<compile_context>
chip_gen: v5e
topology: v5e:2x2
jax: 0.10.0
libtpu: 0.0.40
codegen_flags: <defaults>
</compile_context>

<pallas_src>
import functools

import jax
import jax.numpy as jnp
from jax.experimental import pallas as pl
from jax.experimental.pallas import tpu as pltpu


# ---------------------------------------------------------------------------
# Kernel 1: fused GEMM + bias (drives the k=2,s=2 transposed convolution)
# ---------------------------------------------------------------------------
def _matmul_bias_kernel(x_ref, w_ref, b_ref, o_ref):
    acc = jnp.dot(x_ref[...], w_ref[...], preferred_element_type=jnp.float32)
    acc = acc + b_ref[...]                     # (1, N) broadcast over rows, f32
    o_ref[...] = acc.astype(o_ref.dtype)


def matmul_bias(x, w, b, *, out_dtype=jnp.bfloat16, tm=128):
    """(M, K) @ (K, N) + b.  bf16 operands, f32 accumulation, no K/N padding.

    K and N use full-dim blocks (for U-Net sizes the transposed-conv weight is
    at most ~4 MiB bf16, well inside VMEM), M is tiled on the grid.
    """
    M, K = x.shape
    N = w.shape[1]
    x = x.astype(jnp.bfloat16)
    w = w.astype(jnp.bfloat16)
    b = b.astype(jnp.float32).reshape(1, N)

    TM = tm if M >= tm else M
    Mp = pl.cdiv(M, TM) * TM
    if Mp != M:
        # TODO(synk): mask the last row tile instead of padding M.
        x = jnp.pad(x, ((0, Mp - M), (0, 0)))

    out = pl.pallas_call(
        _matmul_bias_kernel,
        out_shape=jax.ShapeDtypeStruct((Mp, N), out_dtype),
        grid=(Mp // TM,),
        in_specs=[
            pl.BlockSpec((TM, K), lambda i: (i, 0)),
            pl.BlockSpec((K, N), lambda i: (0, 0)),
            pl.BlockSpec((1, N), lambda i: (0, 0)),
        ],
        out_specs=pl.BlockSpec((TM, N), lambda i: (i, 0)),
        compiler_params=pltpu.CompilerParams(
            dimension_semantics=("parallel",),
            vmem_limit_bytes=64 * 1024 * 1024),
        cost_estimate=pl.CostEstimate(
            flops=2 * Mp * K * N, transcendentals=0,
            bytes_accessed=2 * (Mp * K + K * N + Mp * N)),
    )(x, w, b)
    return out[:M] if Mp != M else out


# ---------------------------------------------------------------------------
# Kernel 2: fused Conv_Block = (conv3x3 + ReLU) * 2
#           in-kernel im2col, split-K first conv (no channel concat in HBM),
#           intermediate activation kept in VMEM scratch.
# ---------------------------------------------------------------------------
def _conv_block_kernel(x2_ref, x1_ref, w1a_ref, w1b_ref, b1_ref,
                       w2_ref, b2_ref, o_ref, t_ref, *, TH, H, W):
    i = pl.program_id(1)
    row0 = pl.multiple_of(i * TH, TH)       # window start in the pad-2 row frame
    THp = TH + 2                            # conv1 rows incl. conv2 halo rows
    Cout = o_ref.shape[-1]

    # ------------- conv1 (+bias+ReLU) on THp rows x W cols --------------------
    # Inputs are spatially padded by (2 rows, 1 col); the two channel groups
    # (skip connection x2, upsampled x1) accumulate into the same f32 acc,
    # which implements cat([x2, x1], dim=channels) without materializing it.
    x2w = x2_ref[0, pl.ds(row0, TH + 4), :, :]      # (TH+4, W+2, C2) bf16
    x1w = x1_ref[0, pl.ds(row0, TH + 4), :, :]      # (TH+4, W+2, C1) bf16

    acc1 = jnp.zeros((THp * W, Cout), jnp.float32)
    for dy in range(3):
        for dx in range(3):
            k = dy * 3 + dx
            p2 = x2w[dy:dy + THp, dx:dx + W, :].reshape(THp * W, -1)
            p1 = x1w[dy:dy + THp, dx:dx + W, :].reshape(THp * W, -1)
            acc1 = acc1 + jnp.dot(p2, w1a_ref[k],
                                  preferred_element_type=jnp.float32)
            acc1 = acc1 + jnp.dot(p1, w1b_ref[k],
                                  preferred_element_type=jnp.float32)
    a1 = jnp.maximum(acc1 + b1_ref[...], 0.0).reshape(THp, W, Cout)

    # Halo rows outside the image must be ZERO (conv2 uses zero padding).
    r = (row0 - 1) + jax.lax.broadcasted_iota(jnp.int32, (THp, W, Cout), 0)
    a1 = jnp.where((r >= 0) & (r < H), a1, 0.0)

    # Stage the intermediate activation (bf16) in VMEM with a zero column halo.
    t_ref[...] = jnp.zeros_like(t_ref)
    t_ref[:, 1:W + 1, :] = a1.astype(t_ref.dtype)

    # ------------- conv2 (+bias+ReLU) on TH rows x W cols ---------------------
    tv = t_ref[...]                                  # (TH+2, W+2, Cout) bf16
    acc2 = jnp.zeros((TH * W, Cout), jnp.float32)
    for dy in range(3):
        for dx in range(3):
            p = tv[dy:dy + TH, dx:dx + W, :].reshape(TH * W, -1)
            acc2 = acc2 + jnp.dot(p, w2_ref[dy * 3 + dx],
                                  preferred_element_type=jnp.float32)
    y = jnp.maximum(acc2 + b2_ref[...], 0.0)
    o_ref[0] = y.reshape(TH, W, Cout).astype(o_ref.dtype)


def conv_block_fused(x2, x1, w1a, w1b, b1, w2, b2):
    """x2: (B,H,W,C2), x1: (B,H,W,C1) NHWC -> (B,H,W,Cout) f32 (two conv3x3+ReLU)."""
    B, H, W, C2 = x2.shape
    C1 = x1.shape[-1]
    Cout = w1a.shape[-1]
    TH = 8 if H % 8 == 0 else H             # row tile; 2 recomputed halo rows/tile

    # Spatial halo pads only (rows by 2: conv1 halo for conv2; cols by 1: conv1 pad).
    x2p = jnp.pad(x2.astype(jnp.bfloat16), ((0, 0), (2, 2), (1, 1), (0, 0)))
    x1p = jnp.pad(x1.astype(jnp.bfloat16), ((0, 0), (2, 2), (1, 1), (0, 0)))

    # TODO(synk): for very large H*W*C tile the input rows via manual DMA halos
    # instead of keeping the whole (padded) image block resident in VMEM.
    kernel = functools.partial(_conv_block_kernel, TH=TH, H=H, W=W)
    flops = 2 * B * H * W * 9 * ((C2 + C1) * Cout + Cout * Cout)
    bytes_accessed = int((x2p.size + x1p.size) * 2
                         + (w1a.size + w1b.size + w2.size) * 2
                         + B * H * W * Cout * 4)

    return pl.pallas_call(
        kernel,
        out_shape=jax.ShapeDtypeStruct((B, H, W, Cout), jnp.float32),
        grid=(B, H // TH),
        in_specs=[
            pl.BlockSpec((1, H + 4, W + 2, C2), lambda b, i: (b, 0, 0, 0)),
            pl.BlockSpec((1, H + 4, W + 2, C1), lambda b, i: (b, 0, 0, 0)),
            pl.BlockSpec((9, C2, Cout), lambda b, i: (0, 0, 0)),
            pl.BlockSpec((9, C1, Cout), lambda b, i: (0, 0, 0)),
            pl.BlockSpec((1, Cout), lambda b, i: (0, 0)),
            pl.BlockSpec((9, Cout, Cout), lambda b, i: (0, 0, 0)),
            pl.BlockSpec((1, Cout), lambda b, i: (0, 0)),
        ],
        out_specs=pl.BlockSpec((1, TH, W, Cout), lambda b, i: (b, i, 0, 0)),
        scratch_shapes=[pltpu.VMEM((TH + 2, W + 2, Cout), jnp.bfloat16)],
        compiler_params=pltpu.CompilerParams(
            dimension_semantics=("parallel", "arbitrary"),
            vmem_limit_bytes=64 * 1024 * 1024),
        cost_estimate=pl.CostEstimate(flops=flops, transcendentals=0,
                                      bytes_accessed=bytes_accessed),
    )(x2p, x1p,
      w1a.astype(jnp.bfloat16), w1b.astype(jnp.bfloat16),
      b1.astype(jnp.float32).reshape(1, Cout),
      w2.astype(jnp.bfloat16),
      b2.astype(jnp.float32).reshape(1, Cout))


# ---------------------------------------------------------------------------
# Bilinear resize (align_corners=True) — only used when it is NOT the identity.
# ---------------------------------------------------------------------------
def _bilinear_matrix(n_in, n_out):
    scale = 0.0 if n_out == 1 else (n_in - 1) / (n_out - 1)
    src = jnp.arange(n_out, dtype=jnp.float32) * scale
    lo = jnp.clip(jnp.floor(src).astype(jnp.int32), 0, n_in - 1)
    hi = jnp.clip(lo + 1, 0, n_in - 1)
    frac = src - lo.astype(jnp.float32)
    m = jnp.zeros((n_out, n_in), jnp.float32)
    m = m.at[jnp.arange(n_out), lo].add(1.0 - frac)
    m = m.at[jnp.arange(n_out), hi].add(frac)
    return m


def upsample_bilinear_align_corners(x_nhwc, out_h, out_w):
    # TODO(synk): general-size resize stays in XLA (rare path; the common U-Net
    # 2x case is the identity and is skipped by the caller).
    _, h, w, _ = x_nhwc.shape
    mh = _bilinear_matrix(h, out_h)
    mw = _bilinear_matrix(w, out_w)
    y = jnp.einsum('ah,bw,nhwc->nabc', mh, mw, x_nhwc.astype(jnp.float32))
    return y.astype(x_nhwc.dtype)


# ---------------------------------------------------------------------------
# Upconv_Block forward
# ---------------------------------------------------------------------------
def upconv_block_forward(params, x1_nchw, x2_nchw):
    """x1: (B, in_ch, H1, W1), x2: (B, in_ch//2, H2, W2) NCHW -> (B, out_ch, H2, W2)."""
    x1 = jnp.transpose(x1_nchw, (0, 2, 3, 1))            # NHWC
    x2 = jnp.transpose(x2_nchw, (0, 2, 3, 1))            # NHWC
    B, H1, W1, Cin = x1.shape
    _, H2, W2, C2 = x2.shape
    Cmid = Cin // 2

    # --- ConvTranspose2d(in_ch, in_ch//2, k=2, s=2): per-pixel GEMM -----------
    w_up = params['up_w']                                # (Cin, Cmid, 2, 2)
    w2d = jnp.transpose(w_up, (0, 2, 3, 1)).reshape(Cin, 4 * Cmid)  # col=(di,dj,oc)
    b2d = jnp.tile(params['up_b'], 4)
    y2d = matmul_bias(x1.reshape(B * H1 * W1, Cin), w2d, b2d)        # bf16 out
    y = y2d.reshape(B, H1, W1, 2, 2, Cmid)
    # TODO(synk): fold this pixel-shuffle into the consumer kernel's BlockSpec
    # / a strided in-kernel store instead of an XLA transpose.
    x1_up = jnp.transpose(y, (0, 1, 3, 2, 4, 5)).reshape(B, 2 * H1, 2 * W1, Cmid)

    # --- UpsamplingBilinear2d(size=x2 spatial), align_corners=True ------------
    if (2 * H1, 2 * W1) != (H2, W2):                     # identity otherwise
        x1_up = upsample_bilinear_align_corners(x1_up, H2, W2)

    # --- Conv_Block on the implicit concat [x2, x1_up] (channel-split K) ------
    w1 = params['c1_w']                                  # (out_ch, Cin, 3, 3)
    out_ch = w1.shape[0]
    w1a = jnp.transpose(w1[:, :C2], (2, 3, 1, 0)).reshape(9, C2, out_ch)
    w1b = jnp.transpose(w1[:, C2:], (2, 3, 1, 0)).reshape(9, Cmid, out_ch)
    w2c = jnp.transpose(params['c2_w'], (2, 3, 1, 0)).reshape(9, out_ch, out_ch)
    out = conv_block_fused(x2, x1_up, w1a, w1b, params['c1_b'],
                           w2c, params['c2_b'])
    return jnp.transpose(out, (0, 3, 1, 2))              # back to NCHW


def init_params(key, in_ch, out_ch):
    ks = jax.random.split(key, 6)
    mid = in_ch // 2
    return {
        # ConvTranspose2d weight layout: (in_ch, out_ch, kH, kW)
        'up_w': 0.1 * jax.random.normal(ks[0], (in_ch, mid, 2, 2), jnp.float32),
        'up_b': 0.1 * jax.random.normal(ks[1], (mid,), jnp.float32),
        # Conv2d weight layout: (out_ch, in_ch, kH, kW)
        'c1_w': 0.1 * jax.random.normal(ks[2], (out_ch, in_ch, 3, 3), jnp.float32),
        'c1_b': 0.1 * jax.random.normal(ks[3], (out_ch,), jnp.float32),
        'c2_w': 0.1 * jax.random.normal(ks[4], (out_ch, out_ch, 3, 3), jnp.float32),
        'c2_b': 0.1 * jax.random.normal(ks[5], (out_ch,), jnp.float32),
    }


# ---------------------------------------------------------------------------
# Pure-XLA reference (operands rounded to bf16 to match kernel numerics)
# ---------------------------------------------------------------------------
def reference_forward(params, x1_nchw, x2_nchw):
    f32 = jnp.float32
    rb = lambda a: a.astype(jnp.bfloat16).astype(f32)
    x1, x2 = rb(x1_nchw), rb(x2_nchw)
    w_up = rb(params['up_w'])
    B, Cin, H1, W1 = x1.shape
    Cmid = w_up.shape[1]
    # ConvTranspose2d k=2 s=2: each input pixel scatters a 2x2 output block.
    y = jnp.einsum('bihw,iodc->bohdwc', x1, w_up).reshape(B, Cmid, 2 * H1, 2 * W1)
    y = rb(y + params['up_b'].astype(f32)[None, :, None, None])
    x = jnp.concatenate([x2, y], axis=1)

    def conv3x3_relu(x, w, b):
        out = jax.lax.conv_general_dilated(
            x, rb(w), (1, 1), 'SAME',
            dimension_numbers=('NCHW', 'OIHW', 'NCHW'),
            precision=jax.lax.Precision.HIGHEST)
        return jnp.maximum(out + b.astype(f32)[None, :, None, None], 0.0)

    x = conv3x3_relu(x, params['c1_w'], params['c1_b'])
    x = conv3x3_relu(x, params['c2_w'], params['c2_b'])
    return x


if __name__ == "__main__":
    key = jax.random.PRNGKey(0)
    in_ch, out_ch = 8, 4
    B, H1, W1 = 2, 8, 8            # low-res decoder feature
    H2, W2 = 16, 16                # skip-connection feature (2x spatial)

    kx1, kx2, kp = jax.random.split(key, 3)
    x1 = jax.random.normal(kx1, (B, in_ch, H1, W1), jnp.float32)       # NCHW
    x2 = jax.random.normal(kx2, (B, in_ch // 2, H2, W2), jnp.float32)  # NCHW
    params = init_params(kp, in_ch, out_ch)

    out = jax.block_until_ready(jax.jit(upconv_block_forward)(params, x1, x2))

    assert out.shape == (B, out_ch, H2, W2), out.shape
    assert bool(jnp.all(jnp.isfinite(out)))
    assert bool(jnp.all(out >= 0.0))           # final ReLU

    ref = reference_forward(params, x1, x2)
    err = float(jnp.max(jnp.abs(out - ref)))
    assert err < 5e-2, f"max abs err vs reference: {err}"

    print("KERNEL_OK")
</pallas_src>

<mosaic_0001>
module attributes {stable_mosaic.version = 11 : i64} {
  func.func @_matmul_bias_kernel(%arg0: i32, %arg1: memref<128x8xbf16, #tpu.memory_space<vmem>>, %arg2: memref<8x16xbf16, #tpu.memory_space<vmem>>, %arg3: memref<1x16xf32, #tpu.memory_space<vmem>>, %arg4: memref<128x16xbf16, #tpu.memory_space<vmem>>) attributes {dimension_semantics = [#tpu.dimension_semantics<parallel>], iteration_bounds = array<i64: 1>, scalar_prefetch = 0 : i64, scratch_operands = 0 : i64, tpu.core_type = #tpu.core_type<tc>, window_params = [{transform_indices = @transform_0, window_bounds = array<i64: 128, 8>}, {pipeline_mode = #tpu.pipeline_mode<synchronous>, transform_indices = @transform_1, window_bounds = array<i64: 8, 16>}, {pipeline_mode = #tpu.pipeline_mode<synchronous>, transform_indices = @transform_2, window_bounds = array<i64: 1, 16>}, {transform_indices = @transform_3, window_bounds = array<i64: 128, 16>}]} {
    %c0 = arith.constant 0 : index
    %c0_0 = arith.constant 0 : index
    %0 = vector.load %arg1[%c0, %c0_0] : memref<128x8xbf16, #tpu.memory_space<vmem>>, vector<128x8xbf16>
    %c0_1 = arith.constant 0 : index
    %c0_2 = arith.constant 0 : index
    %1 = vector.load %arg2[%c0_1, %c0_2] : memref<8x16xbf16, #tpu.memory_space<vmem>>, vector<8x16xbf16>
    %cst = arith.constant dense<0.000000e+00> : vector<128x16xf32>
    %2 = tpu.matmul %0, %1, %cst {dimension_numbers = #tpu.dot_dimension_numbers<[1], [0], [0], [1], [0, 0, 1, 1], [], []>} : vector<128x8xbf16>, vector<8x16xbf16>, vector<128x16xf32> -> vector<128x16xf32>
    %c0_3 = arith.constant 0 : index
    %c0_4 = arith.constant 0 : index
    %3 = vector.load %arg3[%c0_3, %c0_4] : memref<1x16xf32, #tpu.memory_space<vmem>>, vector<1x16xf32>
    %4 = vector.broadcast %3 : vector<1x16xf32> to vector<128x16xf32>
    %5 = arith.addf %2, %4 : vector<128x16xf32>
    %6 = arith.truncf %5 : vector<128x16xf32> to vector<128x16xbf16>
    %c0_5 = arith.constant 0 : index
    %c0_6 = arith.constant 0 : index
    %7 = vector.load %arg4[%c0_5, %c0_6] : memref<128x16xbf16, #tpu.memory_space<vmem>>, vector<128x16xbf16>
    tpu.vector_store %arg4[%c0_5, %c0_6], %6 {strides = array<i32>} : memref<128x16xbf16, #tpu.memory_space<vmem>>, vector<128x16xbf16>,
    return
  }
  func.func @transform_0(%arg0: i32) -> (i32, i32) {
    %c0_i32 = arith.constant 0 : i32
    %c0_i32_0 = arith.constant 0 : i32
    return %arg0, %c0_i32 : i32, i32
  }
  func.func @transform_1(%arg0: i32) -> (i32, i32) {
    %c0_i32 = arith.constant 0 : i32
    %c0_i32_0 = arith.constant 0 : i32
    %c0_i32_1 = arith.constant 0 : i32
    return %c0_i32, %c0_i32_0 : i32, i32
  }
  func.func @transform_2(%arg0: i32) -> (i32, i32) {
    %c0_i32 = arith.constant 0 : i32
    %c0_i32_0 = arith.constant 0 : i32
    %c0_i32_1 = arith.constant 0 : i32
    return %c0_i32, %c0_i32_0 : i32, i32
  }
  func.func @transform_3(%arg0: i32) -> (i32, i32) {
    %c0_i32 = arith.constant 0 : i32
    %c0_i32_0 = arith.constant 0 : i32
    return %arg0, %c0_i32 : i32, i32
  }
}

module attributes {stable_mosaic.version = 11 : i64} {
  func.func @_conv_block_kernel(%arg0: i32, %arg1: i32, %arg2: memref<1x20x18x4xbf16, #tpu.memory_space<vmem>>, %arg3: memref<1x20x18x4xbf16, #tpu.memory_space<vmem>>, %arg4: memref<9x4x4xbf16, #tpu.memory_space<vmem>>, %arg5: memref<9x4x4xbf16, #tpu.memory_space<vmem>>, %arg6: memref<1x4xf32, #tpu.memory_space<vmem>>, %arg7: memref<9x4x4xbf16, #tpu.memory_space<vmem>>, %arg8: memref<1x4xf32, #tpu.memory_space<vmem>>, %arg9: memref<1x8x16x4xf32, #tpu.memory_space<vmem>>, %arg10: memref<10x18x4xbf16, #tpu.memory_space<vmem>>) attributes {dimension_semantics = [#tpu.dimension_semantics<parallel>, #tpu.dimension_semantics<arbitrary>], iteration_bounds = array<i64: 2, 2>, scalar_prefetch = 0 : i64, scratch_operands = 1 : i64, tpu.core_type = #tpu.core_type<tc>, window_params = [{transform_indices = @transform_0, window_bounds = array<i64: 1, 20, 18, 4>}, {transform_indices = @transform_1, window_bounds = array<i64: 1, 20, 18, 4>}, {pipeline_mode = #tpu.pipeline_mode<synchronous>, transform_indices = @transform_2, window_bounds = array<i64: 9, 4, 4>}, {pipeline_mode = #tpu.pipeline_mode<synchronous>, transform_indices = @transform_3, window_bounds = array<i64: 9, 4, 4>}, {pipeline_mode = #tpu.pipeline_mode<synchronous>, transform_indices = @transform_4, window_bounds = array<i64: 1, 4>}, {pipeline_mode = #tpu.pipeline_mode<synchronous>, transform_indices = @transform_5, window_bounds = array<i64: 9, 4, 4>}, {pipeline_mode = #tpu.pipeline_mode<synchronous>, transform_indices = @transform_6, window_bounds = array<i64: 1, 4>}, {transform_indices = @transform_7, window_bounds = array<i64: 1, 8, 16, 4>}]} {
    %c8_i32 = arith.constant 8 : i32
    %0 = arith.muli %arg1, %c8_i32 : i32
    %1 = tpu.assume_multiple %0, 8 : i32
    %c0 = arith.constant 0 : index
    %2 = arith.index_cast %1 : i32 to index
    %c0_0 = arith.constant 0 : index
    %c0_1 = arith.constant 0 : index
    %3 = vector.load %arg2[%c0, %2, %c0_0, %c0_1] : memref<1x20x18x4xbf16, #tpu.memory_space<vmem>>, vector<1x12x18x4xbf16>
    %4 = vector.shape_cast %3 : vector<1x12x18x4xbf16> to vector<12x18x4xbf16>
    %c0_2 = arith.constant 0 : index
    %5 = arith.index_cast %1 : i32 to index
    %c0_3 = arith.constant 0 : index
    %c0_4 = arith.constant 0 : index
    %6 = vector.load %arg3[%c0_2, %5, %c0_3, %c0_4] : memref<1x20x18x4xbf16, #tpu.memory_space<vmem>>, vector<1x12x18x4xbf16>
    %7 = vector.shape_cast %6 : vector<1x12x18x4xbf16> to vector<12x18x4xbf16>
    %cst = arith.constant 0.000000e+00 : f32
    %8 = vector.broadcast %cst : f32 to vector<160x4xf32>
    %9 = vector.extract_strided_slice %4 {offsets = [0, 0, 0], sizes = [10, 16, 4], strides = [1, 1, 1]} : vector<12x18x4xbf16> to vector<10x16x4xbf16>
    %10 = vector.shape_cast %9 : vector<10x16x4xbf16> to vector<160x4xbf16>
    %11 = vector.extract_strided_slice %7 {offsets = [0, 0, 0], sizes = [10, 16, 4], strides = [1, 1, 1]} : vector<12x18x4xbf16> to vector<10x16x4xbf16>
    %12 = vector.shape_cast %11 : vector<10x16x4xbf16> to vector<160x4xbf16>
    %c0_5 = arith.constant 0 : index
    %c0_6 = arith.constant 0 : index
    %c0_7 = arith.constant 0 : index
    %13 = vector.load %arg4[%c0_5, %c0_6, %c0_7] : memref<9x4x4xbf16, #tpu.memory_space<vmem>>, vector<1x4x4xbf16>
    %14 = vector.shape_cast %13 : vector<1x4x4xbf16> to vector<4x4xbf16>
    %cst_8 = arith.constant dense<0.000000e+00> : vector<160x4xf32>
    %15 = tpu.matmul %10, %14, %cst_8 {dimension_numbers = #tpu.dot_dimension_numbers<[1], [0], [0], [1], [0, 0, 1, 1], [], []>} : vector<160x4xbf16>, vector<4x4xbf16>, vector<160x4xf32> -> vector<160x4xf32>
    %16 = arith.addf %8, %15 : vector<160x4xf32>
    %c0_9 = arith.constant 0 : index
    %c0_10 = arith.constant 0 : index
    %c0_11 = arith.constant 0 : index
    %17 = vector.load %arg5[%c0_9, %c0_10, %c0_11] : memref<9x4x4xbf16, #tpu.memory_space<vmem>>, vector<1x4x4xbf16>
    %18 = vector.shape_cast %17 : vector<1x4x4xbf16> to vector<4x4xbf16>
    %cst_12 = arith.constant dense<0.000000e+00> : vector<160x4xf32>
    %19 = tpu.matmul %12, %18, %cst_12 {dimension_numbers = #tpu.dot_dimension_numbers<[1], [0], [0], [1], [0, 0, 1, 1], [], []>} : vector<160x4xbf16>, vector<4x4xbf16>, vector<160x4xf32> -> vector<160x4xf32>
    %20 = arith.addf %16, %19 : vector<160x4xf32>
    %21 = vector.extract_strided_slice %4 {offsets = [0, 1, 0], sizes = [10, 16, 4], strides = [1, 1, 1]} : vector<12x18x4xbf16> to vector<10x16x4xbf16>
    %22 = vector.shape_cast %21 : vector<10x16x4xbf16> to vector<160x4xbf16>
    %23 = vector.extract_strided_slice %7 {offsets = [0, 1, 0], sizes = [10, 16, 4], strides = [1, 1, 1]} : vector<12x18x4xbf16> to vector<10x16x4xbf16>
    %24 = vector.shape_cast %23 : vector<10x16x4xbf16> to vector<160x4xbf16>
    %c1 = arith.constant 1 : index
    %c0_13 = arith.constant 0 : index
    %c0_14 = arith.constant 0 : index
    %25 = vector.load %arg4[%c1, %c0_13, %c0_14] : memref<9x4x4xbf16, #tpu.memory_space<vmem>>, vector<1x4x4xbf16>
    %26 = vector.shape_cast %25 : vector<1x4x4xbf16> to vector<4x4xbf16>
    %cst_15 = arith.constant dense<0.000000e+00> : vector<160x4xf32>
    %27 = tpu.matmul %22, %26, %cst_15 {dimension_numbers = #tpu.dot_dimension_numbers<[1], [0], [0], [1], [0, 0, 1, 1], [], []>} : vector<160x4xbf16>, vector<4x4xbf16>, vector<160x4xf32> -> vector<160x4xf32>
    %28 = arith.addf %20, %27 : vector<160x4xf32>
    %c1_16 = arith.constant 1 : index
    %c0_17 = arith.constant 0 : index
    %c0_18 = arith.constant 0 : index
    %29 = vector.load %arg5[%c1_16, %c0_17, %c0_18] : memref<9x4x4xbf16, #tpu.memory_space<vmem>>, vector<1x4x4xbf16>
    %30 = vector.shape_cast %29 : vector<1x4x4xbf16> to vector<4x4xbf16>
    %cst_19 = arith.constant dense<0.000000e+00> : vector<160x4xf32>
    %31 = tpu.matmul %24, %30, %cst_19 {dimension_numbers = #tpu.dot_dimension_numbers<[1], [0], [0], [1], [0, 0, 1, 1], [], []>} : vector<160x4xbf16>, vector<4x4xbf16>, vector<160x4xf32> -> vector<160x4xf32>
    %32 = arith.addf %28, %31 : vector<160x4xf32>
    %33 = vector.extract_strided_slice %4 {offsets = [0, 2, 0], sizes = [10, 16, 4], strides = [1, 1, 1]} : vector<12x18x4xbf16> to vector<10x16x4xbf16>
    %34 = vector.shape_cast %33 : vector<10x16x4xbf16> to vector<160x4xbf16>
    %35 = vector.extract_strided_slice %7 {offsets = [0, 2, 0], sizes = [10, 16, 4], strides = [1, 1, 1]} : vector<12x18x4xbf16> to vector<10x16x4xbf16>
    %36 = vector.shape_cast %35 : vector<10x16x4xbf16> to vector<160x4xbf16>
    %c2 = arith.constant 2 : index
    %c0_20 = arith.constant 0 : index
    %c0_21 = arith.constant 0 : index
    %37 = vector.load %arg4[%c2, %c0_20, %c0_21] : memref<9x4x4xbf16, #tpu.memory_space<vmem>>, vector<1x4x4xbf16>
    %38 = vector.shape_cast %37 : vector<1x4x4xbf16> to vector<4x4xbf16>
    %cst_22 = arith.constant dense<0.000000e+00> : vector<160x4xf32>
    %39 = tpu.matmul %34, %38, %cst_22 {dimension_numbers = #tpu.dot_dimension_numbers<[1], [0], [0], [1], [0, 0, 1, 1], [], []>} : vector<160x4xbf16>, vector<4x4xbf16>, vector<160x4xf32> -> vector<160x4xf32>
    %40 = arith.addf %32, %39 : vector<160x4xf32>
    %c2_23 = arith.constant 2 : index
    %c0_24 = arith.constant 0 : index
    %c0_25 = arith.constant 0 : index
    %41 = vector.load %arg5[%c2_23, %c0_24, %c0_25] : memref<9x4x4xbf16, #tpu.memory_space<vmem>>, vector<1x4x4xbf16>
    %42 = vector.shape_cast %41 : vector<1x4x4xbf16> to vector<4x4xbf16>
    %cst_26 = arith.constant dense<0.000000e+00> : vector<160x4xf32>
    %43 = tpu.matmul %36, %42, %cst_26 {dimension_numbers = #tpu.dot_dimension_numbers<[1], [0], [0], [1], [0, 0, 1, 1], [], []>} : vector<160x4xbf16>, vector<4x4xbf16>, vector<160x4xf32> -> vector<160x4xf32>
    %44 = arith.addf %40, %43 : vector<160x4xf32>
    %45 = vector.extract_strided_slice %4 {offsets = [1, 0, 0], sizes = [10, 16, 4], strides = [1, 1, 1]} : vector<12x18x4xbf16> to vector<10x16x4xbf16>
    %46 = vector.shape_cast %45 : vector<10x16x4xbf16> to vector<160x4xbf16>
    %47 = vector.extract_strided_slice %7 {offsets = [1, 0, 0], sizes = [10, 16, 4], strides = [1, 1, 1]} : vector<12x18x4xbf16> to vector<10x16x4xbf16>
    %48 = vector.shape_cast %47 : vector<10x16x4xbf16> to vector<160x4xbf16>
    %c3 = arith.constant 3 : index
    %c0_27 = arith.constant 0 : index
    %c0_28 = arith.constant 0 : index
    %49 = vector.load %arg4[%c3, %c0_27, %c0_28] : memref<9x4x4xbf16, #tpu.memory_space<vmem>>, vector<1x4x4xbf16>
    %50 = vector.shape_cast %49 : vector<1x4x4xbf16> to vector<4x4xbf16>
    %cst_29 = arith.constant dense<0.000000e+00> : vector<160x4xf32>
    %51 = tpu.matmul %46, %50, %cst_29 {dimension_numbers = #tpu.dot_dimension_numbers<[1], [0], [0], [1], [0, 0, 1, 1], [], []>} : vector<160x4xbf16>, vector<4x4xbf16>, vector<160x4xf32> -> vector<160x4xf32>
    %52 = arith.addf %44, %51 : vector<160x4xf32>
    %c3_30 = arith.constant 3 : index
    %c0_31 = arith.constant 0 : index
    %c0_32 = arith.constant 0 : index
    %53 = vector.load %arg5[%c3_30, %c0_31, %c0_32] : memref<9x4x4xbf16, #tpu.memory_space<vmem>>, vector<1x4x4xbf16>
    %54 = vector.shape_cast %53 : vector<1x4x4xbf16> to vector<4x4xbf16>
    %cst_33 = arith.constant dense<0.000000e+00> : vector<160x4xf32>
    %55 = tpu.matmul %48, %54, %cst_33 {dimension_numbers = #tpu.dot_dimension_numbers<[1], [0], [0], [1], [0, 0, 1, 1], [], []>} : vector<160x4xbf16>, vector<4x4xbf16>, vector<160x4xf32> -> vector<160x4xf32>
    %56 = arith.addf %52, %55 : vector<160x4xf32>
    %57 = vector.extract_strided_slice %4 {offsets = [1, 1, 0], sizes = [10, 16, 4], strides = [1, 1, 1]} : vector<12x18x4xbf16> to vector<10x16x4xbf16>
    %58 = vector.shape_cast %57 : vector<10x16x4xbf16> to vector<160x4xbf16>
    %59 = vector.extract_strided_slice %7 {offsets = [1, 1, 0], sizes = [10, 16, 4], strides = [1, 1, 1]} : vector<12x18x4xbf16> to vector<10x16x4xbf16>
    %60 = vector.shape_cast %59 : vector<10x16x4xbf16> to vector<160x4xbf16>
    %c4 = arith.constant 4 : index
    %c0_34 = arith.constant 0 : index
    %c0_35 = arith.constant 0 : index
    %61 = vector.load %arg4[%c4, %c0_34, %c0_35] : memref<9x4x4xbf16, #tpu.memory_space<vmem>>, vector<1x4x4xbf16>
    %62 = vector.shape_cast %61 : vector<1x4x4xbf16> to vector<4x4xbf16>
    %cst_36 = arith.constant dense<0.000000e+00> : vector<160x4xf32>
    %63 = tpu.matmul %58, %62, %cst_36 {dimension_numbers = #tpu.dot_dimension_numbers<[1], [0], [0], [1], [0, 0, 1, 1], [], []>} : vector<160x4xbf16>, vector<4x4xbf16>, vector<160x4xf32> -> vector<160x4xf32>
    %64 = arith.addf %56, %63 : vector<160x4xf32>
    %c4_37 = arith.constant 4 : index
    %c0_38 = arith.constant 0 : index
    %c0_39 = arith.constant 0 : index
    %65 = vector.load %arg5[%c4_37, %c0_38, %c0_39] : memref<9x4x4xbf16, #tpu.memory_space<vmem>>, vector<1x4x4xbf16>
    %66 = vector.shape_cast %65 : vector<1x4x4xbf16> to vector<4x4xbf16>
    %cst_40 = arith.constant dense<0.000000e+00> : vector<160x4xf32>
    %67 = tpu.matmul %60, %66, %cst_40 {dimension_numbers = #tpu.dot_dimension_numbers<[1], [0], [0], [1], [0, 0, 1, 1], [], []>} : vector<160x4xbf16>, vector<4x4xbf16>, vector<160x4xf32> -> vector<160x4xf32>
    %68 = arith.addf %64, %67 : vector<160x4xf32>
    %69 = vector.extract_strided_slice %4 {offsets = [1, 2, 0], sizes = [10, 16, 4], strides = [1, 1, 1]} : vector<12x18x4xbf16> to vector<10x16x4xbf16>
    %70 = vector.shape_cast %69 : vector<10x16x4xbf16> to vector<160x4xbf16>
    %71 = vector.extract_strided_slice %7 {offsets = [1, 2, 0], sizes = [10, 16, 4], strides = [1, 1, 1]} : vector<12x18x4xbf16> to vector<10x16x4xbf16>
    %72 = vector.shape_cast %71 : vector<10x16x4xbf16> to vector<160x4xbf16>
    %c5 = arith.constant 5 : index
    %c0_41 = arith.constant 0 : index
    %c0_42 = arith.constant 0 : index
    %73 = vector.load %arg4[%c5, %c0_41, %c0_42] : memref<9x4x4xbf16, #tpu.memory_space<vmem>>, vector<1x4x4xbf16>
    %74 = vector.shape_cast %73 : vector<1x4x4xbf16> to vector<4x4xbf16>
    %cst_43 = arith.constant dense<0.000000e+00> : vector<160x4xf32>
    %75 = tpu.matmul %70, %74, %cst_43 {dimension_numbers = #tpu.dot_dimension_numbers<[1], [0], [0], [1], [0, 0, 1, 1], [], []>} : vector<160x4xbf16>, vector<4x4xbf16>, vector<160x4xf32> -> vector<160x4xf32>
    %76 = arith.addf %68, %75 : vector<160x4xf32>
    %c5_44 = arith.constant 5 : index
    %c0_45 = arith.constant 0 : index
    %c0_46 = arith.constant 0 : index
    %77 = vector.load %arg5[%c5_44, %c0_45, %c0_46] : memref<9x4x4xbf16, #tpu.memory_space<vmem>>, vector<1x4x4xbf16>
    %78 = vector.shape_cast %77 : vector<1x4x4xbf16> to vector<4x4xbf16>
    %cst_47 = arith.constant dense<0.000000e+00> : vector<160x4xf32>
    %79 = tpu.matmul %72, %78, %cst_47 {dimension_numbers = #tpu.dot_dimension_numbers<[1], [0], [0], [1], [0, 0, 1, 1], [], []>} : vector<160x4xbf16>, vector<4x4xbf16>, vector<160x4xf32> -> vector<160x4xf32>
    %80 = arith.addf %76, %79 : vector<160x4xf32>
    %81 = vector.extract_strided_slice %4 {offsets = [2, 0, 0], sizes = [10, 16, 4], strides = [1, 1, 1]} : vector<12x18x4xbf16> to vector<10x16x4xbf16>
    %82 = vector.shape_cast %81 : vector<10x16x4xbf16> to vector<160x4xbf16>
    %83 = vector.extract_strided_slice %7 {offsets = [2, 0, 0], sizes = [10, 16, 4], strides = [1, 1, 1]} : vector<12x18x4xbf16> to vector<10x16x4xbf16>
    %84 = vector.shape_cast %83 : vector<10x16x4xbf16> to vector<160x4xbf16>
    %c6 = arith.constant 6 : index
    %c0_48 = arith.constant 0 : index
    %c0_49 = arith.constant 0 : index
    %85 = vector.load %arg4[%c6, %c0_48, %c0_49] : memref<9x4x4xbf16, #tpu.memory_space<vmem>>, vector<1x4x4xbf16>
    %86 = vector.shape_cast %85 : vector<1x4x4xbf16> to vector<4x4xbf16>
    %cst_50 = arith.constant dense<0.000000e+00> : vector<160x4xf32>
    %87 = tpu.matmul %82, %86, %cst_50 {dimension_numbers = #tpu.dot_dimension_numbers<[1], [0], [0], [1], [0, 0, 1, 1], [], []>} : vector<160x4xbf16>, vector<4x4xbf16>, vector<160x4xf32> -> vector<160x4xf32>
    %88 = arith.addf %80, %87 : vector<160x4xf32>
    %c6_51 = arith.constant 6 : index
    %c0_52 = arith.constant 0 : index
    %c0_53 = arith.constant 0 : index
    %89 = vector.load %arg5[%c6_51, %c0_52, %c0_53] : memref<9x4x4xbf16, #tpu.memory_space<vmem>>, vector<1x4x4xbf16>
    %90 = vector.shape_cast %89 : vector<1x4x4xbf16> to vector<4x4xbf16>
    %cst_54 = arith.constant dense<0.000000e+00> : vector<160x4xf32>
    %91 = tpu.matmul %84, %90, %cst_54 {dimension_numbers = #tpu.dot_dimension_numbers<[1], [0], [0], [1], [0, 0, 1, 1], [], []>} : vector<160x4xbf16>, vector<4x4xbf16>, vector<160x4xf32> -> vector<160x4xf32>
    %92 = arith.addf %88, %91 : vector<160x4xf32>
    %93 = vector.extract_strided_slice %4 {offsets = [2, 1, 0], sizes = [10, 16, 4], strides = [1, 1, 1]} : vector<12x18x4xbf16> to vector<10x16x4xbf16>
    %94 = vector.shape_cast %93 : vector<10x16x4xbf16> to vector<160x4xbf16>
    %95 = vector.extract_strided_slice %7 {offsets = [2, 1, 0], sizes = [10, 16, 4], strides = [1, 1, 1]} : vector<12x18x4xbf16> to vector<10x16x4xbf16>
    %96 = vector.shape_cast %95 : vector<10x16x4xbf16> to vector<160x4xbf16>
    %c7 = arith.constant 7 : index
    %c0_55 = arith.constant 0 : index
    %c0_56 = arith.constant 0 : index
    %97 = vector.load %arg4[%c7, %c0_55, %c0_56] : memref<9x4x4xbf16, #tpu.memory_space<vmem>>, vector<1x4x4xbf16>
    %98 = vector.shape_cast %97 : vector<1x4x4xbf16> to vector<4x4xbf16>
    %cst_57 = arith.constant dense<0.000000e+00> : vector<160x4xf32>
    %99 = tpu.matmul %94, %98, %cst_57 {dimension_numbers = #tpu.dot_dimension_numbers<[1], [0], [0], [1], [0, 0, 1, 1], [], []>} : vector<160x4xbf16>, vector<4x4xbf16>, vector<160x4xf32> -> vector<160x4xf32>
    %100 = arith.addf %92, %99 : vector<160x4xf32>
    %c7_58 = arith.constant 7 : index
    %c0_59 = arith.constant 0 : index
    %c0_60 = arith.constant 0 : index
    %101 = vector.load %arg5[%c7_58, %c0_59, %c0_60] : memref<9x4x4xbf16, #tpu.memory_space<vmem>>, vector<1x4x4xbf16>
    %102 = vector.shape_cast %101 : vector<1x4x4xbf16> to vector<4x4xbf16>
    %cst_61 = arith.constant dense<0.000000e+00> : vector<160x4xf32>
    %103 = tpu.matmul %96, %102, %cst_61 {dimension_numbers = #tpu.dot_dimension_numbers<[1], [0], [0], [1], [0, 0, 1, 1], [], []>} : vector<160x4xbf16>, vector<4x4xbf16>, vector<160x4xf32> -> vector<160x4xf32>
    %104 = arith.addf %100, %103 : vector<160x4xf32>
    %105 = vector.extract_strided_slice %4 {offsets = [2, 2, 0], sizes = [10, 16, 4], strides = [1, 1, 1]} : vector<12x18x4xbf16> to vector<10x16x4xbf16>
    %106 = vector.shape_cast %105 : vector<10x16x4xbf16> to vector<160x4xbf16>
    %107 = vector.extract_strided_slice %7 {offsets = [2, 2, 0], sizes = [10, 16, 4], strides = [1, 1, 1]} : vector<12x18x4xbf16> to vector<10x16x4xbf16>
    %108 = vector.shape_cast %107 : vector<10x16x4xbf16> to vector<160x4xbf16>
    %c8 = arith.constant 8 : index
    %c0_62 = arith.constant 0 : index
    %c0_63 = arith.constant 0 : index
    %109 = vector.load %arg4[%c8, %c0_62, %c0_63] : memref<9x4x4xbf16, #tpu.memory_space<vmem>>, vector<1x4x4xbf16>
    %110 = vector.shape_cast %109 : vector<1x4x4xbf16> to vector<4x4xbf16>
    %cst_64 = arith.constant dense<0.000000e+00> : vector<160x4xf32>
    %111 = tpu.matmul %106, %110, %cst_64 {dimension_numbers = #tpu.dot_dimension_numbers<[1], [0], [0], [1], [0, 0, 1, 1], [], []>} : vector<160x4xbf16>, vector<4x4xbf16>, vector<160x4xf32> -> vector<160x4xf32>
    %112 = arith.addf %104, %111 : vector<160x4xf32>
    %c8_65 = arith.constant 8 : index
    %c0_66 = arith.constant 0 : index
    %c0_67 = arith.constant 0 : index
    %113 = vector.load %arg5[%c8_65, %c0_66, %c0_67] : memref<9x4x4xbf16, #tpu.memory_space<vmem>>, vector<1x4x4xbf16>
    %114 = vector.shape_cast %113 : vector<1x4x4xbf16> to vector<4x4xbf16>
    %cst_68 = arith.constant dense<0.000000e+00> : vector<160x4xf32>
    %115 = tpu.matmul %108, %114, %cst_68 {dimension_numbers = #tpu.dot_dimension_numbers<[1], [0], [0], [1], [0, 0, 1, 1], [], []>} : vector<160x4xbf16>, vector<4x4xbf16>, vector<160x4xf32> -> vector<160x4xf32>
    %116 = arith.addf %112, %115 : vector<160x4xf32>
    %c0_69 = arith.constant 0 : index
    %c0_70 = arith.constant 0 : index
    %117 = vector.load %arg6[%c0_69, %c0_70] : memref<1x4xf32, #tpu.memory_space<vmem>>, vector<1x4xf32>
    %118 = vector.broadcast %117 : vector<1x4xf32> to vector<160x4xf32>
    %119 = arith.addf %116, %118 : vector<160x4xf32>
    %cst_71 = arith.constant 0.000000e+00 : f32
    %120 = vector.broadcast %cst_71 : f32 to vector<160x4xf32>
    %121 = arith.maximumf %119, %120 : vector<160x4xf32>
    %122 = vector.shape_cast %121 : vector<160x4xf32> to vector<10x16x4xf32>
    %c1_i32 = arith.constant 1 : i32
    %123 = arith.subi %1, %c1_i32 : i32
    %124 = tpu.iota {dimensions = array<i32: 0>} : vector<10x16x4xi32>
    %125 = vector.broadcast %123 : i32 to vector<10x16x4xi32>
    %126 = arith.addi %125, %124 : vector<10x16x4xi32>
    %c0_i32 = arith.constant 0 : i32
    %127 = vector.broadcast %c0_i32 : i32 to vector<10x16x4xi32>
    %128 = arith.cmpi sge, %126, %127 : vector<10x16x4xi32>
    %c16_i32 = arith.constant 16 : i32
    %129 = vector.broadcast %c16_i32 : i32 to vector<10x16x4xi32>
    %130 = arith.cmpi slt, %126, %129 : vector<10x16x4xi32>
    %131 = arith.andi %128, %130 : vector<10x16x4xi1>
    %cst_72 = arith.constant 0.000000e+00 : f32
    %132 = vector.broadcast %cst_72 : f32 to vector<10x16x4xf32>
    %133 = arith.select %131, %122, %132 : vector<10x16x4xi1>, vector<10x16x4xf32>
    %cst_73 = arith.constant 0.000000e+00 : bf16
    %134 = vector.broadcast %cst_73 : bf16 to vector<10x18x4xbf16>
    %c0_74 = arith.constant 0 : index
    %c0_75 = arith.constant 0 : index
    %c0_76 = arith.constant 0 : index
    %135 = vector.load %arg10[%c0_74, %c0_75, %c0_76] : memref<10x18x4xbf16, #tpu.memory_space<vmem>>, vector<10x18x4xbf16>
    tpu.vector_store %arg10[%c0_74, %c0_75, %c0_76], %134 {strides = array<i32>} : memref<10x18x4xbf16, #tpu.memory_space<vmem>>, vector<10x18x4xbf16>,
    %136 = arith.truncf %133 : vector<10x16x4xf32> to vector<10x16x4xbf16>
    %c0_77 = arith.constant 0 : index
    %c1_78 = arith.constant 1 : index
    %c0_79 = arith.constant 0 : index
    %137 = vector.load %arg10[%c0_77, %c1_78, %c0_79] : memref<10x18x4xbf16, #tpu.memory_space<vmem>>, vector<10x16x4xbf16>
    tpu.vector_store %arg10[%c0_77, %c1_78, %c0_79], %136 {strides = array<i32>} : memref<10x18x4xbf16, #tpu.memory_space<vmem>>, vector<10x16x4xbf16>,
    %c0_80 = arith.constant 0 : index
    %c0_81 = arith.constant 0 : index
    %c0_82 = arith.constant 0 : index
    %138 = vector.load %arg10[%c0_80, %c0_81, %c0_82] : memref<10x18x4xbf16, #tpu.memory_space<vmem>>, vector<10x18x4xbf16>
    %cst_83 = arith.constant 0.000000e+00 : f32
    %139 = vector.broadcast %cst_83 : f32 to vector<128x4xf32>
    %140 = vector.extract_strided_slice %138 {offsets = [0, 0, 0], sizes = [8, 16, 4], strides = [1, 1, 1]} : vector<10x18x4xbf16> to vector<8x16x4xbf16>
    %141 = vector.shape_cast %140 : vector<8x16x4xbf16> to vector<128x4xbf16>
    %c0_84 = arith.constant 0 : index
    %c0_85 = arith.constant 0 : index
    %c0_86 = arith.constant 0 : index
    %142 = vector.load %arg7[%c0_84, %c0_85, %c0_86] : memref<9x4x4xbf16, #tpu.memory_space<vmem>>, vector<1x4x4xbf16>
    %143 = vector.shape_cast %142 : vector<1x4x4xbf16> to vector<4x4xbf16>
    %cst_87 = arith.constant dense<0.000000e+00> : vector<128x4xf32>
    %144 = tpu.matmul %141, %143, %cst_87 {dimension_numbers = #tpu.dot_dimension_numbers<[1], [0], [0], [1], [0, 0, 1, 1], [], []>} : vector<128x4xbf16>, vector<4x4xbf16>, vector<128x4xf32> -> vector<128x4xf32>
    %145 = arith.addf %139, %144 : vector<128x4xf32>
    %146 = vector.extract_strided_slice %138 {offsets = [0, 1, 0], sizes = [8, 16, 4], strides = [1, 1, 1]} : vector<10x18x4xbf16> to vector<8x16x4xbf16>
    %147 = vector.shape_cast %146 : vector<8x16x4xbf16> to vector<128x4xbf16>
    %c1_88 = arith.constant 1 : index
    %c0_89 = arith.constant 0 : index
    %c0_90 = arith.constant 0 : index
    %148 = vector.load %arg7[%c1_88, %c0_89, %c0_90] : memref<9x4x4xbf16, #tpu.memory_space<vmem>>, vector<1x4x4xbf16>
    %149 = vector.shape_cast %148 : vector<1x4x4xbf16> to vector<4x4xbf16>
    %cst_91 = arith.constant dense<0.000000e+00> : vector<128x4xf32>
    %150 = tpu.matmul %147, %149, %cst_91 {dimension_numbers = #tpu.dot_dimension_numbers<[1], [0], [0], [1], [0, 0, 1, 1], [], []>} : vector<128x4xbf16>, vector<4x4xbf16>, vector<128x4xf32> -> vector<128x4xf32>
    %151 = arith.addf %145, %150 : vector<128x4xf32>
    %152 = vector.extract_strided_slice %138 {offsets = [0, 2, 0], sizes = [8, 16, 4], strides = [1, 1, 1]} : vector<10x18x4xbf16> to vector<8x16x4xbf16>
    %153 = vector.shape_cast %152 : vector<8x16x4xbf16> to vector<128x4xbf16>
    %c2_92 = arith.constant 2 : index
    %c0_93 = arith.constant 0 : index
    %c0_94 = arith.constant 0 : index
    %154 = vector.load %arg7[%c2_92, %c0_93, %c0_94] : memref<9x4x4xbf16, #tpu.memory_space<vmem>>, vector<1x4x4xbf16>
    %155 = vector.shape_cast %154 : vector<1x4x4xbf16> to vector<4x4xbf16>
    %cst_95 = arith.constant dense<0.000000e+00> : vector<128x4xf32>
    %156 = tpu.matmul %153, %155, %cst_95 {dimension_numbers = #tpu.dot_dimension_numbers<[1], [0], [0], [1], [0, 0, 1, 1], [], []>} : vector<128x4xbf16>, vector<4x4xbf16>, vector<128x4xf32> -> vector<128x4xf32>
    %157 = arith.addf %151, %156 : vector<128x4xf32>
    %158 = vector.extract_strided_slice %138 {offsets = [1, 0, 0], sizes = [8, 16, 4], strides = [1, 1, 1]} : vector<10x18x4xbf16> to vector<8x16x4xbf16>
    %159 = vector.shape_cast %158 : vector<8x16x4xbf16> to vector<128x4xbf16>
    %c3_96 = arith.constant 3 : index
    %c0_97 = arith.constant 0 : index
    %c0_98 = arith.constant 0 : index
    %160 = vector.load %arg7[%c3_96, %c0_97, %c0_98] : memref<9x4x4xbf16, #tpu.memory_space<vmem>>, vector<1x4x4xbf16>
    %161 = vector.shape_cast %160 : vector<1x4x4xbf16> to vector<4x4xbf16>
    %cst_99 = arith.constant dense<0.000000e+00> : vector<128x4xf32>
    %162 = tpu.matmul %159, %161, %cst_99 {dimension_numbers = #tpu.dot_dimension_numbers<[1], [0], [0], [1], [0, 0, 1, 1], [], []>} : vector<128x4xbf16>, vector<4x4xbf16>, vector<128x4xf32> -> vector<128x4xf32>
    %163 = arith.addf %157, %162 : vector<128x4xf32>
    %164 = vector.extract_strided_slice %138 {offsets = [1, 1, 0], sizes = [8, 16, 4], strides = [1, 1, 1]} : vector<10x18x4xbf16> to vector<8x16x4xbf16>
    %165 = vector.shape_cast %164 : vector<8x16x4xbf16> to vector<128x4xbf16>
    %c4_100 = arith.constant 4 : index
    %c0_101 = arith.constant 0 : index
    %c0_102 = arith.constant 0 : index
    %166 = vector.load %arg7[%c4_100, %c0_101, %c0_102] : memref<9x4x4xbf16, #tpu.memory_space<vmem>>, vector<1x4x4xbf16>
    %167 = vector.shape_cast %166 : vector<1x4x4xbf16> to vector<4x4xbf16>
    %cst_103 = arith.constant dense<0.000000e+00> : vector<128x4xf32>
    %168 = tpu.matmul %165, %167, %cst_103 {dimension_numbers = #tpu.dot_dimension_numbers<[1], [0], [0], [1], [0, 0, 1, 1], [], []>} : vector<128x4xbf16>, vector<4x4xbf16>, vector<128x4xf32> -> vector<128x4xf32>
    %169 = arith.addf %163, %168 : vector<128x4xf32>
    %170 = vector.extract_strided_slice %138 {offsets = [1, 2, 0], sizes = [8, 16, 4], strides = [1, 1, 1]} : vector<10x18x4xbf16> to vector<8x16x4xbf16>
    %171 = vector.shape_cast %170 : vector<8x16x4xbf16> to vector<128x4xbf16>
    %c5_104 = arith.constant 5 : index
    %c0_105 = arith.constant 0 : index
    %c0_106 = arith.constant 0 : index
    %172 = vector.load %arg7[%c5_104, %c0_105, %c0_106] : memref<9x4x4xbf16, #tpu.memory_space<vmem>>, vector<1x4x4xbf16>
    %173 = vector.shape_cast %172 : vector<1x4x4xbf16> to vector<4x4xbf16>
    %cst_107 = arith.constant dense<0.000000e+00> : vector<128x4xf32>
    %174 = tpu.matmul %171, %173, %cst_107 {dimension_numbers = #tpu.dot_dimension_numbers<[1], [0], [0], [1], [0, 0, 1, 1], [], []>} : vector<128x4xbf16>, vector<4x4xbf16>, vector<128x4xf32> -> vector<128x4xf32>
    %175 = arith.addf %169, %174 : vector<128x4xf32>
    %176 = vector.extract_strided_slice %138 {offsets = [2, 0, 0], sizes = [8, 16, 4], strides = [1, 1, 1]} : vector<10x18x4xbf16> to vector<8x16x4xbf16>
    %177 = vector.shape_cast %176 : vector<8x16x4xbf16> to vector<128x4xbf16>
    %c6_108 = arith.constant 6 : index
    %c0_109 = arith.constant 0 : index
    %c0_110 = arith.constant 0 : index
    %178 = vector.load %arg7[%c6_108, %c0_109, %c0_110] : memref<9x4x4xbf16, #tpu.memory_space<vmem>>, vector<1x4x4xbf16>
    %179 = vector.shape_cast %178 : vector<1x4x4xbf16> to vector<4x4xbf16>
    %cst_111 = arith.constant dense<0.000000e+00> : vector<128x4xf32>
    %180 = tpu.matmul %177, %179, %cst_111 {dimension_numbers = #tpu.dot_dimension_numbers<[1], [0], [0], [1], [0, 0, 1, 1], [], []>} : vector<128x4xbf16>, vector<4x4xbf16>, vector<128x4xf32> -> vector<128x4xf32>
    %181 = arith.addf %175, %180 : vector<128x4xf32>
    %182 = vector.extract_strided_slice %138 {offsets = [2, 1, 0], sizes = [8, 16, 4], strides = [1, 1, 1]} : vector<10x18x4xbf16> to vector<8x16x4xbf16>
    %183 = vector.shape_cast %182 : vector<8x16x4xbf16> to vector<128x4xbf16>
    %c7_112 = arith.constant 7 : index
    %c0_113 = arith.constant 0 : index
    %c0_114 = arith.constant 0 : index
    %184 = vector.load %arg7[%c7_112, %c0_113, %c0_114] : memref<9x4x4xbf16, #tpu.memory_space<vmem>>, vector<1x4x4xbf16>
    %185 = vector.shape_cast %184 : vector<1x4x4xbf16> to vector<4x4xbf16>
    %cst_115 = arith.constant dense<0.000000e+00> : vector<128x4xf32>
    %186 = tpu.matmul %183, %185, %cst_115 {dimension_numbers = #tpu.dot_dimension_numbers<[1], [0], [0], [1], [0, 0, 1, 1], [], []>} : vector<128x4xbf16>, vector<4x4xbf16>, vector<128x4xf32> -> vector<128x4xf32>
    %187 = arith.addf %181, %186 : vector<128x4xf32>
    %188 = vector.extract_strided_slice %138 {offsets = [2, 2, 0], sizes = [8, 16, 4], strides = [1, 1, 1]} : vector<10x18x4xbf16> to vector<8x16x4xbf16>
    %189 = vector.shape_cast %188 : vector<8x16x4xbf16> to vector<128x4xbf16>
    %c8_116 = arith.constant 8 : index
    %c0_117 = arith.constant 0 : index
    %c0_118 = arith.constant 0 : index
    %190 = vector.load %arg7[%c8_116, %c0_117, %c0_118] : memref<9x4x4xbf16, #tpu.memory_space<vmem>>, vector<1x4x4xbf16>
    %191 = vector.shape_cast %190 : vector<1x4x4xbf16> to vector<4x4xbf16>
    %cst_119 = arith.constant dense<0.000000e+00> : vector<128x4xf32>
    %192 = tpu.matmul %189, %191, %cst_119 {dimension_numbers = #tpu.dot_dimension_numbers<[1], [0], [0], [1], [0, 0, 1, 1], [], []>} : vector<128x4xbf16>, vector<4x4xbf16>, vector<128x4xf32> -> vector<128x4xf32>
    %193 = arith.addf %187, %192 : vector<128x4xf32>
    %c0_120 = arith.constant 0 : index
    %c0_121 = arith.constant 0 : index
    %194 = vector.load %arg8[%c0_120, %c0_121] : memref<1x4xf32, #tpu.memory_space<vmem>>, vector<1x4xf32>
    %195 = vector.broadcast %194 : vector<1x4xf32> to vector<128x4xf32>
    %196 = arith.addf %193, %195 : vector<128x4xf32>
    %cst_122 = arith.constant 0.000000e+00 : f32
    %197 = vector.broadcast %cst_122 : f32 to vector<128x4xf32>
    %198 = arith.maximumf %196, %197 : vector<128x4xf32>
    %199 = vector.shape_cast %198 : vector<128x4xf32> to vector<8x16x4xf32>
    %c0_123 = arith.constant 0 : index
    %c0_124 = arith.constant 0 : index
    %c0_125 = arith.constant 0 : index
    %c0_126 = arith.constant 0 : index
    %200 = vector.load %arg9[%c0_123, %c0_124, %c0_125, %c0_126] : memref<1x8x16x4xf32, #tpu.memory_space<vmem>>, vector<1x8x16x4xf32>
    %201 = vector.shape_cast %200 : vector<1x8x16x4xf32> to vector<8x16x4xf32>
    %202 = vector.shape_cast %199 : vector<8x16x4xf32> to vector<1x8x16x4xf32>
    tpu.vector_store %arg9[%c0_123, %c0_124, %c0_125, %c0_126], %202 {strides = array<i32>} : memref<1x8x16x4xf32, #tpu.memory_space<vmem>>, vector<1x8x16x4xf32>,
    return
  }
  func.func @transform_0(%arg0: i32, %arg1: i32) -> (i32, i32, i32, i32) {
    %c0_i32 = arith.constant 0 : i32
    %c0_i32_0 = arith.constant 0 : i32
    %c0_i32_1 = arith.constant 0 : i32
    %c0_i32_2 = arith.constant 0 : i32
    return %arg0, %c0_i32, %c0_i32_0, %c0_i32_1 : i32, i32, i32, i32
  }
  func.func @transform_1(%arg0: i32, %arg1: i32) -> (i32, i32, i32, i32) {
    %c0_i32 = arith.constant 0 : i32
    %c0_i32_0 = arith.constant 0 : i32
    %c0_i32_1 = arith.constant 0 : i32
    %c0_i32_2 = arith.constant 0 : i32
    return %arg0, %c0_i32, %c0_i32_0, %c0_i32_1 : i32, i32, i32, i32
  }
  func.func @transform_2(%arg0: i32, %arg1: i32) -> (i32, i32, i32) {
    %c0_i32 = arith.constant 0 : i32
    %c0_i32_0 = arith.constant 0 : i32
    %c0_i32_1 = arith.constant 0 : i32
    %c0_i32_2 = arith.constant 0 : i32
    return %c0_i32, %c0_i32_0, %c0_i32_1 : i32, i32, i32
  }
  func.func @transform_3(%arg0: i32, %arg1: i32) -> (i32, i32, i32) {
    %c0_i32 = arith.constant 0 : i32
    %c0_i32_0 = arith.constant 0 : i32
    %c0_i32_1 = arith.constant 0 : i32
    %c0_i32_2 = arith.constant 0 : i32
    return %c0_i32, %c0_i32_0, %c0_i32_1 : i32, i32, i32
  }
  func.func @transform_4(%arg0: i32, %arg1: i32) -> (i32, i32) {
    %c0_i32 = arith.constant 0 : i32
    %c0_i32_0 = arith.constant 0 : i32
    %c0_i32_1 = arith.constant 0 : i32
    return %c0_i32, %c0_i32_0 : i32, i32
  }
  func.func @transform_5(%arg0: i32, %arg1: i32) -> (i32, i32, i32) {
    %c0_i32 = arith.constant 0 : i32
    %c0_i32_0 = arith.constant 0 : i32
    %c0_i32_1 = arith.constant 0 : i32
    %c0_i32_2 = arith.constant 0 : i32
    return %c0_i32, %c0_i32_0, %c0_i32_1 : i32, i32, i32
  }
  func.func @transform_6(%arg0: i32, %arg1: i32) -> (i32, i32) {
    %c0_i32 = arith.constant 0 : i32
    %c0_i32_0 = arith.constant 0 : i32
    %c0_i32_1 = arith.constant 0 : i32
    return %c0_i32, %c0_i32_0 : i32, i32
  }
  func.func @transform_7(%arg0: i32, %arg1: i32) -> (i32, i32, i32, i32) {
    %c0_i32 = arith.constant 0 : i32
    %c0_i32_0 = arith.constant 0 : i32
    %c0_i32_1 = arith.constant 0 : i32
    return %arg0, %arg1, %c0_i32, %c0_i32_0 : i32, i32, i32, i32
  }
}

</mosaic_0001>

<bundles_post_ra>
// kernel: tile.9
= control target key start
LH: loop header
LB: loop body
LE: loop exit
PB: predicated region body
PF: predicated region fallthrough
CT: control target
= control target key end

     0   :  { %s37_s8 = smov 4   ;;  %s38_s9 = smov 8   ;;  %vm7_vm0 = vcmask 31744   ;;  %vm13_vm1 = vcmask 130144   ;;  %vm19_vm2 = vcmask 97344   ;;  %vm25_vm3 = vcmask 64544   ;;  %s55_s0 = inlined_call_operand.vmem [shape: f32[4,4], index: 0, kind: input, shape index: {}]   ;;  %s56_s1 = inlined_call_operand.vmem [shape: f32[1,16], index: 1, kind: output, shape index: {}]  }
   0x1   :  { %v4_v0 = vld [vmem:[%s55_s0] sm:$0xf]  ;;  %s36_s0 = smov 12  }
   0x2   :  { %5 = vst [vmem:[#allocation1] sm:$0xf] %v4_v0 }
   0x9   :  { %v10_v1 = vld [vmem:[#allocation1 + $0x3] sm:$0x1]   ;;  %v22_v2 = vld [vmem:[#allocation1 + $0x1] sm:$0x1]   ;;  %v16_v3 = vld [vmem:[#allocation1 + $0x2] sm:$0x1]  }
   0xa   :  { %11 = vrot.lane.b32.xlu0 %v10_v1, %s36_s0  ;;  %23 = vrot.lane.b32.xlu1 %v22_v2, %s37_s8  ;;  %v6_v4 = vld [vmem:[#allocation1] sm:$0x1]  }
   0xb   :  { %8 = vst.msk [vmem:[#allocation0] sm:$0x1] %vm7_vm0, %v6_v4  }
  0x12   :  { %17 = vrot.lane.b32.xlu0 %v16_v3, %s38_s9 }
  0x7c   :  { %v12_v5 = vpop.permute.xlu0 %11   ;;  %v24_v6 = vpop.permute.xlu1 %23  }
  0x7d   :  { %14 = vst.msk [vmem:[#allocation0] sm:$0x1] %vm13_vm1, %v12_v5  }
  0x84   :  { %v18_v7 = vpop.permute.xlu0 %17  }
  0x85   :  { %20 = vst.msk [vmem:[#allocation0] sm:$0x1] %vm19_vm2, %v18_v7  }
  0x86   :  { %26 = vst.msk [vmem:[#allocation0] sm:$0x1] %vm25_vm3, %v24_v6  }
  0x8d   :  { %v29_v8 = vld [vmem:[#allocation0] sm:$0x1] }
  0x8e   :  { %32 = vst [vmem:[%s56_s1] sm:$0x1] %v29_v8 }

// kernel: tile.8
= control target key start
LH: loop header
LB: loop body
LE: loop exit
PB: predicated region body
PF: predicated region fallthrough
CT: control target
= control target key end

     0   :  { %2 = vsyncpa [#allocation1], 0  ;;  %s48_s8 = smov [#allocation0]   ;;  %s65_s0 = inlined_call_operand.hbm [shape: f32[4], index: 0, kind: input, shape index: {}]   ;;  %s66_s1 = inlined_call_operand.vmem [shape: f32[4,4], index: 1, kind: output, shape index: {}]  }
   0x1   :  { %s8_s0 = sshll.u32 %s65_s0, 4  ;;  %s10_s9 = sshll.u32 %s48_s8, 4  ;;  %s9_s0 = int_to_ptr.hbm [resolvable:$true] %s8_s0  ;;  %s11_s9 = int_to_ptr.vmem [resolvable:$true] %s10_s9 }
   0x2   :  { %13 = dma.hbm_to_vmem [thread:$0]  %s9_s0, 16, %s11_s9, [#allocation1]  }
   0x3   :  { %46 = dma.done.wait [#allocation1], 16  }
   0x4   :  { %47 = vsyncadd [#allocation1], 4294967280  ;;  %v18_v0 = vld [vmem:[#allocation0] ss:$0 sm:$0xff] }
   0x5   :  { %19 = vst [vmem:[%s66_s1] sm:$0xf] %v18_v0 }
   0x6   :  { %20 = vsyncpa [#allocation1], 1 }

// kernel: upconv_block_forward.2
= control target key start
LH: loop header
LB: loop body
LE: loop exit
PB: predicated region body
PF: predicated region fallthrough
CT: control target
= control target key end

     0   :  { %vm101_vm0 = vcmask 1043456   ;;  %vm76_vm1 = vcmask 64512   ;;  %vm170_vm2 = vcmask 125952   ;;  %s365_s1 = inlined_call_operand.vmem [shape: bf16[8,16], index: 1, kind: input, shape index: {}]   ;;  %s366_s0 = inlined_call_operand.vmem [shape: bf16[128,8], index: 0, kind: input, shape index: {}]   ;;  %s367_s2 = inlined_call_operand.vmem [shape: f32[1,16], index: 2, kind: input, shape index: {}]   ;;  %s368_s3 = inlined_call_operand.vmem [shape: bf16[128,16], index: 3, kind: output, shape index: {}]  }
   0x1   :  { %v31_v0 = vld [vmem:[%s365_s1] sm:$0xf]  ;;  %v233_v3 = vld [vmem:[%s366_s0 + $0x10] sm:$0xff]  ;;  %v232_v6 = vld [vmem:[%s366_s0 + $0x8] sm:$0xff] }
   0x2   :  { %v103_v1 = vsel %vm101_vm0, %v31_v0, 0  ;;  %v231_v2 = vld [vmem:[%s366_s0] sm:$0xff]  ;;  %v237_v5 = vld [vmem:[%s366_s0 + $0x30] sm:$0xff]  ;;  %v234_v7 = vld [vmem:[%s366_s0 + $0x18] sm:$0xff] }
   0x3   :  { %112 = vmatpush.bf16.msra.mxu0 %v103_v1  ;;  %239 = vmatpush.bf16.msra.mxu1 %v103_v1  ;;  %v235_v4 = vld [vmem:[%s366_s0 + $0x20] sm:$0xff]  ;;  %v236_v8 = vld [vmem:[%s366_s0 + $0x28] sm:$0xff]  ;;  %v238_v9 = vld [vmem:[%s366_s0 + $0x38] sm:$0xff] }
   0x4   :  { %240 = vmatpush.bf16.msra.mxu2 %v103_v1  ;;  %241 = vmatpush.bf16.msra.mxu3 %v103_v1  ;;  %v242_v10 = vld [vmem:[%s367_s2] ss:$0 sm:$0xff] }
   0x6   :  { %223 = vmatmul.msk.bf16.vlgmr.msra.gmra.mxu0 %vm76_vm1, %v231_v2  ;;  %225 = vmatmul.msk.bf16.vlgmr.msra.gmra.mxu1 %vm76_vm1, %v233_v3 }
   0x7   :  { %227 = vmatmul.msk.bf16.vlgmr.msra.gmra.mxu2 %vm76_vm1, %v235_v4  ;;  %229 = vmatmul.msk.bf16.vlgmr.msra.gmra.mxu3 %vm76_vm1, %v237_v5 }
  0x16   :  { %224 = vmatmul.msk.bf16.gmra.mxu0 %vm76_vm1, %v232_v6  ;;  %226 = vmatmul.msk.bf16.gmra.mxu1 %vm76_vm1, %v234_v7 }
  0x17   :  { %228 = vmatmul.msk.bf16.gmra.mxu2 %vm76_vm1, %v236_v8  ;;  %230 = vmatmul.msk.bf16.gmra.mxu3 %vm76_vm1, %v238_v9 }
  0x83   :  { %v114_v11 = vpop.f32.mrf.mxu0  ;;  %v124_v12 = vpop.f32.mrf.mxu1 }
  0x84   :  { %v115_v13 = vadd.f32 %v242_v10, %v114_v11  ;;  %v125_v14 = vadd.f32 %v242_v10, %v124_v12 }
  0x86   :  { %v154_v15 = vpack.c.bf16 %v115_v13, %v115_v13  ;;  %v158_v16 = vpack.c.bf16 %v125_v14, %v125_v14 }
  0x88   :  { %171 = vst.msk [vmem:[%s368_s3] sm:$0xf] %vm170_vm2, %v154_v15 }
  0x89   :  { %175 = vst.msk [vmem:[%s368_s3 + $0x10] sm:$0xf] %vm170_vm2, %v158_v16 }
  0x8a   :  { %v134_v17 = vpop.f32.mrf.mxu2  ;;  %v144_v18 = vpop.f32.mrf.mxu3 }
  0x8b   :  { %v135_v19 = vadd.f32 %v242_v10, %v134_v17  ;;  %v145_v20 = vadd.f32 %v242_v10, %v144_v18  ;;  %v116_v21 = vpop.f32.mrf.mxu0  ;;  %v126_v22 = vpop.f32.mrf.mxu1 }
  0x8c   :  { %v117_v23 = vadd.f32 %v242_v10, %v116_v21  ;;  %v127_v24 = vadd.f32 %v242_v10, %v126_v22 }
  0x8d   :  { %v162_v25 = vpack.c.bf16 %v135_v19, %v135_v19  ;;  %v166_v26 = vpack.c.bf16 %v145_v20, %v145_v20 }
  0x8e   :  { %v155_v27 = vpack.c.bf16 %v117_v23, %v117_v23  ;;  %v159_v28 = vpack.c.bf16 %v127_v24, %v127_v24 }
  0x8f   :  { %179 = vst.msk [vmem:[%s368_s3 + $0x20] sm:$0xf] %vm170_vm2, %v162_v25 }
  0x90   :  { %183 = vst.msk [vmem:[%s368_s3 + $0x30] sm:$0xf] %vm170_vm2, %v166_v26 }
  0x91   :  { %172 = vst.msk [vmem:[%s368_s3 + $0x4] sm:$0xf] %vm170_vm2, %v155_v27 }
  0x92   :  { %176 = vst.msk [vmem:[%s368_s3 + $0x14] sm:$0xf] %vm170_vm2, %v159_v28  ;;  %v136_v29 = vpop.f32.mrf.mxu2  ;;  %v146_v30 = vpop.f32.mrf.mxu3 }
  0x93   :  { %v137_v31 = vadd.f32 %v242_v10, %v136_v29  ;;  %v147_v32 = vadd.f32 %v242_v10, %v146_v30  ;;  %v119_v33 = vpop.f32.mrf.mxu0  ;;  %v129_v34 = vpop.f32.mrf.mxu1 }
  0x94   :  { %v120_v35 = vadd.f32 %v242_v10, %v119_v33  ;;  %v130_v36 = vadd.f32 %v242_v10, %v129_v34 }
  0x95   :  { %v163_v37 = vpack.c.bf16 %v137_v31, %v137_v31  ;;  %v167_v38 = vpack.c.bf16 %v147_v32, %v147_v32 }
  0x96   :  { %v156_v39 = vpack.c.bf16 %v120_v35, %v120_v35  ;;  %v160_v40 = vpack.c.bf16 %v130_v36, %v130_v36 }
  0x97   :  { %180 = vst.msk [vmem:[%s368_s3 + $0x24] sm:$0xf] %vm170_vm2, %v163_v37 }
  0x98   :  { %184 = vst.msk [vmem:[%s368_s3 + $0x34] sm:$0xf] %vm170_vm2, %v167_v38 }
  0x99   :  { %173 = vst.msk [vmem:[%s368_s3 + $0x8] sm:$0xf] %vm170_vm2, %v156_v39 }
  0x9a   :  { %177 = vst.msk [vmem:[%s368_s3 + $0x18] sm:$0xf] %vm170_vm2, %v160_v40  ;;  %v139_v41 = vpop.f32.mrf.mxu2  ;;  %v149_v42 = vpop.f32.mrf.mxu3 }
  0x9b   :  { %v140_v43 = vadd.f32 %v242_v10, %v139_v41  ;;  %v150_v44 = vadd.f32 %v242_v10, %v149_v42  ;;  %v121_v45 = vpop.f32.mrf.mxu0  ;;  %v131_v46 = vpop.f32.mrf.mxu1 }
  0x9c   :  { %v122_v47 = vadd.f32 %v242_v10, %v121_v45  ;;  %v132_v48 = vadd.f32 %v242_v10, %v131_v46 }
  0x9d   :  { %v164_v49 = vpack.c.bf16 %v140_v43, %v140_v43  ;;  %v168_v50 = vpack.c.bf16 %v150_v44, %v150_v44 }
  0x9e   :  { %v157_v51 = vpack.c.bf16 %v122_v47, %v122_v47  ;;  %v161_v52 = vpack.c.bf16 %v132_v48, %v132_v48 }
  0x9f   :  { %181 = vst.msk [vmem:[%s368_s3 + $0x28] sm:$0xf] %vm170_vm2, %v164_v49 }
  0xa0   :  { %185 = vst.msk [vmem:[%s368_s3 + $0x38] sm:$0xf] %vm170_vm2, %v168_v50 }
  0xa1   :  { %174 = vst.msk [vmem:[%s368_s3 + $0xc] sm:$0xf] %vm170_vm2, %v157_v51 }
  0xa2   :  { %178 = vst.msk [vmem:[%s368_s3 + $0x1c] sm:$0xf] %vm170_vm2, %v161_v52  ;;  %v141_v53 = vpop.f32.mrf.mxu2  ;;  %v151_v54 = vpop.f32.mrf.mxu3 }
  0xa3   :  { %v142_v55 = vadd.f32 %v242_v10, %v141_v53  ;;  %v152_v56 = vadd.f32 %v242_v10, %v151_v54 }
  0xa5   :  { %v165_v57 = vpack.c.bf16 %v142_v55, %v142_v55  ;;  %v169_v58 = vpack.c.bf16 %v152_v56, %v152_v56 }
  0xa7   :  { %182 = vst.msk [vmem:[%s368_s3 + $0x2c] sm:$0xf] %vm170_vm2, %v165_v57 }
  0xa8   :  { %186 = vst.msk [vmem:[%s368_s3 + $0x3c] sm:$0xf] %vm170_vm2, %v169_v58 }

// kernel: upconv_block_forward.3
= control target key start
LH: loop header
LB: loop body
LE: loop exit
PB: predicated region body
PF: predicated region fallthrough
CT: control target
= control target key end

     0   :  { %s5548_s24 = smov 0   ;;  %s5550_s25 = smov 0   ;;  %s8177_s0 = inlined_call_operand.vmem [shape: bf16[2,20,18,4], index: 0, kind: input, shape index: {}]   ;;  %s8178_s1 = inlined_call_operand.vmem [shape: bf16[2,20,18,4], index: 1, kind: input, shape index: {}]   ;;  %s8179_s2 = inlined_call_operand.vmem [shape: bf16[9,4,4], index: 2, kind: input, shape index: {}]   ;;  %s8180_s3 = inlined_call_operand.vmem [shape: bf16[9,4,4], index: 3, kind: input, shape index: {}]   ;;  %s8181_s4 = inlined_call_operand.vmem [shape: f32[1,4], index: 4, kind: input, shape index: {}]   ;;  %s8182_s5 = inlined_call_operand.vmem [shape: bf16[9,4,4], index: 5, kind: input, shape index: {}]   ;;  %s8183_s6 = inlined_call_operand.vmem [shape: f32[1,4], index: 6, kind: input, shape index: {}]   ;;  %s8184_s7 = inlined_call_operand.vmem [shape: f32[2,16,16,4], index: 7, kind: output, shape index: {}]  }
   0x1   :  { %s5552_s26 = smov 0   ;;  %s5554_s27 = smov 0  }
   0x2   :  { %s5556_s28 = smov 0  }
   0x3 LB: > { %s26_s29 = sadd.s32 1, %s5497_s26  ;;  %s29_s30 = sadd.s32 1, %s5501_s27  ;;  %s5505_s28 = sphi %s5556_s28, %s17_s28   ;;  %s5501_s27 = sphi %s5554_s27, %s8376_s27   ;;  %s5497_s26 = sphi %s5552_s26, %s8375_s26   ;;  %s5493_s25 = sphi %s5550_s25, %s8374_s25   ;;  %s5489_s24 = sphi %s5548_s24, %s8373_s24  }
   0x4   : > { %p27_p0 = scmp.ge.s32.totalorder %s26_s29, 2  ;;  %p4873_p1 = scmp.ge.s32.totalorder %s5505_s28, 1 }
   0x5   : > { %p261_p2 = scmp.lt.s32.totalorder %s5505_s28, 5 }
   0x6   : > { %s8378_s29 = smov (%p27_p0, %s26_s29), 0  ;;  %s8380_s30 = smov (!%p27_p0, %s29_s30), %s5501_s27 }
   0x7   : > { %p262_p3 = pnand %p4873_p1, %p261_p2  ;;  %p31_p4 = scmp.ge.s32.totalorder %s8380_s30, 2 }
   0x9   : > { %s8382_s30 = smov (%p31_p4, %s8380_s30), 0  ;;  %265 = sbr.rel (%p262_p3) target bundleno = 1434 (0x59a), region = 48 }
   0xe   : > { %v404_v0 = vld [vmem:[%s8180_s3] sm:$0x3]  ;;  %vm486_vm0 = vcmask 1041408   ;;  %p303_p5 = scmp.lt.s32.totalorder %s5493_s25, 1  ;;  %s5333_s12 = smul.u32 96, %s5489_s24  ;;  %vm455_vm1 = vcmask 31744  }
   0xf   : > { %v488_v1 = vsel %vm486_vm0, %v404_v0, 0  ;;  %v403_v2 = vld [vmem:[%s8179_s2] sm:$0x3]  ;;  %v4984_v14 = vld [vmem:[%s8179_s2 + $0x2] sm:$0x3]  ;;  %vm1472_vm5 = vcmask 1042432  }
  0x10   : > { %497 = vmatpush.bf16.msra.mxu0 %v488_v1  ;;  %5369 = vmatpush.bf16.msra.mxu1 %v488_v1  ;;  %s8384_s25 = smov (!%p303_p5, %s5493_s25), 1  ;;  %v630_v3 = vsel %vm486_vm0, %v403_v2, 0  ;;  %v4995_v15 = vld [vmem:[%s8180_s3 + $0x2] sm:$0x3]  ;;  %v1237_v17 = vsel %vm486_vm0, %v4984_v14, 0  ;;  %vm1473_vm6 = vcmask 1046532  }
  0x11   : > { %s5372_s13 = smul.u32 240, %s8384_s25  ;;  %v5631_v18 = vsel %vm486_vm0, %v4995_v15, 0  ;;  %vm691_vm2 = vsmask.f32 3328  ;;  %vm692_vm3 = vsmask.f32 7440  ;;  %5370 = vmatpush.bf16.msra.mxu2 %v1237_v17  ;;  %vm5846_vm7 = vmor %vm1472_vm5, %vm1473_vm6 }
  0x12   : > { %5371 = vmatpush.bf16.msra.mxu3 %v5631_v18  ;;  %vm5640_vm4 = vmor %vm691_vm2, %vm692_vm3  ;;  %vm3234_vm8 = vcmask 27648   ;;  %vm3237_vm9 = vcmask 24576   ;;  %vm3490_vm13 = vsmask.f32 7938  ;;  %vm3286_vm15 = vsmask.f32 256 }
  0x13   : > { %s312_s16 = scalar_lea.vmem %s8178_s1, %s5372_s13  ;;  %s307_s20 = scalar_lea.vmem %s8177_s0, %s5372_s13  ;;  %vm7304_vm14 = vmand %vm3234_vm8, %vm3490_vm13  ;;  %vm3287_vm2 = vsmask.f32 4368 }
  0x14   : > { %639 = vmatpush.bf16.msrb.mxu1 %v630_v3  ;;  %s5595_s17 = scalar_lea.vmem %s312_s16, %s5333_s12  ;;  %s5604_s21 = scalar_lea.vmem %s307_s20, %s5333_s12  ;;  %vm7321_vm6 = vmor %vm3286_vm15, %vm3287_vm2 }
  0x15   : > { %v5347_v4 = vld [vmem:[%s5595_s17] sm:$0xff]  ;;  %v5354_v5 = vld [vmem:[%s5595_s17 + $0x54] sm:$0xff]  ;;  %v5348_v6 = vld [vmem:[%s5595_s17 + $0xc] sm:$0xff]  ;;  %s4878_s16 = sshll.u32 %s8384_s25, 5 }
  0x16   : > { %4924 = vmatmul.msk.bf16.vlgmr.msra.gmra.mxu0 %vm455_vm1, %v5347_v4  ;;  %4931 = vmatmul.msk.bf16.vlgmr.msra.gmra.mxu1 %vm455_vm1, %v5354_v5  ;;  %v5355_v7 = vld [vmem:[%s5595_s17 + $0x60] sm:$0xff]  ;;  %v5609_v8 = vld [vmem:[%s5604_s21 + $0xc] sm:$0xf]  ;;  %v5612_v9 = vld [vmem:[%s5604_s21 + $0x10] sm:$0xf] }
  0x17   : > { %v719_v10 = vshrl.u32 %v5609_v8, 16  ;;  %v722_v11 = vshll.u32 %v5609_v8, 16  ;;  %v728_v12 = vshll.u32 %v5612_v9, 16  ;;  %v732_v13 = vshrl.u32 %v5612_v9, 16  ;;  %v5627_v16 = vld [vmem:[%s5604_s21 + $0x14] sm:$0x1] }
  0x18   : > { %1246 = vmatpush.bf16.msra.mxu1 %v1237_v17  ;;  %v370_v23 = vld [vmem:[%s5595_s17 + $0xc] sm:$0xf]  ;;  %v738_v24 = vshll.u32 %v5627_v16, 16  ;;  %v371_v25 = vld [vmem:[%s5595_s17 + $0x10] sm:$0xf]  ;;  %v5349_v52 = vld [vmem:[%s5595_s17 + $0x18] sm:$0xff] }
  0x19   : > { %v721_v19 = vrot.slane %v719_v10, 4  ;;  %v724_v20 = vrot.slane %v722_v11, 5  ;;  %v730_v21 = vrot.slane %v728_v12, 5  ;;  %v734_v22 = vrot.slane %v732_v13, 4  ;;  %v372_v26 = vld [vmem:[%s5595_s17 + $0x14] sm:$0x1] }
  0x1a   : > { %v959_v27 = vshrl.u32 %v370_v23, 16  ;;  %v962_v30 = vshll.u32 %v370_v23, 16  ;;  %v968_v31 = vshll.u32 %v371_v25, 16  ;;  %v740_v33 = vrot.slane %v738_v24, 5  ;;  %v5356_v53 = vld [vmem:[%s5595_s17 + $0x6c] sm:$0xff] }
  0x1b   : > { %v725_v28 = vor.u32 %v724_v20, %v721_v19  ;;  %v735_v29 = vor.u32 %v734_v22, %v730_v21  ;;  %v972_v35 = vshrl.u32 %v371_v25, 16  ;;  %v978_v36 = vshll.u32 %v372_v26, 16  ;;  %v5659_v58 = vld [vmem:[%s5604_s21 + $0x18] sm:$0xf]  ;;  %v5662_v59 = vld [vmem:[%s5604_s21 + $0x1c] sm:$0xf] }
  0x1c   : > { %v961_v34 = vrot.slane %v959_v27, 4  ;;  %v964_v39 = vrot.slane %v962_v30, 5  ;;  %v970_v40 = vrot.slane %v968_v31, 5  ;;  %v743_v60 = vshrl.u32 %v5659_v58, 16  ;;  %v5673_v1 = vld [vmem:[%s5604_s21 + $0x20] sm:$0x1] }
  0x1d   : > { %v726_v37 = vrot.slane %v725_v28, 4  ;;  %v736_v38 = vrot.slane %v735_v29, 4  ;;  %v974_v41 = vrot.slane %v972_v35, 4  ;;  %v980_v48 = vrot.slane %v978_v36, 5  ;;  %v373_v2 = vld [vmem:[%s5595_s17 + $0x18] sm:$0xf] }
  0x1e   : > { %v965_v44 = vor.u32 %v964_v39, %v961_v34  ;;  %v746_v61 = vshll.u32 %v5659_v58, 16  ;;  %v752_v62 = vshll.u32 %v5662_v59, 16  ;;  %v756_v63 = vshrl.u32 %v5662_v59, 16  ;;  %v374_v3 = vld [vmem:[%s5595_s17 + $0x1c] sm:$0xf] }
  0x1f   : > { %v731_v42 = vsel %vm5640_vm4, %v726_v37, %v730_v21  ;;  %v741_v43 = vsel %vm5640_vm4, %v736_v38, %v740_v33  ;;  %v975_v47 = vor.u32 %v974_v41, %v970_v40  ;;  %v745_v4 = vrot.slane %v743_v60, 4  ;;  %v375_v10 = vld [vmem:[%s5595_s17 + $0x20] sm:$0x1] }
  0x20   : > { %v1178_v45 = vunpack.c.l.b16 %v731_v42  ;;  %v1179_v46 = vunpack.c.l.b16 %v741_v43  ;;  %v966_v49 = vrot.slane %v965_v44, 4  ;;  %v748_v5 = vrot.slane %v746_v61, 5  ;;  %v5350_v42 = vld [vmem:[%s5595_s17 + $0x24] sm:$0xff] }
  0x21   : > { %v976_v51 = vrot.slane %v975_v47, 4  ;;  %v762_v11 = vshll.u32 %v5673_v1, 16  ;;  %v983_v12 = vshrl.u32 %v373_v2, 16  ;;  %v986_v13 = vshll.u32 %v373_v2, 16  ;;  %v5334_v43 = vld [vmem:[%s5604_s21] sm:$0xff] }
  0x22   : > { %v5648_v50 = vpack.c.b16 %v1179_v46, %v1178_v45  ;;  %v971_v54 = vsel %vm5640_vm4, %v966_v49, %v970_v40  ;;  %v992_v14 = vshll.u32 %v374_v3, 16  ;;  %v749_v15 = vor.u32 %v748_v5, %v745_v4  ;;  %v5698_v46 = vld [vmem:[%s5604_s21 + $0x24] sm:$0xf]  ;;  %v5701_v47 = vld [vmem:[%s5604_s21 + $0x28] sm:$0xf] }
  0x23   : > { %v981_v55 = vsel %vm5640_vm4, %v976_v51, %v980_v48  ;;  %v1322_v56 = vunpack.c.l.b16 %v971_v54  ;;  %v996_v19 = vshrl.u32 %v374_v3, 16  ;;  %v1002_v20 = vshll.u32 %v375_v10, 16  ;;  %v376_v54 = vld [vmem:[%s5595_s17 + $0x24] sm:$0xf] }
  0x24   : > { %4986 = vmatmul.msk.bf16.vlgmr.msra.gmra.mxu2 %vm455_vm1, %v5648_v50  ;;  %v1323_v57 = vunpack.c.l.b16 %v981_v55  ;;  %v764_v21 = vrot.slane %v762_v11, 5  ;;  %v985_v22 = vrot.slane %v983_v12, 4  ;;  %v988_v23 = vrot.slane %v986_v13, 5  ;;  %v377_v55 = vld [vmem:[%s5595_s17 + $0x28] sm:$0xf] }
  0x25   : > { %v994_v24 = vrot.slane %v992_v14, 5  ;;  %v750_v25 = vrot.slane %v749_v15, 4  ;;  %v998_v27 = vrot.slane %v996_v19, 4  ;;  %v1004_v33 = vrot.slane %v1002_v20, 5 }
  0x26   : > { %4925 = vmatmul.msk.bf16.gmra.mxu0 %vm455_vm1, %v5348_v6  ;;  %4932 = vmatmul.msk.bf16.gmra.mxu1 %vm455_vm1, %v5355_v7  ;;  %v5670_v0 = vpack.c.b16 %v1323_v57, %v1322_v56  ;;  %v754_v6 = vrot.slane %v752_v62, 5  ;;  %v758_v7 = vrot.slane %v756_v63, 4  ;;  %v989_v28 = vor.u32 %v988_v23, %v985_v22  ;;  %v378_v62 = vld [vmem:[%s5595_s17 + $0x2c] sm:$0x1] }
  0x27   : > { %v999_v31 = vor.u32 %v998_v27, %v994_v24  ;;  %v767_v48 = vshrl.u32 %v5698_v46, 16  ;;  %v770_v49 = vshll.u32 %v5698_v46, 16  ;;  %v776_v51 = vshll.u32 %v5701_v47, 16 }
  0x28   : > { %8246 = vst [vmem:[#allocation3_spill] sm:$0xff] %v5670_v0  ;;  %4997 = vmatmul.msk.bf16.vlgmr.msra.gmra.mxu3 %vm455_vm1, %v5670_v0  ;;  %v759_v17 = vor.u32 %v758_v7, %v754_v6  ;;  %v755_v29 = vsel %vm5640_vm4, %v750_v25, %v754_v6  ;;  %v990_v36 = vrot.slane %v989_v28, 4  ;;  %v1007_v2 = vshrl.u32 %v376_v54, 16 }
  0x29   : > { %v1180_v34 = vunpack.c.l.b16 %v755_v29  ;;  %v1000_v37 = vrot.slane %v999_v31, 4  ;;  %v769_v56 = vrot.slane %v767_v48, 4  ;;  %v772_v57 = vrot.slane %v770_v49, 5  ;;  %v5026_v48 = vld [vmem:[%s8179_s2 + $0x4] sm:$0x3] }
  0x2a   : > { %v760_v26 = vrot.slane %v759_v17, 4  ;;  %v995_v39 = vsel %vm5640_vm4, %v990_v36, %v994_v24  ;;  %v778_v60 = vrot.slane %v776_v51, 5  ;;  %v1010_v3 = vshll.u32 %v376_v54, 16  ;;  %v379_v49 = vld [vmem:[%s5595_s17 + $0x30] sm:$0xf] }
  0x2b   : > { %v1005_v40 = vsel %vm5640_vm4, %v1000_v37, %v1004_v33  ;;  %v1324_v41 = vunpack.c.l.b16 %v995_v39  ;;  %v1016_v4 = vshll.u32 %v377_v55, 16  ;;  %v773_v5 = vor.u32 %v772_v57, %v769_v56  ;;  %v5351_v33 = vld [vmem:[%s5595_s17 + $0x30] sm:$0xff] }
  0x2c   : > { %v765_v30 = vsel %vm5640_vm4, %v760_v26, %v764_v21  ;;  %v1325_v44 = vunpack.c.l.b16 %v1005_v40  ;;  %v1020_v7 = vshrl.u32 %v377_v55, 16  ;;  %v1026_v10 = vshll.u32 %v378_v62, 16  ;;  %v5738_v37 = vld [vmem:[%s5604_s21 + $0x30] sm:$0xf]  ;;  %v5741_v39 = vld [vmem:[%s5604_s21 + $0x34] sm:$0xf] }
  0x2d   : > { %v1181_v35 = vunpack.c.l.b16 %v765_v30  ;;  %v1009_v12 = vrot.slane %v1007_v2, 4  ;;  %v1012_v13 = vrot.slane %v1010_v3, 5  ;;  %v1018_v14 = vrot.slane %v1016_v4, 5  ;;  %v380_v56 = vld [vmem:[%s5595_s17 + $0x34] sm:$0xf] }
  0x2e   : > { %v5695_v45 = vpack.c.b16 %v1325_v44, %v1324_v41  ;;  %v774_v15 = vrot.slane %v773_v5, 4  ;;  %v1028_v23 = vrot.slane %v1026_v10, 5  ;;  %v791_v40 = vshrl.u32 %v5738_v37, 16  ;;  %v5751_v44 = vld [vmem:[%s5604_s21 + $0x38] sm:$0x1] }
  0x2f   : > { %v5685_v38 = vpack.c.b16 %v1181_v35, %v1180_v34  ;;  %v1013_v19 = vor.u32 %v1012_v13, %v1009_v12  ;;  %v5731_v34 = vld [vmem:[%s5604_s21 + $0xc] sm:$0xff]  ;;  %v794_v41 = vshll.u32 %v5738_v37, 16  ;;  %v810_v57 = vshll.u32 %v5751_v44, 16 }
  0x30   : > { %8247 = vst [vmem:[#allocation4_spill] sm:$0xff] %v5695_v45  ;;  %v779_v20 = vsel %vm5640_vm4, %v774_v15, %v778_v60  ;;  %v793_v51 = vrot.slane %v791_v40, 4  ;;  %v1031_v62 = vshrl.u32 %v379_v49, 16  ;;  %v1040_v4 = vshll.u32 %v380_v56, 16 }
  0x31   : > { %v1182_v24 = vunpack.c.l.b16 %v779_v20  ;;  %v1014_v26 = vrot.slane %v1013_v19, 4  ;;  %v1044_v5 = vshrl.u32 %v380_v56, 16 }
  0x33   : > { %v1019_v29 = vsel %vm5640_vm4, %v1014_v26, %v1018_v14  ;;  %v1046_v15 = vrot.slane %v1044_v5, 4 }
  0x34   : > { %4987 = vmatmul.msk.bf16.gmra.mxu2 %vm455_vm1, %v5685_v38  ;;  %v1326_v31 = vunpack.c.l.b16 %v1019_v29 }
  0x36   : > { %4926 = vmatmul.msk.bf16.gmra.mxu0 %vm455_vm1, %v5349_v52  ;;  %4933 = vmatmul.msk.bf16.gmra.mxu1 %vm455_vm1, %v5356_v53  ;;  %v780_v52 = vshrl.u32 %v5701_v47, 16  ;;  %v5710_v53 = vld [vmem:[%s5604_s21 + $0x2c] sm:$0x1] }
  0x37   : > { %v786_v63 = vshll.u32 %v5710_v53, 16 }
  0x38   : > { %v782_v61 = vrot.slane %v780_v52, 4  ;;  %4998 = vmatmul.msk.bf16.gmra.mxu3 %vm455_vm1, %v5695_v45  ;;  %v796_v52 = vrot.slane %v794_v41, 5  ;;  %v5782_v41 = vld [vmem:[%s5604_s21 + $0x3c] sm:$0xf] }
  0x39   : > { %v788_v11 = vrot.slane %v786_v63, 5  ;;  %v1034_v63 = vshll.u32 %v379_v49, 16 }
  0x3a   : > { %v783_v6 = vor.u32 %v782_v61, %v778_v60  ;;  %v1688_v60 = vsel %vm486_vm0, %v5026_v48, 0  ;;  %v381_v61 = vld [vmem:[%s5595_s17 + $0x38] sm:$0x1]  ;;  %v797_v2 = vor.u32 %v796_v52, %v793_v51  ;;  %v818_v48 = vshll.u32 %v5782_v41, 16  ;;  %v5794_v51 = vld [vmem:[%s5604_s21 + $0x44] sm:$0x1] }
  0x3b   : > { %1697 = vmatpush.bf16.msrb.mxu0 %v1688_v60  ;;  %v1036_v10 = vrot.slane %v1034_v63, 5 }
  0x3c   : > { %v784_v17 = vrot.slane %v783_v6, 4  ;;  %v812_v6 = vrot.slane %v810_v57, 5  ;;  %v798_v12 = vrot.slane %v797_v2, 4 }
  0x3e   : > { %v789_v21 = vsel %vm5640_vm4, %v784_v17, %v788_v11  ;;  %v1050_v11 = vshll.u32 %v381_v61, 16  ;;  %v834_v61 = vshll.u32 %v5794_v51, 16 }
  0x3f   : > { %v1183_v25 = vunpack.c.l.b16 %v789_v21 }
  0x40   : > { %v1052_v21 = vrot.slane %v1050_v11, 5  ;;  %v5804_v11 = vld [vmem:[%s5604_s21 + $0x4] sm:$0xf] }
  0x41   : > { %v5723_v28 = vpack.c.b16 %v1183_v25, %v1182_v24 }
  0x43   : > { %8248 = vst [vmem:[#allocation5_spill] sm:$0xff] %v5723_v28 }
  0x44   : > { %4988 = vmatmul.msk.bf16.gmra.mxu2 %vm455_vm1, %v5723_v28 }
  0x46   : > { %4927 = vmatmul.msk.bf16.gmra.mxu0 %vm455_vm1, %v5350_v42  ;;  %4974 = vmatmul.msk.bf16.vlgmr.msrb.gmra.mxu1 %vm455_vm1, %v5334_v43  ;;  %v800_v42 = vshll.u32 %v5741_v39, 16  ;;  %v804_v43 = vshrl.u32 %v5741_v39, 16 }
  0x47   : > { %1390 = vmatpush.bf16.msrb.mxu1 %v5631_v18  ;;  %v1022_v18 = vrot.slane %v1020_v7, 4  ;;  %v1033_v7 = vrot.slane %v1031_v62, 4  ;;  %v383_v62 = vld [vmem:[%s5595_s17 + $0x40] sm:$0xf] }
  0x48   : > { %v802_v54 = vrot.slane %v800_v42, 5  ;;  %v806_v55 = vrot.slane %v804_v43, 4  ;;  %v5785_v42 = vld [vmem:[%s5604_s21 + $0x40] sm:$0xf]  ;;  %v815_v43 = vshrl.u32 %v5782_v41, 16 }
  0x49   : > { %v1023_v22 = vor.u32 %v1022_v18, %v1018_v14  ;;  %v1042_v14 = vrot.slane %v1040_v4, 5  ;;  %v1037_v17 = vor.u32 %v1036_v10, %v1033_v7  ;;  %v824_v49 = vshll.u32 %v5785_v42, 16  ;;  %v384_v4 = vld [vmem:[%s5595_s17 + $0x44] sm:$0x1] }
  0x4a   : > { %v807_v3 = vor.u32 %v806_v55, %v802_v54  ;;  %v803_v18 = vsel %vm5640_vm4, %v798_v12, %v802_v54  ;;  %v817_v52 = vrot.slane %v815_v43, 4  ;;  %v820_v54 = vrot.slane %v818_v48, 5  ;;  %v382_v55 = vld [vmem:[%s5595_s17 + $0x3c] sm:$0xf]  ;;  %v5819_v43 = vld [vmem:[%s5604_s21 + $0x8] sm:$0x1] }
  0x4b   : > { %v1024_v27 = vrot.slane %v1023_v22, 4  ;;  %v1047_v20 = vor.u32 %v1046_v15, %v1042_v14  ;;  %v1184_v22 = vunpack.c.l.b16 %v803_v18  ;;  %v1038_v24 = vrot.slane %v1037_v17, 4 }
  0x4c   : > { %v808_v13 = vrot.slane %v807_v3, 4  ;;  %v821_v56 = vor.u32 %v820_v54, %v817_v52  ;;  %v826_v57 = vrot.slane %v824_v49, 5  ;;  %v828_v60 = vshrl.u32 %v5785_v42, 16 }
  0x4d   : > { %v1029_v30 = vsel %vm5640_vm4, %v1024_v27, %v1028_v23  ;;  %v1048_v25 = vrot.slane %v1047_v20, 4  ;;  %v1043_v27 = vsel %vm5640_vm4, %v1038_v24, %v1042_v14  ;;  %v1055_v63 = vshrl.u32 %v382_v55, 16  ;;  %v5810_v24 = vld [vmem:[%s5604_s21] sm:$0xf] }
  0x4e   : > { %v1327_v35 = vunpack.c.l.b16 %v1029_v30  ;;  %v813_v19 = vsel %vm5640_vm4, %v808_v13, %v812_v6  ;;  %v1328_v30 = vunpack.c.l.b16 %v1043_v27  ;;  %v822_v2 = vrot.slane %v821_v56, 4 }
  0x4f   : > { %v1185_v23 = vunpack.c.l.b16 %v813_v19  ;;  %v1053_v29 = vsel %vm5640_vm4, %v1048_v25, %v1052_v21  ;;  %v830_v3 = vrot.slane %v828_v60, 4  ;;  %v1058_v5 = vshll.u32 %v382_v55, 16  ;;  %v5827_v60 = vld [vmem:[%s5604_s21 + $0x48] sm:$0xf] }
  0x50   : > { %v5735_v36 = vpack.c.b16 %v1327_v35, %v1326_v31  ;;  %v5352_v31 = vld [vmem:[%s5595_s17 + $0x3c] sm:$0xff]  ;;  %v1329_v35 = vunpack.c.l.b16 %v1053_v29  ;;  %v836_v6 = vrot.slane %v834_v61, 5  ;;  %v1057_v7 = vrot.slane %v1055_v63, 4  ;;  %v5830_v61 = vld [vmem:[%s5604_s21 + $0x4c] sm:$0xf] }
  0x51   : > { %v5767_v26 = vpack.c.b16 %v1185_v23, %v1184_v22  ;;  %v1064_v10 = vshll.u32 %v383_v62, 16  ;;  %v827_v12 = vsel %vm5640_vm4, %v822_v2, %v826_v57  ;;  %v831_v13 = vor.u32 %v830_v3, %v826_v57 }
  0x52   : > { %8249 = vst [vmem:[#allocation6_spill] sm:$0xff] %v5735_v36  ;;  %4999 = vmatmul.msk.bf16.gmra.mxu3 %vm455_vm1, %v5735_v36  ;;  %v5779_v40 = vpack.c.b16 %v1329_v35, %v1328_v30  ;;  %v1060_v14 = vrot.slane %v1058_v5, 5  ;;  %v1068_v15 = vshrl.u32 %v383_v62, 16  ;;  %v1074_v18 = vshll.u32 %v384_v4, 16  ;;  %v5816_v35 = vld [vmem:[%s5604_s21 + $0x24] sm:$0xff] }
  0x53   : > { %8250 = vst [vmem:[#allocation7_spill] sm:$0xff] %v5767_v26  ;;  %v1066_v17 = vrot.slane %v1064_v10, 5  ;;  %v832_v19 = vrot.slane %v831_v13, 4  ;;  %v1477_v22 = vrot.slane %v5804_v11, 5  ;;  %v1186_v23 = vunpack.c.l.b16 %v827_v12  ;;  %v386_v10 = vld [vmem:[%s5595_s17 + $0x4c] sm:$0xf] }
  0x54   : > { %4989 = vmatmul.msk.bf16.gmra.mxu2 %vm455_vm1, %v5767_v26  ;;  %8251 = vst [vmem:[#allocation8_spill] sm:$0xff] %v5779_v40  ;;  %v1061_v20 = vor.u32 %v1060_v14, %v1057_v7  ;;  %v1070_v21 = vrot.slane %v1068_v15, 4  ;;  %v1076_v30 = vrot.slane %v1074_v18, 5  ;;  %v5006_v54 = vrot.slane %v5810_v24, 9  ;;  %v385_v7 = vld [vmem:[%s5595_s17 + $0x48] sm:$0xf] }
  0x55   : > { %v837_v25 = vsel %vm5640_vm4, %v832_v19, %v836_v6  ;;  %v1479_v55 = vrot.slane %v1477_v22, 4  ;;  %v1480_v62 = vrot.slane %v5819_v43, 5  ;;  %v839_v2 = vshrl.u32 %v5827_v60, 16  ;;  %v5855_v19 = vld [vmem:[%s5604_s21 + $0x50] sm:$0x1] }
  0x56   : > { %4928 = vmatmul.msk.bf16.gmra.mxu0 %vm455_vm1, %v5351_v33  ;;  %4975 = vmatmul.msk.bf16.gmra.mxu1 %vm455_vm1, %v5731_v34  ;;  %v5775_v33 = vld [vmem:[%s5604_s21 + $0x18] sm:$0xff]  ;;  %v1062_v27 = vrot.slane %v1061_v20, 4  ;;  %v1071_v29 = vor.u32 %v1070_v21, %v1066_v17  ;;  %v1187_v48 = vunpack.c.l.b16 %v837_v25  ;;  %v842_v3 = vshll.u32 %v5827_v60, 16 }
  0x57   : > { %v848_v5 = vshll.u32 %v5830_v61, 16  ;;  %v852_v6 = vshrl.u32 %v5830_v61, 16  ;;  %v841_v13 = vrot.slane %v839_v2, 4  ;;  %v1079_v15 = vshrl.u32 %v385_v7, 16 }
  0x58   : > { %v1067_v49 = vsel %vm5640_vm4, %v1062_v27, %v1066_v17  ;;  %v1072_v52 = vrot.slane %v1071_v29, 4  ;;  %v5824_v56 = vpack.c.b16 %v1187_v48, %v1186_v23  ;;  %v844_v14 = vrot.slane %v842_v3, 5 }
  0x59   : > { %v1330_v57 = vunpack.c.l.b16 %v1067_v49  ;;  %v1082_v17 = vshll.u32 %v385_v7, 16  ;;  %v850_v20 = vrot.slane %v848_v5, 5  ;;  %v854_v21 = vrot.slane %v852_v6, 4  ;;  %v387_v49 = vld [vmem:[%s5595_s17 + $0x50] sm:$0x1] }
  0x5a   : > { %8252 = vst [vmem:[#allocation9_spill] sm:$0xff] %v5824_v56  ;;  %v1077_v63 = vsel %vm5640_vm4, %v1072_v52, %v1076_v30  ;;  %v1088_v23 = vshll.u32 %v386_v10, 16  ;;  %v845_v25 = vor.u32 %v844_v14, %v841_v13  ;;  %v858_v27 = vshll.u32 %v5855_v19, 16 }
  0x5b   : > { %v1331_v4 = vunpack.c.l.b16 %v1077_v63  ;;  %v1081_v29 = vrot.slane %v1079_v15, 4  ;;  %v1084_v30 = vrot.slane %v1082_v17, 5  ;;  %v855_v48 = vor.u32 %v854_v21, %v850_v20 }
  0x5c   : > { %v1090_v52 = vrot.slane %v1088_v23, 5  ;;  %v1481_v63 = vsel %vm5846_vm7, %v1479_v55, %v1480_v62  ;;  %v846_v2 = vrot.slane %v845_v25, 4  ;;  %v860_v3 = vrot.slane %v858_v27, 5  ;;  %v5873_v27 = vld [vmem:[%s5604_s21 + $0x30] sm:$0xff] }
  0x5d   : > { %v5852_v18 = vpack.c.b16 %v1331_v4, %v1330_v57  ;;  %v1092_v57 = vshrl.u32 %v386_v10, 16  ;;  %v1085_v4 = vor.u32 %v1084_v30, %v1081_v29  ;;  %v856_v5 = vrot.slane %v855_v48, 4 }
  0x5e   : > { %v1098_v7 = vshll.u32 %v387_v49, 16  ;;  %v1628_v14 = vunpack.c.l.b16 %v1481_v63  ;;  %v1484_v25 = vrot.slane %v5612_v9, 5  ;;  %v5007_v49 = vrot.slane %v5609_v8, 9 }
  0x5f   : > { %8255 = vst [vmem:[#allocation10_spill] sm:$0xff] %v5852_v18  ;;  %v1094_v6 = vrot.slane %v1092_v57, 4  ;;  %v861_v10 = vsel %vm5640_vm4, %v856_v5, %v860_v3  ;;  %v5881_v57 = vld [vmem:[%s5604_s21 + $0x54] sm:$0xf]  ;;  %v1487_v9 = vrot.slane %v5627_v16, 5 }
  0x60   : > { %v1100_v55 = vrot.slane %v1098_v7, 5  ;;  %v1189_v17 = vunpack.c.l.b16 %v861_v10  ;;  %v1486_v63 = vrot.slane %v1484_v25, 4  ;;  %v866_v3 = vshll.u32 %v5881_v57, 16  ;;  %v389_v7 = vld [vmem:[%s5595_s17 + $0x58] sm:$0xf] }
  0x61   : > { %v1095_v15 = vor.u32 %v1094_v6, %v1090_v52  ;;  %v388_v6 = vld [vmem:[%s5595_s17 + $0x54] sm:$0xf] }
  0x62   : > { %5000 = vmatmul.msk.bf16.gmra.mxu3 %vm455_vm1, %v5779_v40 }
  0x63   : > { %v1096_v23 = vrot.slane %v1095_v15, 4 }
  0x64   : > { %4990 = vmatmul.msk.bf16.gmra.mxu2 %vm455_vm1, %v5824_v56 }
  0x65   : > { %v1101_v29 = vsel %vm5640_vm4, %v1096_v23, %v1100_v55  ;;  %v1112_v55 = vshll.u32 %v389_v7, 16 }
  0x66   : > { %4929 = vmatmul.msk.bf16.gmra.mxu0 %vm455_vm1, %v5352_v31  ;;  %4976 = vmatmul.msk.bf16.gmra.mxu1 %vm455_vm1, %v5775_v33  ;;  %v5353_v31 = vld [vmem:[%s5595_s17 + $0x48] sm:$0xff]  ;;  %v1333_v48 = vunpack.c.l.b16 %v1101_v29  ;;  %v1485_v29 = vsel %vm5846_vm7, %v5007_v49, %v1484_v25 }
  0x72   : > { %5001 = vmatmul.msk.bf16.gmra.mxu3 %vm455_vm1, %v5852_v18 }
  0x76   : > { %4930 = vmatmul.msk.bf16.gmra.mxu0 %vm455_vm1, %v5353_v31  ;;  %4977 = vmatmul.msk.bf16.gmra.mxu1 %vm455_vm1, %v5816_v35  ;;  %v1478_v31 = vsel %vm5846_vm7, %v5006_v54, %v1477_v22  ;;  %v851_v22 = vsel %vm5640_vm4, %v846_v2, %v850_v20  ;;  %v1086_v54 = vrot.slane %v1085_v4, 4  ;;  %v863_v2 = vshrl.u32 %v5881_v57, 16 }
  0x77   : > { %v1627_v13 = vunpack.c.l.b16 %v1478_v31  ;;  %v1188_v62 = vunpack.c.l.b16 %v851_v22  ;;  %v1103_v22 = vshrl.u32 %v388_v6, 16 }
  0x78   : > { %v1091_v21 = vsel %vm5640_vm4, %v1086_v54, %v1090_v52  ;;  %v5884_v52 = vld [vmem:[%s5604_s21 + $0x58] sm:$0xf]  ;;  %v865_v16 = vrot.slane %v863_v2, 4  ;;  %v1106_v54 = vshll.u32 %v388_v6, 16  ;;  %v1114_v2 = vrot.slane %v1112_v55, 5 }
  0x79   : > { %v1647_v20 = vpack.c.b16 %v1628_v14, %v1627_v13  ;;  %v1332_v30 = vunpack.c.l.b16 %v1091_v21  ;;  %v5877_v31 = vpack.c.b16 %v1189_v17, %v1188_v62  ;;  %v872_v8 = vshll.u32 %v5884_v52, 16  ;;  %v5901_v14 = vld [vmem:[%s5604_s21 + $0x5c] sm:$0x1] }
  0x7a   : > { %v876_v5 = vshrl.u32 %v5884_v52, 16  ;;  %v868_v13 = vrot.slane %v866_v3, 5  ;;  %v1116_v62 = vshrl.u32 %v389_v7, 16  ;;  %v882_v21 = vshll.u32 %v5901_v14, 16 }
  0x7b   : > { %8256 = vst [vmem:[#allocation11_spill] sm:$0xff] %v5877_v31  ;;  %v5892_v4 = vpack.c.b16 %v1333_v48, %v1332_v30  ;;  %4991 = vmatmul.msk.bf16.gmra.mxu2 %vm455_vm1, %v5877_v31  ;;  %v874_v10 = vrot.slane %v872_v8, 5  ;;  %v1105_v23 = vrot.slane %v1103_v22, 4  ;;  %v390_v48 = vld [vmem:[%s5595_s17 + $0x5c] sm:$0x1]  ;;  %v1488_v8 = vsel %vm5846_vm7, %v1486_v63, %v1487_v9 }
  0x7c   : > { %v878_v15 = vrot.slane %v876_v5, 4  ;;  %v869_v17 = vor.u32 %v868_v13, %v865_v16  ;;  %v1118_v3 = vrot.slane %v1116_v62, 4  ;;  %v884_v6 = vrot.slane %v882_v21, 5 }
  0x7d   : > { %8257 = vst [vmem:[#allocation12_spill] sm:$0xff] %v5892_v4  ;;  %v1122_v22 = vshll.u32 %v390_v48, 16 }
  0x7e   : > { %v879_v30 = vor.u32 %v878_v15, %v874_v10  ;;  %v870_v5 = vrot.slane %v869_v17, 4  ;;  %v1119_v13 = vor.u32 %v1118_v3, %v1114_v2 }
  0x7f   : > { %v1124_v63 = vrot.slane %v1122_v22, 5 }
  0x80   : > { %v880_v16 = vrot.slane %v879_v30, 4  ;;  %v875_v25 = vsel %vm5640_vm4, %v870_v5, %v874_v10  ;;  %v1120_v55 = vrot.slane %v1119_v13, 4  ;;  %v5921_v10 = vld [vmem:[%s5604_s21 + $0x3c] sm:$0xff] }
  0x81   : > { %v1190_v9 = vunpack.c.l.b16 %v875_v25  ;;  %v5933_v5 = vld [vmem:[%s5604_s21 + $0x60] sm:$0xf]  ;;  %v5953_v25 = vld [vmem:[%s5595_s17 + $0x64] sm:$0xf] }
  0x82   : > { %5002 = vmatmul.msk.bf16.gmra.mxu3 %vm455_vm1, %v5892_v4  ;;  %v1630_v4 = vunpack.c.l.b16 %v1488_v8  ;;  %v885_v15 = vsel %vm5640_vm4, %v880_v16, %v884_v6  ;;  %v1125_v21 = vsel %vm5640_vm4, %v1120_v55, %v1124_v63  ;;  %v5936_v6 = vld [vmem:[%s5604_s21 + $0x64] sm:$0xf]  ;;  %8262 = vst [vmem:[#allocation17_spill] sm:$0xff] %v5953_v25 }
  0x83   : > { %v1191_v62 = vunpack.c.l.b16 %v885_v15  ;;  %v1335_v30 = vunpack.c.l.b16 %v1125_v21  ;;  %v896_v16 = vshll.u32 %v5936_v6, 16  ;;  %v900_v22 = vshrl.u32 %v5936_v6, 16 }
  0x84   : > { %v1140_v21 = vshrl.u32 %v5953_v25, 16 }
  0x85   : > { %v5929_v8 = vpack.c.b16 %v1191_v62, %v1190_v9  ;;  %v898_v55 = vrot.slane %v896_v16, 5  ;;  %v5959_v9 = vld [vmem:[%s5604_s21 + $0x68] sm:$0x1] }
  0x86   : > { %4978 = vmatmul.msk.bf16.gmra.mxu1 %vm455_vm1, %v5873_v27  ;;  %5027 = vmatmul.msk.bf16.vlgmr.msrb.gmra.mxu0 %vm455_vm1, %v1647_v20  ;;  %v1108_v20 = vrot.slane %v1106_v54, 5  ;;  %v1629_v54 = vunpack.c.l.b16 %v1485_v29  ;;  %v906_v18 = vshll.u32 %v5959_v9, 16  ;;  %v5970_v16 = vld [vmem:[%s5595_s17 + $0x68] sm:$0x1]  ;;  %v1142_v36 = vrot.slane %v1140_v21, 4 }
  0x87   : > { %8259 = vst [vmem:[#allocation14_spill] sm:$0xff] %v5929_v8 }
  0x88   : > { %v1109_v7 = vor.u32 %v1108_v20, %v1105_v23  ;;  %v1491_v23 = vrot.slane %v5662_v59, 5  ;;  %v5923_v20 = vpack.c.b16 %v1630_v4, %v1629_v54  ;;  %v887_v4 = vshrl.u32 %v5933_v5, 16  ;;  %v5950_v54 = vld [vmem:[%s5595_s17 + $0x60] sm:$0xf]  ;;  %8263 = vst [vmem:[#allocation18_spill] sm:$0xff] %v5970_v16 }
  0x89   : > { %8261 = vst [vmem:[#allocation16_spill] sm:$0xff] %v5950_v54  ;;  %v1127_v63 = vshrl.u32 %v5950_v54, 16  ;;  %v1130_v62 = vshll.u32 %v5950_v54, 16 }
  0x8a   : > { %v1110_v49 = vrot.slane %v1109_v7, 4  ;;  %8258 = vst [vmem:[#allocation13_spill] sm:$0xff] %v5923_v20  ;;  %v1493_v59 = vrot.slane %v1491_v23, 4  ;;  %v890_v7 = vshll.u32 %v5933_v5, 16 }
  0x8b   : > { %4992 = vmatmul.msk.bf16.gmra.mxu2 %vm455_vm1, %v5929_v8 }
  0x8c   : > { %v1115_v17 = vsel %vm5640_vm4, %v1110_v49, %v1114_v2  ;;  %v5008_v2 = vrot.slane %v5659_v58, 9  ;;  %v1494_v58 = vrot.slane %v5673_v1, 5  ;;  %v889_v49 = vrot.slane %v887_v4, 4 }
  0x8d   : > { %v1334_v29 = vunpack.c.l.b16 %v1115_v17  ;;  %v892_v15 = vrot.slane %v890_v7, 5  ;;  %v902_v1 = vrot.slane %v900_v22, 4  ;;  %v1136_v17 = vshll.u32 %v5953_v25, 16 }
  0x8e   : > { %v1129_v4 = vrot.slane %v1127_v63, 4  ;;  %v1132_v22 = vrot.slane %v1130_v62, 5 }
  0x8f   : > { %v5946_v13 = vpack.c.b16 %v1335_v30, %v1334_v29  ;;  %v1492_v29 = vsel %vm5846_vm7, %v5008_v2, %v1491_v23  ;;  %v893_v30 = vor.u32 %v892_v15, %v889_v49  ;;  %v903_v7 = vor.u32 %v902_v1, %v898_v55 }
  0x90   : > { %v1138_v40 = vrot.slane %v1136_v17, 5  ;;  %v1495_v23 = vsel %vm5846_vm7, %v1493_v59, %v1494_v58  ;;  %v908_v49 = vrot.slane %v906_v18, 5  ;;  %v1146_v15 = vshll.u32 %v5970_v16, 16 }
  0x91   : > { %8260 = vst [vmem:[#allocation15_spill] sm:$0xff] %v5946_v13  ;;  %v894_v2 = vrot.slane %v893_v30, 4  ;;  %v904_v63 = vrot.slane %v903_v7, 4  ;;  %v1631_v8 = vunpack.c.l.b16 %v1492_v29  ;;  %v1632_v21 = vunpack.c.l.b16 %v1495_v23 }
  0x92   : > { %5003 = vmatmul.msk.bf16.gmra.mxu3 %vm455_vm1, %v5946_v13  ;;  %v1133_v13 = vor.u32 %v1132_v22, %v1129_v4  ;;  %v1143_v1 = vor.u32 %v1142_v36, %v1138_v40  ;;  %v1148_v17 = vrot.slane %v1146_v15, 5  ;;  %v1498_v29 = vrot.slane %v5701_v47, 5 }
  0x93   : > { %v5925_v48 = vpop.f32.mrf.mxu0  ;;  %v5927_v3 = vpop.f32.mrf.mxu1  ;;  %v899_v62 = vsel %vm5640_vm4, %v894_v2, %v898_v55  ;;  %v5989_v55 = vld [vmem:[%s5604_s21 + $0x48] sm:$0xff]  ;;  %v5991_v4 = vpack.c.b16 %v1632_v21, %v1631_v8  ;;  %v6004_v2 = vld [vmem:[%s5604_s21 + $0x70] sm:$0xf] }
  0x94   : > { %v1134_v54 = vrot.slane %v1133_v13, 4  ;;  %v1144_v59 = vrot.slane %v1143_v1, 4  ;;  %v1192_v18 = vunpack.c.l.b16 %v899_v62  ;;  %v1500_v47 = vrot.slane %v1498_v29, 4  ;;  %v6018_v62 = vld [vmem:[%s5595_s17 + $0x6c] sm:$0xf] }
  0x95   : > { %8265 = vst [vmem:[#allocation20_spill] sm:$0xff] %v5991_v4  ;;  %v920_v15 = vshll.u32 %v6004_v2, 16  ;;  %v924_v1 = vshrl.u32 %v6004_v2, 16 }
  0x96   : > { %4979 = vmatmul.msk.bf16.gmra.mxu1 %vm455_vm1, %v5921_v10  ;;  %5028 = vmatmul.msk.bf16.gmra.mxu0 %vm455_vm1, %v5923_v20  ;;  %v909_v20 = vsel %vm5640_vm4, %v904_v63, %v908_v49  ;;  %v1139_v30 = vsel %vm5640_vm4, %v1134_v54, %v1138_v40  ;;  %v1149_v36 = vsel %vm5640_vm4, %v1144_v59, %v1148_v17  ;;  %v5009_v40 = vrot.slane %v5698_v46, 9  ;;  %v6001_v54 = vld [vmem:[%s5604_s21 + $0x6c] sm:$0xf]  ;;  %v6021_v17 = vld [vmem:[%s5595_s17 + $0x70] sm:$0xf] }
  0x97   : > { %v1193_v58 = vunpack.c.l.b16 %v909_v20  ;;  %v1336_v7 = vunpack.c.l.b16 %v1139_v30  ;;  %v1337_v22 = vunpack.c.l.b16 %v1149_v36  ;;  %v911_v8 = vshrl.u32 %v6001_v54, 16  ;;  %8268 = vst [vmem:[#allocation23_spill] sm:$0xff] %v6018_v62  ;;  %v6027_v30 = vld [vmem:[%s5604_s21 + $0x74] sm:$0x1] }
  0x98   : > { %v914_v49 = vshll.u32 %v6001_v54, 16  ;;  %v1501_v46 = vrot.slane %v5710_v53, 5  ;;  %8269 = vst [vmem:[#allocation24_spill] sm:$0xff] %v6021_v17  ;;  %v926_v53 = vrot.slane %v924_v1, 4  ;;  %v1154_v36 = vshll.u32 %v6018_v62, 16 }
  0x99   : > { %v5997_v20 = vpack.c.b16 %v1193_v58, %v1192_v18  ;;  %v6014_v63 = vpack.c.b16 %v1337_v22, %v1336_v7  ;;  %v913_v21 = vrot.slane %v911_v8, 4  ;;  %v922_v18 = vrot.slane %v920_v15, 5  ;;  %v6038_v15 = vld [vmem:[%s5595_s17 + $0x74] sm:$0x1] }
  0x9a   : > { %v916_v59 = vrot.slane %v914_v49, 5  ;;  %v1151_v58 = vshrl.u32 %v6018_v62, 16  ;;  %v1160_v7 = vshll.u32 %v6021_v17, 16  ;;  %v1164_v22 = vshrl.u32 %v6021_v17, 16  ;;  %8270 = vst [vmem:[#allocation25_spill] sm:$0xff] %v6038_v15 }
  0x9b   : > { %v5972_v45 = vpop.f32.mrf.mxu0  ;;  %v5974_v0 = vpop.f32.mrf.mxu1  ;;  %8266 = vst [vmem:[#allocation21_spill] sm:$0xff] %v5997_v20  ;;  %4993 = vmatmul.msk.bf16.gmra.mxu2 %vm455_vm1, %v5997_v20  ;;  %v930_v20 = vshll.u32 %v6027_v30, 16  ;;  %v927_v49 = vor.u32 %v926_v53, %v922_v18  ;;  %v1156_v1 = vrot.slane %v1154_v36, 5 }
  0x9c   : > { %8264 = vst [vmem:[#allocation19_spill] sm:$0xff] %v5974_v0  ;;  %v917_v16 = vor.u32 %v916_v59, %v913_v21  ;;  %v1153_v8 = vrot.slane %v1151_v58, 4  ;;  %v1162_v31 = vrot.slane %v1160_v7, 5  ;;  %v1166_v62 = vrot.slane %v1164_v22, 4 }
  0x9d   : > { %8267 = vst [vmem:[#allocation22_spill] sm:$0xff] %v6014_v63  ;;  %v932_v21 = vrot.slane %v930_v20, 5  ;;  %v1170_v59 = vshll.u32 %v6038_v15, 16  ;;  %v928_v58 = vrot.slane %v927_v49, 4  ;;  %v6060_v49 = vld [vmem:[%s5604_s21 + $0x54] sm:$0xff] }
  0x9e   : > { %v1157_v17 = vor.u32 %v1156_v1, %v1153_v8  ;;  %v708_v8 = vshrl.u32 %v5804_v11, 16 }
  0x9f   : > { %v1172_v7 = vrot.slane %v1170_v59, 5 }
  0xa0   : > { %v1158_v56 = vrot.slane %v1157_v17, 4 }
  0xa2   : > { %5004 = vmatmul.msk.bf16.gmra.mxu3 %vm455_vm1, %v6014_v63  ;;  %v1167_v63 = vor.u32 %v1166_v62, %v1162_v31  ;;  %v1163_v20 = vsel %vm5640_vm4, %v1158_v56, %v1162_v31  ;;  %v698_v62 = vshll.u32 %v5810_v24, 16 }
  0xa3   : > { %v5993_v13 = vpop.f32.mrf.mxu0  ;;  %v5995_v23 = vpop.f32.mrf.mxu1 }
  0xa4   : > { %v1168_v26 = vrot.slane %v1167_v63, 4  ;;  %v1338_v63 = vunpack.c.l.b16 %v1163_v20 }
  0xa6   : > { %4980 = vmatmul.msk.bf16.gmra.mxu1 %vm455_vm1, %v5989_v55  ;;  %5029 = vmatmul.msk.bf16.gmra.mxu0 %vm455_vm1, %v5991_v4  ;;  %v1499_v4 = vsel %vm5846_vm7, %v5009_v40, %v1498_v29  ;;  %v1502_v29 = vsel %vm5846_vm7, %v1500_v47, %v1501_v46  ;;  %v918_v40 = vrot.slane %v917_v16, 4  ;;  %v1173_v46 = vsel %vm5640_vm4, %v1168_v26, %v1172_v7 }
  0xa7   : > { %v1633_v53 = vunpack.c.l.b16 %v1499_v4  ;;  %v1634_v22 = vunpack.c.l.b16 %v1502_v29  ;;  %v695_v4 = vshrl.u32 %v5810_v24, 16  ;;  %v1505_v26 = vrot.slane %v5741_v39, 5  ;;  %v1253_v59 = vpop.f32.mrf.mxu2 }
  0xa8   : > { %v923_v36 = vsel %vm5640_vm4, %v918_v40, %v922_v18  ;;  %v704_v18 = vshll.u32 %v5804_v11, 16  ;;  %v700_v24 = vrot.slane %v698_v62, 5  ;;  %v1508_v39 = vrot.slane %v5751_v44, 5 }
  0xa9   : > { %v1194_v47 = vunpack.c.l.b16 %v923_v36  ;;  %v6062_v17 = vpack.c.b16 %v1634_v22, %v1633_v53  ;;  %v697_v29 = vrot.slane %v695_v4, 4  ;;  %v1507_v53 = vrot.slane %v1505_v26, 4 }
  0xaa   : > { %v706_v40 = vrot.slane %v704_v18, 5  ;;  %v714_v22 = vshll.u32 %v5819_v43, 16 }
  0xab   : > { %v6040_v25 = vpop.f32.mrf.mxu0  ;;  %v6042_v0 = vpop.f32.mrf.mxu1  ;;  %8272 = vst [vmem:[#allocation27_spill] sm:$0xff] %v6062_v17  ;;  %v701_v36 = vor.u32 %v700_v24, %v697_v29  ;;  %v1509_v44 = vsel %vm5846_vm7, %v1507_v53, %v1508_v39  ;;  %v6099_v29 = vld [vmem:[%s5604_s21 + $0x60] sm:$0xff]  ;;  %v1512_v39 = vrot.slane %v5785_v42, 5  ;;  %v5011_v42 = vrot.slane %v5782_v41, 9  ;;  %v6139_v41 = vld [vmem:[%s5604_s21 + $0x6c] sm:$0xff] }
  0xac   : > { %8271 = vst [vmem:[#allocation26_spill] sm:$0xff] %v6042_v0  ;;  %v933_v0 = vsel %vm5640_vm4, %v928_v58, %v932_v21  ;;  %v710_v21 = vrot.slane %v708_v8, 4  ;;  %v5010_v58 = vrot.slane %v5738_v37, 9  ;;  %v1397_v20 = vpop.f32.mrf.mxu3  ;;  %v716_v62 = vrot.slane %v714_v22, 5 }
  0xad   : > { %v1195_v16 = vunpack.c.l.b16 %v933_v0  ;;  %v1339_v0 = vunpack.c.l.b16 %v1173_v46  ;;  %v702_v46 = vrot.slane %v701_v36, 4  ;;  %v1636_v8 = vunpack.c.l.b16 %v1509_v44  ;;  %8279 = vst [vmem:[#allocation34_spill] sm:$0xff] %v6139_v41 }
  0xae   : > { %v711_v7 = vor.u32 %v710_v21, %v706_v40  ;;  %v1506_v37 = vsel %vm5846_vm7, %v5010_v58, %v1505_v26 }
  0xaf   : > { %v6069_v31 = vpack.c.b16 %v1195_v16, %v1194_v47  ;;  %v6075_v11 = vpack.c.b16 %v1339_v0, %v1338_v63  ;;  %v1635_v18 = vunpack.c.l.b16 %v1506_v37  ;;  %v6092_v43 = vpop.f32.mrf.mxu2  ;;  %v707_v63 = vsel %vm5640_vm4, %v702_v46, %v706_v40 }
  0xb0   : > { %v712_v4 = vrot.slane %v711_v7, 4  ;;  %v6103_v24 = vunpack.c.l.b16 %v707_v63  ;;  %v1515_v37 = vrot.slane %v5794_v51, 5 }
  0xb1   : > { %8273 = vst [vmem:[#allocation28_spill] sm:$0xff] %v6069_v31  ;;  %4994 = vmatmul.msk.bf16.gmra.mxu2 %vm455_vm1, %v6069_v31  ;;  %v6101_v26 = vpack.c.b16 %v1636_v8, %v1635_v18 }
  0xb2   : > { %8274 = vst [vmem:[#allocation29_spill] sm:$0xff] %v6075_v11  ;;  %5005 = vmatmul.msk.bf16.gmra.mxu3 %vm455_vm1, %v6075_v11  ;;  %v717_v0 = vsel %vm5640_vm4, %v712_v4, %v716_v62  ;;  %v1513_v4 = vsel %vm5846_vm7, %v5011_v42, %v1512_v39 }
  0xb3   : > { %v6064_v1 = vpop.f32.mrf.mxu0  ;;  %v6066_v56 = vpop.f32.mrf.mxu1  ;;  %8276 = vst [vmem:[#allocation31_spill] sm:$0xff] %v6101_v26  ;;  %v6105_v21 = vunpack.c.l.b16 %v717_v0  ;;  %v1637_v63 = vunpack.c.l.b16 %v1513_v4  ;;  %v1522_v4 = vrot.slane %v5855_v19, 5 }
  0xb4   : > { %v6113_v40 = vpop.f32.mrf.mxu3 }
  0xb6   : > { %4981 = vmatmul.msk.bf16.gmra.mxu1 %vm455_vm1, %v6060_v49  ;;  %5030 = vmatmul.msk.bf16.gmra.mxu0 %vm455_vm1, %v6062_v17 }
  0xb7   : > { %v6121_v22 = vpop.f32.mrf.mxu2 }
  0xbb   : > { %v6084_v47 = vpop.f32.mrf.mxu0  ;;  %v6086_v16 = vpop.f32.mrf.mxu1 }
  0xbc   : > { %8275 = vst [vmem:[#allocation30_spill] sm:$0xff] %v6086_v16  ;;  %v6134_v8 = vpop.f32.mrf.mxu3 }
  0xbf   : > { %v6136_v0 = vpop.f32.mrf.mxu2 }
  0xc3   : > { %v6107_v58 = vpop.f32.mrf.mxu0  ;;  %v641_v53 = vpop.f32.mrf.mxu1 }
  0xc4   : > { %v6111_v36 = vadd.f32 %v641_v53, %v5925_v48  ;;  %v1514_v48 = vrot.slane %v1512_v39, 4  ;;  %v6147_v42 = vpop.f32.mrf.mxu3 }
  0xc6   : > { %8277 = vst [vmem:[#allocation32_spill] sm:$0xff] %v6111_v36  ;;  %4982 = vmatmul.msk.bf16.gmra.mxu1 %vm455_vm1, %v6099_v29  ;;  %5031 = vmatmul.msk.bf16.gmra.mxu0 %vm455_vm1, %v6101_v26  ;;  %v1516_v62 = vsel %vm5846_vm7, %v1514_v48, %v1515_v37  ;;  %v1519_v37 = vrot.slane %v5830_v61, 5 }
  0xc7   : > { %v1638_v51 = vunpack.c.l.b16 %v1516_v62  ;;  %v6160_v61 = vpop.f32.mrf.mxu2 }
  0xc8   : > { %v1521_v62 = vrot.slane %v1519_v37, 4 }
  0xc9   : > { %v6141_v53 = vpack.c.b16 %v1638_v51, %v1637_v63  ;;  %v6156_v63 = vld [vmem:[%s5595_s17] sm:$0xf] }
  0xca   : > { %v1523_v19 = vsel %vm5846_vm7, %v1521_v62, %v1522_v4 }
  0xcb   : > { %v6125_v44 = vpop.f32.mrf.mxu0  ;;  %v643_v46 = vpop.f32.mrf.mxu1  ;;  %8280 = vst [vmem:[#allocation35_spill] sm:$0xff] %v6141_v53  ;;  %v1640_v31 = vunpack.c.l.b16 %v1523_v19  ;;  %v5037_v19 = vld [vmem:[%s8180_s3 + $0x4] sm:$0x3] }
  0xcc   : > { %v6132_v18 = vadd.f32 %v643_v46, %v5972_v45  ;;  %v5012_v46 = vrot.slane %v5827_v60, 9 }
  0xce   : > { %8278 = vst [vmem:[#allocation33_spill] sm:$0xff] %v6132_v18 }
  0xd3   : > { %v6143_v7 = vpop.f32.mrf.mxu0  ;;  %v646_v39 = vpop.f32.mrf.mxu1 }
  0xd4   : > { %v647_v45 = vadd.f32 %v646_v39, %v5993_v13  ;;  %v6163_v13 = vld [vmem:[%s5595_s17 + $0x4] sm:$0xf]  ;;  %v935_v39 = vshrl.u32 %v6156_v63, 16 }
  0xd5   : > { %v6178_v26 = vpop.f32.mrf.mxu3 }
  0xd6   : > { %v1300_v48 = vadd.f32 %v1253_v59, %v647_v45  ;;  %4983 = vmatmul.msk.bf16.gmra.mxu1 %vm455_vm1, %v6139_v41  ;;  %5032 = vmatmul.msk.bf16.gmra.mxu0 %vm455_vm1, %v6141_v53  ;;  %v1520_v59 = vsel %vm5846_vm7, %v5012_v46, %v1519_v37  ;;  %v938_v45 = vshll.u32 %v6156_v63, 16  ;;  %v5048_v46 = vld [vmem:[%s8179_s2 + $0x6] sm:$0x3]  ;;  %v937_v17 = vrot.slane %v935_v39, 4 }
  0xd7   : > { %v1639_v37 = vunpack.c.l.b16 %v1520_v59  ;;  %v1924_v18 = vsel %vm486_vm0, %v5048_v46, 0 }
  0xd8   : > { %v6158_v51 = vadd.f32 %v1397_v20, %v1300_v48  ;;  %v944_v20 = vshll.u32 %v6163_v13, 16  ;;  %v948_v48 = vshrl.u32 %v6163_v13, 16  ;;  %v940_v15 = vrot.slane %v938_v45, 5  ;;  %1933 = vmatpush.bf16.msrb.mxu2 %v1924_v18 }
  0xd9   : > { %v6194_v39 = vpack.c.b16 %v1640_v31, %v1639_v37  ;;  %v1529_v37 = vrot.slane %v5901_v14, 5 }
  0xda   : > { %v946_v4 = vrot.slane %v944_v20, 5  ;;  %v950_v62 = vrot.slane %v948_v48, 4  ;;  %v941_v45 = vor.u32 %v940_v15, %v937_v17  ;;  %v6196_v20 = vpop.f32.mrf.mxu2  ;;  %v5416_v15 = vld [vmem:[%s5595_s17 + $0xc] sm:$0xff] }
  0xdb   : > { %v6169_v11 = vpop.f32.mrf.mxu0  ;;  %v648_v60 = vpop.f32.mrf.mxu1  ;;  %5053 = vmatmul.msk.bf16.vlgmr.msrb.gmra.mxu2 %vm455_vm1, %v5731_v34  ;;  %v5078_v34 = vld [vmem:[%s8179_s2 + $0x8] sm:$0x3] }
  0xdc   : > { %v6176_v53 = vadd.f32 %v648_v60, %v6040_v25  ;;  %v5063_v25 = vld [vmem:[%s8180_s3 + $0x6] sm:$0x3]  ;;  %v6188_v60 = vld [vmem:[%s5595_s17 + $0x8] sm:$0x1]  ;;  %v951_v46 = vor.u32 %v950_v62, %v946_v4  ;;  %v2154_v17 = vsel %vm486_vm0, %v5078_v34, 0 }
  0xdd   : > { %v2016_v59 = vsel %vm486_vm0, %v5063_v25, 0  ;;  %v954_v36 = vshll.u32 %v6188_v60, 16  ;;  %v1526_v25 = vrot.slane %v5884_v52, 5  ;;  %v6206_v31 = vpop.f32.mrf.mxu3  ;;  %v8281_v52 = vpack.c.b16 %v6105_v21, %v6103_v24  ;;  %2163 = vmatpush.bf16.msra.mxu0 %v2154_v17 }
  0xde   : > { %2025 = vmatpush.bf16.msrb.mxu3 %v2016_v59  ;;  %v1832_v59 = vsel %vm486_vm0, %v5037_v19, 0  ;;  %v952_v19 = vrot.slane %v951_v46, 4 }
  0xdf   : > { %v1528_v16 = vrot.slane %v1526_v25, 4 }
  0xe1   : > { %5068 = vmatmul.msk.bf16.vlgmr.msrb.gmra.mxu3 %vm455_vm1, %v5416_v15  ;;  %v5013_v15 = vrot.slane %v5881_v57, 9  ;;  %v1530_v57 = vsel %vm5846_vm7, %v1528_v16, %v1529_v37  ;;  %v1557_v37 = vrot.slane %v6163_v13, 5 }
  0xe2   : > { %v1642_v17 = vunpack.c.l.b16 %v1530_v57 }
  0xe3   : > { %v6200_v18 = vpop.f32.mrf.mxu0  ;;  %v651_v48 = vpop.f32.mrf.mxu1 }
  0xe4   : > { %v652_v41 = vadd.f32 %v651_v48, %v6064_v1  ;;  %v942_v1 = vrot.slane %v941_v45, 4  ;;  %v956_v48 = vrot.slane %v954_v36, 5  ;;  %v1527_v36 = vsel %vm5846_vm7, %v5013_v15, %v1526_v25  ;;  %v5417_v15 = vld [vmem:[%s5595_s17 + $0x18] sm:$0xff] }
  0xe5   : > { %v1641_v34 = vunpack.c.l.b16 %v1527_v36  ;;  %v1533_v25 = vrot.slane %v5936_v6, 5  ;;  %v1560_v36 = vrot.slane %v6188_v60, 5 }
  0xe6   : > { %v1302_v62 = vadd.f32 %v6121_v22, %v652_v41  ;;  %4985 = vmatmul.msk.bf16.vlgmr.msra.gmra.mxu1 %vm455_vm1, %v8281_v52  ;;  %5033 = vmatmul.msk.bf16.gmra.mxu0 %vm455_vm1, %v6194_v39  ;;  %v947_v24 = vsel %vm5640_vm4, %v942_v1, %v946_v4  ;;  %v957_v21 = vsel %vm5640_vm4, %v952_v19, %v956_v48  ;;  %v5089_v4 = vld [vmem:[%s8180_s3 + $0x8] sm:$0x3] }
  0xe7   : > { %1841 = vmatpush.bf16.msra.mxu1 %v1832_v59  ;;  %v1320_v46 = vunpack.c.l.b16 %v947_v24  ;;  %v1321_v59 = vunpack.c.l.b16 %v957_v21  ;;  %v6242_v1 = vpack.c.b16 %v1642_v17, %v1641_v34  ;;  %v2244_v48 = vsel %vm486_vm0, %v5089_v4, 0 }
  0xe8   : > { %v6224_v14 = vadd.f32 %v6134_v8, %v1302_v62  ;;  %v1268_v8 = vpop.f32.mrf.mxu2  ;;  %v1412_v62 = vpop.f32.mrf.mxu3  ;;  %v1535_v13 = vrot.slane %v1533_v25, 4  ;;  %v1559_v21 = vrot.slane %v1557_v37, 4 }
  0xe9   : > { %v1340_v52 = vpack.c.b16 %v1321_v59, %v1320_v46  ;;  %8282 = vst [vmem:[#allocation36_spill] sm:$0xff] %v6242_v1 }
  0xea   : > { %v1561_v60 = vsel %vm5846_vm7, %v1559_v21, %v1560_v36  ;;  %v1543_v36 = vrot.slane %v6027_v30, 5 }
  0xeb   : > { %v6226_v22 = vpop.f32.mrf.mxu0  ;;  %v653_v41 = vpop.f32.mrf.mxu1  ;;  %5054 = vmatmul.msk.bf16.gmra.mxu2 %vm455_vm1, %v5775_v33  ;;  %v5014_v33 = vrot.slane %v5933_v5, 9 }
  0xec   : > { %v6237_v45 = vadd.f32 %v653_v41, %v6084_v47  ;;  %v1536_v41 = vrot.slane %v5959_v9, 5 }
  0xed   : > { %v1534_v5 = vsel %vm5846_vm7, %v5014_v33, %v1533_v25 }
  0xee   : > { %v1537_v59 = vsel %vm5846_vm7, %v1535_v13, %v1536_v41  ;;  %v1643_v34 = vunpack.c.l.b16 %v1534_v5  ;;  %v5418_v41 = vld [vmem:[%s5595_s17 + $0x10] sm:$0xf]  ;;  %v5419_v13 = vld [vmem:[%s5595_s17 + $0x24] sm:$0xff]  ;;  %v5421_v5 = vld [vmem:[%s5595_s17 + $0xc] sm:$0xf] }
  0xef   : > { %v1644_v17 = vunpack.c.l.b16 %v1537_v59  ;;  %v5017_v59 = vrot.slane %v5421_v5, 9  ;;  %v1301_v5 = vadd.f32 %v6092_v43, %v6176_v53 }
  0xf0   : > { %v6260_v6 = vpop.f32.mrf.mxu2 }
  0xf1   : > { %5069 = vmatmul.msk.bf16.gmra.mxu3 %vm455_vm1, %v5417_v15  ;;  %v6282_v25 = vpack.c.b16 %v1644_v17, %v1643_v34 }
  0xf3   : > { %v6246_v16 = vpop.f32.mrf.mxu0  ;;  %v656_v47 = vpop.f32.mrf.mxu1  ;;  %8283 = vst [vmem:[#allocation37_spill] sm:$0xff] %v6282_v25 }
  0xf4   : > { %v657_v19 = vadd.f32 %v656_v47, %v6107_v58  ;;  %v5016_v58 = vrot.slane %v6156_v63, 9 }
  0xf6   : > { %v1304_v24 = vadd.f32 %v6160_v61, %v657_v19  ;;  %4996 = vmatmul.msk.bf16.vlgmr.msrb.gmra.mxu1 %vm455_vm1, %v1340_v52  ;;  %5034 = vmatmul.msk.bf16.gmra.mxu0 %vm455_vm1, %v6242_v1  ;;  %v6267_v61 = vpop.f32.mrf.mxu3  ;;  %v1558_v63 = vsel %vm5846_vm7, %v5016_v58, %v1557_v37  ;;  %v1772_v52 = vunpack.c.l.b16 %v1561_v60  ;;  %v5420_v58 = vld [vmem:[%s5595_s17 + $0x14] sm:$0x1] }
  0xf7   : > { %2253 = vmatpush.bf16.msrb.mxu1 %v2244_v48  ;;  %v1771_v4 = vunpack.c.l.b16 %v1558_v63  ;;  %v1567_v21 = vrot.slane %v5420_v58, 5 }
  0xf8   : > { %v6265_v9 = vadd.f32 %v6178_v26, %v1304_v24  ;;  %v1273_v47 = vpop.f32.mrf.mxu2  ;;  %v1564_v24 = vrot.slane %v5418_v41, 5 }
  0xf9   : > { %v1791_v19 = vpack.c.b16 %v1772_v52, %v1771_v4 }
  0xfa   : > { %v1566_v63 = vrot.slane %v1564_v24, 4 }
  0xfb   : > { %v6269_v57 = vpop.f32.mrf.mxu0  ;;  %v658_v46 = vpop.f32.mrf.mxu1  ;;  %5055 = vmatmul.msk.bf16.gmra.mxu2 %vm455_vm1, %v5816_v35  ;;  %v5015_v35 = vrot.slane %v6001_v54, 9  ;;  %v1565_v54 = vsel %vm5846_vm7, %v5017_v59, %v1564_v24 }
  0xfc   : > { %v6280_v26 = vadd.f32 %v658_v46, %v6125_v44  ;;  %v1540_v44 = vrot.slane %v6004_v2, 5  ;;  %v1568_v4 = vsel %vm5846_vm7, %v1566_v63, %v1567_v21  ;;  %v1773_v41 = vunpack.c.l.b16 %v1565_v54  ;;  %v5424_v63 = vld [vmem:[%s5595_s17 + $0x20] sm:$0x1] }
  0xfd   : > { %v1445_v54 = vadd.f32 %v6113_v40, %v1301_v5  ;;  %v5427_v5 = vld [vmem:[%s5595_s17 + $0x3c] sm:$0xff] }
  0xfe   : > { %v1417_v48 = vpop.f32.mrf.mxu3  ;;  %v1542_v2 = vrot.slane %v1540_v44, 4  ;;  %v1541_v30 = vsel %vm5846_vm7, %v5015_v35, %v1540_v44 }
 0x100   : > { %v6302_v60 = vpop.f32.mrf.mxu2 }
 0x101   : > { %5070 = vmatmul.msk.bf16.gmra.mxu3 %vm455_vm1, %v5419_v13 }
 0x103   : > { %v661_v37 = vpop.f32.mrf.mxu1  ;;  %v6286_v15 = vpop.f32.mrf.mxu0 }
 0x104   : > { %v662_v33 = vadd.f32 %v661_v37, %v6143_v7 }
 0x106   : > { %v1306_v46 = vadd.f32 %v1268_v8, %v662_v33  ;;  %5035 = vmatmul.msk.bf16.gmra.mxu0 %vm455_vm1, %v6282_v25  ;;  %5038 = vmatmul.msk.bf16.vlgmr.msra.gmra.mxu1 %vm455_vm1, %v1791_v19  ;;  %v1544_v8 = vsel %vm5846_vm7, %v1542_v2, %v1543_v36  ;;  %v6317_v52 = vpop.f32.mrf.mxu3  ;;  %v1645_v19 = vunpack.c.l.b16 %v1541_v30  ;;  %v1774_v33 = vunpack.c.l.b16 %v1568_v4  ;;  %v5423_v2 = vld [vmem:[%s5595_s17 + $0x30] sm:$0xff] }
 0x107   : > { %v1646_v37 = vunpack.c.l.b16 %v1544_v8 }
 0x108   : > { %v6300_v7 = vadd.f32 %v1412_v62, %v1306_v46  ;;  %v6321_v13 = vpack.c.b16 %v1774_v33, %v1773_v41  ;;  %v1278_v35 = vpop.f32.mrf.mxu2 }
 0x109   : > { %v6319_v44 = vpack.c.b16 %v1646_v37, %v1645_v19 }
 0x10b   : > { %v663_v34 = vpop.f32.mrf.mxu1  ;;  %v6304_v17 = vpop.f32.mrf.mxu0  ;;  %8284 = vst [vmem:[#allocation38_spill] sm:$0xff] %v6319_v44  ;;  %5056 = vmatmul.msk.bf16.gmra.mxu2 %vm455_vm1, %v5873_v27 }
 0x10c   : > { %v6315_v62 = vadd.f32 %v663_v34, %v6169_v11  ;;  %v5422_v11 = vld [vmem:[%s5595_s17 + $0x1c] sm:$0xf]  ;;  %v5425_v34 = vld [vmem:[%s5595_s17 + $0x18] sm:$0xf] }
 0x10d   : > { %v1571_v21 = vrot.slane %v5422_v11, 5 }
 0x10e   : > { %v1422_v27 = vpop.f32.mrf.mxu3 }
 0x10f   : > { %v1573_v30 = vrot.slane %v1571_v21, 4 }
 0x110   : > { %v6352_v33 = vpop.f32.mrf.mxu2 }
 0x111   : > { %5071 = vmatmul.msk.bf16.gmra.mxu3 %vm455_vm1, %v5423_v2 }
 0x113   : > { %v666_v24 = vpop.f32.mrf.mxu1  ;;  %v1704_v58 = vpop.f32.mrf.mxu0 }
 0x114   : > { %v667_v36 = vadd.f32 %v666_v24, %v6200_v18  ;;  %v6328_v46 = vadd.f32 %v1704_v58, %v6158_v51  ;;  %v1574_v18 = vrot.slane %v5424_v63, 5  ;;  %v5018_v51 = vrot.slane %v5425_v34, 9  ;;  %v5429_v34 = vld [vmem:[%s5595_s17 + $0x24] sm:$0xf] }
 0x116   : > { %v1308_v59 = vadd.f32 %v1273_v47, %v667_v36  ;;  %5036 = vmatmul.msk.bf16.gmra.mxu0 %vm455_vm1, %v6319_v44  ;;  %5039 = vmatmul.msk.bf16.gmra.mxu1 %vm455_vm1, %v6321_v13  ;;  %v1572_v53 = vsel %vm5846_vm7, %v5018_v51, %v1571_v21  ;;  %v1575_v47 = vsel %vm5846_vm7, %v1573_v30, %v1574_v18  ;;  %v6354_v40 = vpop.f32.mrf.mxu3  ;;  %v5426_v21 = vld [vmem:[%s5595_s17 + $0x28] sm:$0xf] }
 0x117   : > { %v1775_v41 = vunpack.c.l.b16 %v1572_v53 }
 0x118   : > { %v6340_v8 = vadd.f32 %v1417_v48, %v1308_v59  ;;  %v1776_v48 = vunpack.c.l.b16 %v1575_v47  ;;  %v1303_v59 = vadd.f32 %v6136_v0, %v6237_v45  ;;  %v1283_v30 = vpop.f32.mrf.mxu2 }
 0x11a   : > { %v6356_v24 = vpack.c.b16 %v1776_v48, %v1775_v41 }
 0x11b   : > { %v668_v4 = vpop.f32.mrf.mxu1  ;;  %v1706_v43 = vpop.f32.mrf.mxu0  ;;  %5057 = vmatmul.msk.bf16.gmra.mxu2 %vm455_vm1, %v5921_v10  ;;  %v5428_v10 = vld [vmem:[%s5595_s17 + $0x2c] sm:$0x1] }
 0x11c   : > { %v6348_v19 = vadd.f32 %v668_v4, %v6226_v22  ;;  %v6350_v37 = vadd.f32 %v1706_v43, %v1445_v54  ;;  %8285 = vst [vmem:[#allocation39_spill] sm:$0xff] %v6356_v24  ;;  %v1578_v22 = vrot.slane %v5426_v21, 5  ;;  %v1581_v18 = vrot.slane %v5428_v10, 5  ;;  %v5433_v10 = vld [vmem:[%s5595_s17 + $0x30] sm:$0xf] }
 0x11d   : > { %v1447_v54 = vadd.f32 %v6147_v42, %v1303_v59  ;;  %v1305_v59 = vadd.f32 %v6196_v20, %v6280_v26 }
 0x11e   : > { %v1580_v51 = vrot.slane %v1578_v22, 4  ;;  %v1427_v4 = vpop.f32.mrf.mxu3 }
 0x120   : > { %v6389_v42 = vpop.f32.mrf.mxu2 }
 0x121   : > { %5072 = vmatmul.msk.bf16.gmra.mxu3 %vm455_vm1, %v5427_v5  ;;  %v5431_v5 = vld [vmem:[%s5595_s17 + $0x48] sm:$0xff] }
 0x123   : > { %v671_v58 = vpop.f32.mrf.mxu1  ;;  %v1709_v11 = vpop.f32.mrf.mxu0 }
 0x124   : > { %v672_v36 = vadd.f32 %v671_v58, %v6246_v16  ;;  %v6363_v2 = vadd.f32 %v1709_v11, %v6224_v14  ;;  %v5019_v16 = vrot.slane %v5429_v34, 9  ;;  %v5430_v11 = vld [vmem:[%s5595_s17 + $0x34] sm:$0xf] }
 0x125   : > { %v1585_v21 = vrot.slane %v5430_v11, 5 }
 0x126   : > { %v1310_v63 = vadd.f32 %v1278_v35, %v672_v36  ;;  %5040 = vmatmul.msk.bf16.gmra.mxu1 %vm455_vm1, %v6356_v24  ;;  %5079 = vmatmul.msk.bf16.vlgmr.msra.gmra.mxu0 %vm455_vm1, %v5648_v50  ;;  %v1579_v35 = vsel %vm5846_vm7, %v5019_v16, %v1578_v22  ;;  %v1582_v50 = vsel %vm5846_vm7, %v1580_v51, %v1581_v18  ;;  %v6398_v36 = vpop.f32.mrf.mxu3 }
 0x127   : > { %v1778_v47 = vunpack.c.l.b16 %v1582_v50  ;;  %v1587_v18 = vrot.slane %v1585_v21, 4  ;;  %v1449_v16 = vadd.f32 %v6206_v31, %v1305_v59  ;;  %v5436_v59 = vld [vmem:[%s5595_s17 + $0x44] sm:$0x1] }
 0x128   : > { %v6375_v14 = vadd.f32 %v1422_v27, %v1310_v63  ;;  %v1777_v27 = vunpack.c.l.b16 %v1579_v35 }
 0x12a   : > { %v6387_v41 = vpack.c.b16 %v1778_v47, %v1777_v27  ;;  %v5434_v47 = vld [vmem:[%s5595_s17 + $0x40] sm:$0xf] }
 0x12b   : > { %v673_v0 = vpop.f32.mrf.mxu1  ;;  %v1711_v45 = vpop.f32.mrf.mxu0  ;;  %5058 = vmatmul.msk.bf16.gmra.mxu2 %vm455_vm1, %v5989_v55  ;;  %v5432_v55 = vld [vmem:[%s5595_s17 + $0x38] sm:$0x1] }
 0x12c   : > { %v6383_v43 = vadd.f32 %v673_v0, %v6269_v57  ;;  %v6385_v53 = vadd.f32 %v1711_v45, %v1447_v54  ;;  %8286 = vst [vmem:[#allocation40_spill] sm:$0xff] %v6387_v41  ;;  %v1288_v0 = vpop.f32.mrf.mxu2 }
 0x12e   : > { %v1432_v50 = vpop.f32.mrf.mxu3 }
 0x131   : > { %5073 = vmatmul.msk.bf16.gmra.mxu3 %vm455_vm1, %v5431_v5 }
 0x133   : > { %v676_v48 = vpop.f32.mrf.mxu1  ;;  %v1714_v58 = vpop.f32.mrf.mxu0 }
 0x134   : > { %v677_v57 = vadd.f32 %v676_v48, %v5927_v3  ;;  %v6396_v22 = vadd.f32 %v1714_v58, %v6265_v9  ;;  %v1588_v3 = vrot.slane %v5432_v55, 5  ;;  %v5020_v9 = vrot.slane %v5433_v10, 9 }
 0x135   : > { %v1592_v48 = vrot.slane %v5434_v47, 5 }
 0x136   : > { %v1312_v63 = vadd.f32 %v1283_v30, %v677_v57  ;;  %5041 = vmatmul.msk.bf16.gmra.mxu1 %vm455_vm1, %v6387_v41  ;;  %5080 = vmatmul.msk.bf16.gmra.mxu0 %vm455_vm1, %v5685_v38  ;;  %v1586_v26 = vsel %vm5846_vm7, %v5020_v9, %v1585_v21  ;;  %v1589_v30 = vsel %vm5846_vm7, %v1587_v18, %v1588_v3  ;;  %v5435_v21 = vld [vmem:[%s5595_s17 + $0x54] sm:$0xff]  ;;  %v6444_v10 = vpop.f32.mrf.mxu3 }
 0x137   : > { %v1779_v45 = vunpack.c.l.b16 %v1586_v26  ;;  %v1780_v35 = vunpack.c.l.b16 %v1589_v30  ;;  %v1307_v57 = vadd.f32 %v6260_v6, %v6315_v62  ;;  %v1594_v55 = vrot.slane %v1592_v48, 4 }
 0x138   : > { %v6410_v34 = vadd.f32 %v1427_v4, %v1312_v63  ;;  %v5437_v63 = vld [vmem:[%s5595_s17 + $0x3c] sm:$0xf] }
 0x139   : > { %v6421_v4 = vpack.c.b16 %v1780_v35, %v1779_v45  ;;  %v1451_v6 = vadd.f32 %v6267_v61, %v1307_v57 }
 0x13b   : > { %v6413_v51 = vpop.f32.mrf.mxu1  ;;  %v1716_v20 = vpop.f32.mrf.mxu0  ;;  %8287 = vst [vmem:[#allocation41_spill] sm:$0xff] %v6421_v4  ;;  %5059 = vmatmul.msk.bf16.gmra.mxu2 %vm455_vm1, %v6060_v49 }
 0x13c   : > { %v6419_v54 = vadd.f32 %v1716_v20, %v1449_v16  ;;  %v6438_v49 = vpop.f32.mrf.mxu2 }
 0x13e   : > { %v1437_v35 = vpop.f32.mrf.mxu3 }
 0x141   : > { %5074 = vmatmul.msk.bf16.gmra.mxu3 %vm455_vm1, %v5435_v21  ;;  %v1309_v21 = vadd.f32 %v6302_v60, %v6348_v19 }
 0x143   : > { %v681_v31 = vpop.f32.mrf.mxu1  ;;  %v1719_v27 = vpop.f32.mrf.mxu0 }
 0x144   : > { %v682_v58 = vadd.f32 %v681_v31, %v5995_v23  ;;  %v6428_v11 = vadd.f32 %v1719_v27, %v6300_v7  ;;  %v1595_v23 = vrot.slane %v5436_v59, 5  ;;  %v5021_v7 = vrot.slane %v5437_v63, 9  ;;  %v5438_v31 = vld [vmem:[%s5595_s17 + $0x4c] sm:$0xf] }
 0x145   : > { %v1599_v27 = vrot.slane %v5438_v31, 5  ;;  %v8292_v31 = vld [vmem:[#allocation34_spill] sm:$0xff] }
 0x146   : > { %v1314_v5 = vadd.f32 %v1288_v0, %v682_v58  ;;  %5042 = vmatmul.msk.bf16.gmra.mxu1 %vm455_vm1, %v6421_v4  ;;  %5081 = vmatmul.msk.bf16.gmra.mxu0 %vm455_vm1, %v5723_v28  ;;  %v1593_v18 = vsel %vm5846_vm7, %v5021_v7, %v1592_v48  ;;  %v1596_v16 = vsel %vm5846_vm7, %v1594_v55, %v1595_v23  ;;  %v1293_v0 = vpop.f32.mrf.mxu2  ;;  %v5439_v58 = vld [vmem:[%s5595_s17 + $0x60] sm:$0xff]  ;;  %v5441_v23 = vld [vmem:[%s5595_s17 + $0x48] sm:$0xf] }
 0x147   : > { %v1781_v26 = vunpack.c.l.b16 %v1593_v18  ;;  %v1782_v30 = vunpack.c.l.b16 %v1596_v16  ;;  %v1601_v63 = vrot.slane %v1599_v27, 4  ;;  %v1453_v7 = vadd.f32 %v6317_v52, %v1309_v21  ;;  %v8290_v18 = vld [vmem:[#allocation30_spill] sm:$0xff] }
 0x148   : > { %v6442_v3 = vadd.f32 %v1432_v50, %v1314_v5  ;;  %v5440_v5 = vld [vmem:[%s5595_s17 + $0x50] sm:$0x1] }
 0x149   : > { %v6455_v45 = vpack.c.b16 %v1782_v30, %v1781_v26  ;;  %v1602_v59 = vrot.slane %v5440_v5, 5  ;;  %v1439_v30 = vpop.f32.mrf.mxu3 }
 0x14b   : > { %v6447_v62 = vpop.f32.mrf.mxu1  ;;  %v1721_v9 = vpop.f32.mrf.mxu0  ;;  %8288 = vst [vmem:[#allocation42_spill] sm:$0xff] %v6455_v45  ;;  %5060 = vmatmul.msk.bf16.gmra.mxu2 %vm455_vm1, %v6099_v29  ;;  %v8289_v29 = vld [vmem:[#allocation7_spill] sm:$0xff] }
 0x14c   : > { %v6453_v20 = vadd.f32 %v1721_v9, %v1451_v6  ;;  %v1603_v9 = vsel %vm5846_vm7, %v1601_v63, %v1602_v59  ;;  %v1311_v63 = vadd.f32 %v6352_v33, %v6383_v43 }
 0x14e   : > { %v1295_v55 = vpop.f32.mrf.mxu2 }
 0x151   : > { %5075 = vmatmul.msk.bf16.gmra.mxu3 %vm455_vm1, %v5439_v58  ;;  %v5442_v58 = vld [vmem:[%s5595_s17 + $0x58] sm:$0xf] }
 0x152   : > { %v1606_v21 = vrot.slane %v5442_v58, 5 }
 0x153   : > { %v686_v61 = vpop.f32.mrf.mxu1  ;;  %v1724_v50 = vpop.f32.mrf.mxu0 }
 0x154   : > { %v687_v47 = vadd.f32 %v686_v61, %v6066_v56  ;;  %v6462_v48 = vadd.f32 %v1724_v50, %v6340_v8  ;;  %v5022_v56 = vrot.slane %v5441_v23, 9  ;;  %v1784_v61 = vunpack.c.l.b16 %v1603_v9  ;;  %v5443_v23 = vld [vmem:[%s5595_s17 + $0x6c] sm:$0xff] }
 0x156   : > { %v1316_v57 = vadd.f32 %v1293_v0, %v687_v47  ;;  %5043 = vmatmul.msk.bf16.gmra.mxu1 %vm455_vm1, %v6455_v45  ;;  %5082 = vmatmul.msk.bf16.gmra.mxu0 %vm455_vm1, %v8289_v29  ;;  %v1600_v19 = vsel %vm5846_vm7, %v5022_v56, %v1599_v27 }
 0x158   : > { %v6474_v8 = vadd.f32 %v1437_v35, %v1316_v57  ;;  %v1783_v35 = vunpack.c.l.b16 %v1600_v19  ;;  %v8293_v57 = vld [vmem:[#allocation32_spill] sm:$0xff]  ;;  %v1608_v19 = vrot.slane %v1606_v21, 4 }
 0x15a   : > { %v6486_v50 = vpack.c.b16 %v1784_v61, %v1783_v35 }
 0x15b   : > { %v688_v6 = vpop.f32.mrf.mxu1  ;;  %v1726_v60 = vpop.f32.mrf.mxu0  ;;  %5061 = vmatmul.msk.bf16.gmra.mxu2 %vm455_vm1, %v8292_v31 }
 0x15c   : > { %v689_v16 = vadd.f32 %v688_v6, %v8290_v18  ;;  %v6482_v26 = vadd.f32 %v1726_v60, %v1453_v7  ;;  %8291 = vst [vmem:[#allocation30_spill] sm:$0xff] %v6486_v50  ;;  %v8294_v7 = vld [vmem:[#allocation9_spill] sm:$0xff]  ;;  %v5445_v60 = vld [vmem:[%s5595_s17 + $0x54] sm:$0xf]  ;;  %v1455_v18 = vadd.f32 %v6354_v40, %v1311_v63  ;;  %v8297_v40 = vld [vmem:[#allocation19_spill] sm:$0xff] }
 0x15e   : > { %v1317_v0 = vadd.f32 %v1295_v55, %v689_v16  ;;  %v6497_v56 = vpop.f32.mrf.mxu2  ;;  %v5444_v55 = vld [vmem:[%s5595_s17 + $0x5c] sm:$0x1] }
 0x15f   : > { %v1609_v6 = vrot.slane %v5444_v55, 5 }
 0x160   : > { %v6484_v52 = vadd.f32 %v1439_v30, %v1317_v0  ;;  %v8295_v0 = vld [vmem:[#allocation33_spill] sm:$0xff] }
 0x161   : > { %5076 = vmatmul.msk.bf16.gmra.mxu3 %vm455_vm1, %v5443_v23  ;;  %v1610_v43 = vsel %vm5846_vm7, %v1608_v19, %v1609_v6  ;;  %v679_v23 = vadd.f32 %v6413_v51, %v8297_v40 }
 0x163   : > { %v1248_v27 = vpop.f32.mrf.mxu1  ;;  %v1729_v47 = vpop.f32.mrf.mxu0  ;;  %v1313_v51 = vadd.f32 %v6389_v42, %v679_v23 }
 0x164   : > { %v1298_v5 = vadd.f32 %v1248_v27, %v8293_v57  ;;  %v6493_v59 = vadd.f32 %v1729_v47, %v6375_v14  ;;  %v5023_v14 = vrot.slane %v5445_v60, 9  ;;  %v6507_v9 = vpop.f32.mrf.mxu3  ;;  %v1786_v47 = vunpack.c.l.b16 %v1610_v43  ;;  %v6522_v57 = vld [vmem:[%s5604_s21 + $0x78] sm:$0xff]  ;;  %v8299_v60 = vld [vmem:[#allocation17_spill] sm:$0xff] }
 0x165   : > { %8296 = vst [vmem:[#allocation34_spill] sm:$0xff] %v6522_v57  ;;  %v1457_v42 = vadd.f32 %v6398_v36, %v1313_v51 }
 0x166   : > { %5044 = vmatmul.msk.bf16.gmra.mxu1 %vm455_vm1, %v6486_v50  ;;  %5083 = vmatmul.msk.bf16.gmra.mxu0 %vm455_vm1, %v8294_v7  ;;  %v1607_v33 = vsel %vm5846_vm7, %v5023_v14, %v1606_v21  ;;  %v6517_v31 = vpop.f32.mrf.mxu2  ;;  %v5357_v21 = vld [vmem:[%s5595_s17 + $0x78] sm:$0xff]  ;;  %v1613_v14 = vrot.slane %v8299_v60, 5  ;;  %v6651_v7 = vld [vmem:[%s5604_s21 + $0x80] sm:$0x1] }
 0x167   : > { %v1785_v27 = vunpack.c.l.b16 %v1607_v33  ;;  %v8301_v33 = vld [vmem:[#allocation18_spill] sm:$0xff] }
 0x168   : > { %v1616_v43 = vrot.slane %v8301_v33, 5 }
 0x169   : > { %v6526_v63 = vpack.c.b16 %v1786_v47, %v1785_v27 }
 0x16b   : > { %v1250_v16 = vpop.f32.mrf.mxu1  ;;  %v1731_v30 = vpop.f32.mrf.mxu0  ;;  %8298 = vst [vmem:[#allocation32_spill] sm:$0xff] %v6526_v63  ;;  %5062 = vmatmul.msk.bf16.gmra.mxu2 %vm455_vm1, %v6522_v57  ;;  %v8313_v57 = vld [vmem:[#allocation27_spill] sm:$0xff] }
 0x16c   : > { %v1299_v35 = vadd.f32 %v1250_v16, %v8295_v0  ;;  %v6515_v61 = vadd.f32 %v1731_v30, %v1455_v18  ;;  %v6519_v58 = vpop.f32.mrf.mxu3  ;;  %v8300_v30 = vld [vmem:[#allocation11_spill] sm:$0xff]  ;;  %v8302_v0 = vld [vmem:[#allocation16_spill] sm:$0xff] }
 0x16d   : > { %v5024_v27 = vrot.slane %v8302_v0, 9  ;;  %v5113_v0 = vld [vmem:[%s8180_s3 + $0xa] sm:$0x3] }
 0x16e   : > { %v6536_v16 = vpop.f32.mrf.mxu2 }
 0x171   : > { %5077 = vmatmul.msk.bf16.gmra.mxu3 %vm455_vm1, %v5357_v21 }
 0x173   : > { %v1392_v55 = vpop.f32.mrf.mxu1  ;;  %v1734_v6 = vpop.f32.mrf.mxu0 }
 0x174   : > { %v1442_v19 = vadd.f32 %v1392_v55, %v1298_v5  ;;  %v6533_v18 = vadd.f32 %v1734_v6, %v6410_v34  ;;  %v1615_v5 = vrot.slane %v1613_v14, 4  ;;  %v6545_v47 = vpop.f32.mrf.mxu3  ;;  %v5102_v34 = vld [vmem:[%s8179_s2 + $0xa] sm:$0x3]  ;;  %v1614_v55 = vsel %vm5846_vm7, %v5024_v27, %v1613_v14  ;;  %v8303_v14 = vld [vmem:[#allocation26_spill] sm:$0xff] }
 0x175   : > { %v2350_v40 = vsel %vm486_vm0, %v5102_v34, 0  ;;  %v2440_v34 = vsel %vm486_vm0, %v5113_v0, 0  ;;  %v1787_v36 = vunpack.c.l.b16 %v1614_v55  ;;  %v684_v27 = vadd.f32 %v6447_v62, %v8303_v14 }
 0x176   : > { %5045 = vmatmul.msk.bf16.gmra.mxu1 %vm455_vm1, %v6526_v63  ;;  %5084 = vmatmul.msk.bf16.gmra.mxu0 %vm455_vm1, %v8300_v30  ;;  %v1617_v6 = vsel %vm5846_vm7, %v1615_v5, %v1616_v43  ;;  %v6562_v30 = vpop.f32.mrf.mxu2  ;;  %v8305_v5 = vld [vmem:[#allocation13_spill] sm:$0xff] }
 0x177   : > { %2359 = vmatpush.bf16.msra.mxu2 %v2350_v40  ;;  %v1788_v51 = vunpack.c.l.b16 %v1617_v6  ;;  %2449 = vmatpush.bf16.msra.mxu3 %v2440_v34  ;;  %v1315_v34 = vadd.f32 %v6438_v49, %v684_v27 }
 0x179   : > { %v6569_v43 = vpack.c.b16 %v1788_v51, %v1787_v36  ;;  %v8308_v51 = vld [vmem:[#allocation25_spill] sm:$0xff] }
 0x17a   : > { %v1623_v14 = vrot.slane %v8308_v51, 5 }
 0x17b   : > { %v1394_v23 = vpop.f32.mrf.mxu1  ;;  %v1736_v21 = vpop.f32.mrf.mxu0  ;;  %8304 = vst [vmem:[#allocation33_spill] sm:$0xff] %v6569_v43  ;;  %5103 = vmatmul.msk.bf16.vlgmr.msra.gmra.mxu2 %vm455_vm1, %v8305_v5 }
 0x17c   : > { %v1443_v60 = vadd.f32 %v1394_v23, %v1299_v35  ;;  %v6556_v33 = vadd.f32 %v1736_v21, %v1457_v42  ;;  %v6564_v40 = vpop.f32.mrf.mxu3  ;;  %v1749_v35 = vadd.f32 %v6286_v15, %v1442_v19  ;;  %v8306_v21 = vld [vmem:[#allocation24_spill] sm:$0xff]  ;;  %v5124_v15 = vld [vmem:[%s8179_s2 + $0xc] sm:$0x3] }
 0x17d   : > { %v1620_v0 = vrot.slane %v8306_v21, 5  ;;  %v2532_v62 = vsel %vm486_vm0, %v5124_v15, 0 }
 0x17e   : > { %v6583_v19 = vpop.f32.mrf.mxu2  ;;  %2541 = vmatpush.bf16.msrb.mxu0 %v2532_v62  ;;  %v1750_v21 = vadd.f32 %v6304_v17, %v1443_v60 }
 0x181   : > { %5114 = vmatmul.msk.bf16.vlgmr.msra.gmra.mxu3 %vm455_vm1, %v6321_v13  ;;  %v5139_v13 = vld [vmem:[%s8180_s3 + $0xc] sm:$0x3] }
 0x182   : > { %v2624_v49 = vsel %vm486_vm0, %v5139_v13, 0 }
 0x183   : > { %v1739_v42 = vpop.f32.mrf.mxu0  ;;  %v1843_v23 = vpop.f32.mrf.mxu1  ;;  %2633 = vmatpush.bf16.msra.mxu1 %v2624_v49 }
 0x184   : > { %v6575_v55 = vadd.f32 %v1739_v42, %v6442_v3  ;;  %v1893_v6 = vadd.f32 %v1843_v23, %v1749_v35  ;;  %v8307_v3 = vld [vmem:[#allocation14_spill] sm:$0xff]  ;;  %v8309_v35 = vld [vmem:[#allocation23_spill] sm:$0xff]  ;;  %v1622_v42 = vrot.slane %v1620_v0, 4  ;;  %v6597_v27 = vpop.f32.mrf.mxu3  ;;  %v1459_v23 = vadd.f32 %v6444_v10, %v1315_v34 }
 0x185   : > { %v5025_v5 = vrot.slane %v8309_v35, 9 }
 0x186   : > { %v1985_v36 = vadd.f32 %v6497_v56, %v1893_v6  ;;  %5046 = vmatmul.msk.bf16.gmra.mxu1 %vm455_vm1, %v6569_v43  ;;  %5085 = vmatmul.msk.bf16.gmra.mxu0 %vm455_vm1, %v8307_v3  ;;  %v1624_v35 = vsel %vm5846_vm7, %v1622_v42, %v1623_v14  ;;  %v6608_v3 = vpop.f32.mrf.mxu2 }
 0x187   : > { %v1621_v51 = vsel %vm5846_vm7, %v5025_v5, %v1620_v0  ;;  %v1790_v49 = vunpack.c.l.b16 %v1624_v35  ;;  %v8311_v0 = vld [vmem:[#allocation20_spill] sm:$0xff] }
 0x188   : > { %v2077_v56 = vadd.f32 %v6507_v9, %v1985_v36  ;;  %v1789_v36 = vunpack.c.l.b16 %v1621_v51 }
 0x18a   : > { %v6614_v60 = vpack.c.b16 %v1790_v49, %v1789_v36 }
 0x18b   : > { %v1741_v6 = vpop.f32.mrf.mxu0  ;;  %v1845_v15 = vpop.f32.mrf.mxu1  ;;  %5104 = vmatmul.msk.bf16.gmra.mxu2 %vm455_vm1, %v8311_v0 }
 0x18c   : > { %v6606_v62 = vadd.f32 %v1741_v6, %v1459_v23  ;;  %v1894_v13 = vadd.f32 %v1845_v15, %v1750_v21  ;;  %v6611_v10 = vpop.f32.mrf.mxu3  ;;  %8310 = vst [vmem:[#allocation19_spill] sm:$0xff] %v6614_v60  ;;  %v6635_v6 = vld [vmem:[%s5604_s21 + $0x78] sm:$0xf] }
 0x18d   : > { %v2098_v35 = vshrl.u32 %v6635_v6, 16 }
 0x18e   : > { %v1986_v9 = vadd.f32 %v6517_v31, %v1894_v13  ;;  %v6624_v42 = vpop.f32.mrf.mxu2 }
 0x190   : > { %v2078_v17 = vadd.f32 %v6519_v58, %v1986_v9  ;;  %v8312_v58 = vld [vmem:[#allocation21_spill] sm:$0xff] }
 0x191   : > { %5115 = vmatmul.msk.bf16.gmra.mxu3 %vm455_vm1, %v6356_v24 }
 0x193   : > { %v1744_v34 = vpop.f32.mrf.mxu0  ;;  %v1848_v14 = vpop.f32.mrf.mxu1 }
 0x194   : > { %v6619_v5 = vadd.f32 %v1744_v34, %v6474_v8  ;;  %v1895_v31 = vadd.f32 %v1848_v14, %v6328_v46  ;;  %v6631_v21 = vpop.f32.mrf.mxu3  ;;  %v6638_v46 = vld [vmem:[%s5604_s21 + $0x7c] sm:$0xf]  ;;  %v2100_v14 = vrot.slane %v2098_v35, 4 }
 0x195   : > { %v2107_v13 = vshll.u32 %v6638_v46, 16  ;;  %v2111_v9 = vshrl.u32 %v6638_v46, 16 }
 0x196   : > { %v1987_v23 = vadd.f32 %v6536_v16, %v1895_v31  ;;  %5047 = vmatmul.msk.bf16.gmra.mxu1 %vm455_vm1, %v6614_v60  ;;  %5086 = vmatmul.msk.bf16.gmra.mxu0 %vm455_vm1, %v8312_v58  ;;  %v2101_v16 = vshll.u32 %v6635_v6, 16  ;;  %v1952_v49 = vpop.f32.mrf.mxu2 }
 0x197   : > { %v2113_v24 = vrot.slane %v2111_v9, 4 }
 0x198   : > { %v2079_v8 = vadd.f32 %v6545_v47, %v1987_v23  ;;  %v2103_v31 = vrot.slane %v2101_v16, 5  ;;  %v2109_v23 = vrot.slane %v2107_v13, 5  ;;  %v8314_v16 = vld [vmem:[#allocation28_spill] sm:$0xff]  ;;  %v8315_v13 = vld [vmem:[#allocation3_spill] sm:$0xff] }
 0x19a   : > { %v2114_v28 = vor.u32 %v2113_v24, %v2109_v23 }
 0x19b   : > { %v1746_v15 = vpop.f32.mrf.mxu0  ;;  %v1850_v51 = vpop.f32.mrf.mxu1  ;;  %5105 = vmatmul.msk.bf16.gmra.mxu2 %vm455_vm1, %v8313_v57 }
 0x19c   : > { %v6645_v36 = vadd.f32 %v1746_v15, %v6484_v52  ;;  %v1896_v47 = vadd.f32 %v1850_v51, %v6350_v37  ;;  %v2044_v58 = vpop.f32.mrf.mxu3  ;;  %v2104_v15 = vor.u32 %v2103_v31, %v2100_v14  ;;  %v2117_v37 = vshll.u32 %v6651_v7, 16 }
 0x19d   : > { %v2115_v24 = vrot.slane %v2114_v28, 4 }
 0x19e   : > { %v1988_v34 = vadd.f32 %v6562_v30, %v1896_v47  ;;  %v1955_v35 = vpop.f32.mrf.mxu2  ;;  %v2105_v9 = vrot.slane %v2104_v15, 4  ;;  %v2119_v47 = vrot.slane %v2117_v37, 5 }
 0x1a0   : > { %v2080_v0 = vadd.f32 %v6564_v40, %v1988_v34  ;;  %v2110_v14 = vsel %vm5640_vm4, %v2105_v9, %v2109_v23 }
 0x1a1   : > { %5116 = vmatmul.msk.bf16.gmra.mxu3 %vm455_vm1, %v6387_v41  ;;  %v2147_v28 = vunpack.c.l.b16 %v2110_v14  ;;  %v8316_v41 = vld [vmem:[#allocation31_spill] sm:$0xff] }
 0x1a3   : > { %v1853_v29 = vpop.f32.mrf.mxu1  ;;  %v2165_v52 = vpop.f32.mrf.mxu0 }
 0x1a4   : > { %v1897_v30 = vadd.f32 %v1853_v29, %v6363_v2  ;;  %v6657_v51 = vadd.f32 %v2165_v52, %v2077_v56  ;;  %v2047_v34 = vpop.f32.mrf.mxu3 }
 0x1a6   : > { %v1989_v40 = vadd.f32 %v6583_v19, %v1897_v30  ;;  %5087 = vmatmul.msk.bf16.gmra.mxu0 %vm455_vm1, %v8314_v16  ;;  %5090 = vmatmul.msk.bf16.vlgmr.msrb.gmra.mxu1 %vm455_vm1, %v8315_v13  ;;  %v2120_v19 = vsel %vm5640_vm4, %v2115_v24, %v2119_v47  ;;  %v1957_v30 = vpop.f32.mrf.mxu2 }
 0x1a7   : > { %v2148_v37 = vunpack.c.l.b16 %v2120_v19 }
 0x1a8   : > { %v2081_v2 = vadd.f32 %v6597_v27, %v1989_v40 }
 0x1a9   : > { %v6676_v40 = vpack.c.b16 %v2148_v37, %v2147_v28  ;;  %v8318_v28 = vld [vmem:[#allocation35_spill] sm:$0xff] }
 0x1ab   : > { %v1855_v29 = vpop.f32.mrf.mxu1  ;;  %v2167_v56 = vpop.f32.mrf.mxu0  ;;  %5106 = vmatmul.msk.bf16.gmra.mxu2 %vm455_vm1, %v8316_v41 }
 0x1ac   : > { %v1898_v31 = vadd.f32 %v1855_v29, %v6385_v53  ;;  %v6672_v52 = vadd.f32 %v2167_v56, %v2078_v17  ;;  %v2049_v13 = vpop.f32.mrf.mxu3 }
 0x1ae   : > { %v1990_v15 = vadd.f32 %v6608_v3, %v1898_v31  ;;  %v1960_v3 = vpop.f32.mrf.mxu2 }
 0x1b0   : > { %v2082_v27 = vadd.f32 %v6611_v10, %v1990_v15  ;;  %v8317_v10 = vld [vmem:[#allocation4_spill] sm:$0xff] }
 0x1b1   : > { %5117 = vmatmul.msk.bf16.gmra.mxu3 %vm455_vm1, %v6421_v4 }
 0x1b3   : > { %v1858_v23 = vpop.f32.mrf.mxu1  ;;  %v2170_v9 = vpop.f32.mrf.mxu0 }
 0x1b4   : > { %v1899_v24 = vadd.f32 %v1858_v23, %v6396_v22  ;;  %v6681_v53 = vadd.f32 %v2170_v9, %v2079_v8  ;;  %v2052_v47 = vpop.f32.mrf.mxu3 }
 0x1b6   : > { %v1991_v17 = vadd.f32 %v6624_v42, %v1899_v24  ;;  %5088 = vmatmul.msk.bf16.gmra.mxu0 %vm455_vm1, %v6676_v40  ;;  %5091 = vmatmul.msk.bf16.gmra.mxu1 %vm455_vm1, %v8317_v10  ;;  %v1962_v19 = vpop.f32.mrf.mxu2 }
 0x1b8   : > { %v2083_v29 = vadd.f32 %v6631_v21, %v1991_v17 }
 0x1bb   : > { %v1860_v56 = vpop.f32.mrf.mxu1  ;;  %v2172_v14 = vpop.f32.mrf.mxu0  ;;  %5107 = vmatmul.msk.bf16.gmra.mxu2 %vm455_vm1, %v8318_v28 }
 0x1bc   : > { %v1900_v22 = vadd.f32 %v1860_v56, %v6419_v54  ;;  %v6692_v8 = vadd.f32 %v2172_v14, %v2080_v0  ;;  %v2054_v15 = vpop.f32.mrf.mxu3  ;;  %v8319_v0 = vld [vmem:[#allocation6_spill] sm:$0xff] }
 0x1be   : > { %v1992_v31 = vadd.f32 %v1952_v49, %v1900_v22  ;;  %v1965_v21 = vpop.f32.mrf.mxu2  ;;  %v5446_v49 = vld [vmem:[%s5604_s21 + $0x18] sm:$0xff] }
 0x1c0   : > { %v2084_v42 = vadd.f32 %v2044_v58, %v1992_v31 }
 0x1c1   : > { %5118 = vmatmul.msk.bf16.gmra.mxu3 %vm455_vm1, %v6455_v45 }
 0x1c3   : > { %v1863_v37 = vpop.f32.mrf.mxu1  ;;  %v2175_v23 = vpop.f32.mrf.mxu0 }
 0x1c4   : > { %v1901_v9 = vadd.f32 %v1863_v37, %v6428_v11  ;;  %v6697_v24 = vadd.f32 %v2175_v23, %v2081_v2  ;;  %v2057_v58 = vpop.f32.mrf.mxu3 }
 0x1c6   : > { %v1993_v54 = vadd.f32 %v1955_v35, %v1901_v9  ;;  %5092 = vmatmul.msk.bf16.gmra.mxu1 %vm455_vm1, %v8319_v0  ;;  %5129 = vmatmul.msk.bf16.vlgmr.msrb.gmra.mxu0 %vm455_vm1, %v5446_v49  ;;  %v1967_v22 = vpop.f32.mrf.mxu2 }
 0x1c8   : > { %v2085_v17 = vadd.f32 %v2047_v34, %v1993_v54 }
 0x1cb   : > { %v1865_v56 = vpop.f32.mrf.mxu1  ;;  %v2177_v14 = vpop.f32.mrf.mxu0  ;;  %5108 = vmatmul.msk.bf16.gmra.mxu2 %vm455_vm1, %v6194_v39 }
 0x1cc   : > { %v1902_v11 = vadd.f32 %v1865_v56, %v6453_v20  ;;  %v6706_v2 = vadd.f32 %v2177_v14, %v2082_v27  ;;  %v2059_v37 = vpop.f32.mrf.mxu3  ;;  %v8320_v27 = vld [vmem:[#allocation8_spill] sm:$0xff] }
 0x1ce   : > { %v1994_v31 = vadd.f32 %v1957_v30, %v1902_v11  ;;  %v1970_v34 = vpop.f32.mrf.mxu2  ;;  %v5447_v30 = vld [vmem:[%s5604_s21 + $0x24] sm:$0xff] }
 0x1d0   : > { %v2086_v23 = vadd.f32 %v2049_v13, %v1994_v31 }
 0x1d1   : > { %5119 = vmatmul.msk.bf16.gmra.mxu3 %vm455_vm1, %v6486_v50 }
 0x1d3   : > { %v1868_v35 = vpop.f32.mrf.mxu1  ;;  %v2180_v9 = vpop.f32.mrf.mxu0 }
 0x1d4   : > { %v1903_v49 = vadd.f32 %v1868_v35, %v6462_v48  ;;  %v6711_v45 = vadd.f32 %v2180_v9, %v2083_v29  ;;  %v2062_v13 = vpop.f32.mrf.mxu3 }
 0x1d6   : > { %v1995_v20 = vadd.f32 %v1960_v3, %v1903_v49  ;;  %5093 = vmatmul.msk.bf16.gmra.mxu1 %vm455_vm1, %v8320_v27  ;;  %5130 = vmatmul.msk.bf16.gmra.mxu0 %vm455_vm1, %v5447_v30  ;;  %v1972_v11 = vpop.f32.mrf.mxu2 }
 0x1d8   : > { %v2087_v54 = vadd.f32 %v2052_v47, %v1995_v20 }
 0x1db   : > { %v1870_v56 = vpop.f32.mrf.mxu1  ;;  %v2182_v14 = vpop.f32.mrf.mxu0  ;;  %5109 = vmatmul.msk.bf16.gmra.mxu2 %vm455_vm1, %v6242_v1 }
 0x1dc   : > { %v1904_v48 = vadd.f32 %v1870_v56, %v6482_v26  ;;  %v6720_v29 = vadd.f32 %v2182_v14, %v2084_v42  ;;  %v2064_v35 = vpop.f32.mrf.mxu3  ;;  %v8321_v42 = vld [vmem:[#allocation10_spill] sm:$0xff] }
 0x1de   : > { %v1996_v31 = vadd.f32 %v1962_v19, %v1904_v48  ;;  %v1975_v47 = vpop.f32.mrf.mxu2  ;;  %v5448_v19 = vld [vmem:[%s5604_s21 + $0x30] sm:$0xff] }
 0x1e0   : > { %v2088_v9 = vadd.f32 %v2054_v15, %v1996_v31 }
 0x1e1   : > { %5120 = vmatmul.msk.bf16.gmra.mxu3 %vm455_vm1, %v6526_v63 }
 0x1e3   : > { %v1873_v3 = vpop.f32.mrf.mxu1  ;;  %v2185_v49 = vpop.f32.mrf.mxu0 }
 0x1e4   : > { %v1905_v30 = vadd.f32 %v1873_v3, %v6493_v59  ;;  %v6725_v50 = vadd.f32 %v2185_v49, %v2085_v17  ;;  %v2067_v15 = vpop.f32.mrf.mxu3 }
 0x1e6   : > { %v1997_v26 = vadd.f32 %v1965_v21, %v1905_v30  ;;  %5094 = vmatmul.msk.bf16.gmra.mxu1 %vm455_vm1, %v8321_v42  ;;  %5131 = vmatmul.msk.bf16.gmra.mxu0 %vm455_vm1, %v5448_v19  ;;  %v1977_v48 = vpop.f32.mrf.mxu2 }
 0x1e8   : > { %v2089_v20 = vadd.f32 %v2057_v58, %v1997_v26 }
 0x1eb   : > { %v1875_v56 = vpop.f32.mrf.mxu1  ;;  %v2187_v14 = vpop.f32.mrf.mxu0  ;;  %5110 = vmatmul.msk.bf16.gmra.mxu2 %vm455_vm1, %v6282_v25 }
 0x1ec   : > { %v1906_v59 = vadd.f32 %v1875_v56, %v6515_v61  ;;  %v6734_v17 = vadd.f32 %v2187_v14, %v2086_v23  ;;  %v2069_v3 = vpop.f32.mrf.mxu3  ;;  %v8322_v23 = vld [vmem:[#allocation12_spill] sm:$0xff] }
 0x1ee   : > { %v1998_v31 = vadd.f32 %v1967_v22, %v1906_v59  ;;  %v6743_v58 = vpop.f32.mrf.mxu2  ;;  %v5449_v22 = vld [vmem:[%s5604_s21 + $0x3c] sm:$0xff] }
 0x1f0   : > { %v2090_v49 = vadd.f32 %v2059_v37, %v1998_v31 }
 0x1f1   : > { %5121 = vmatmul.msk.bf16.gmra.mxu3 %vm455_vm1, %v6569_v43  ;;  %v6786_v43 = vld [vmem:[%s5595_s17 + $0x80] sm:$0x1] }
 0x1f3   : > { %v1878_v21 = vpop.f32.mrf.mxu1  ;;  %v2190_v30 = vpop.f32.mrf.mxu0 }
 0x1f4   : > { %v1907_v19 = vadd.f32 %v1878_v21, %v6533_v18  ;;  %v6739_v63 = vadd.f32 %v2190_v30, %v2087_v54  ;;  %v6749_v37 = vpop.f32.mrf.mxu3 }
 0x1f6   : > { %v1999_v61 = vadd.f32 %v1970_v34, %v1907_v19  ;;  %5095 = vmatmul.msk.bf16.gmra.mxu1 %vm455_vm1, %v8322_v23  ;;  %5132 = vmatmul.msk.bf16.gmra.mxu0 %vm455_vm1, %v5449_v22  ;;  %v6754_v59 = vpop.f32.mrf.mxu2 }
 0x1f8   : > { %v2091_v26 = vadd.f32 %v2062_v13, %v1999_v61 }
 0x1fb   : > { %v1880_v56 = vpop.f32.mrf.mxu1  ;;  %v2192_v14 = vpop.f32.mrf.mxu0  ;;  %5111 = vmatmul.msk.bf16.gmra.mxu2 %vm455_vm1, %v6319_v44 }
 0x1fc   : > { %v1908_v18 = vadd.f32 %v1880_v56, %v6556_v33  ;;  %v6752_v54 = vadd.f32 %v2192_v14, %v2088_v9  ;;  %v6756_v34 = vpop.f32.mrf.mxu3  ;;  %v8323_v9 = vld [vmem:[#allocation15_spill] sm:$0xff] }
 0x1fe   : > { %v2000_v31 = vadd.f32 %v1972_v11, %v1908_v18  ;;  %v6767_v33 = vpop.f32.mrf.mxu2 }
 0x200   : > { %v6758_v21 = vadd.f32 %v2064_v35, %v2000_v31  ;;  %v5450_v35 = vld [vmem:[%s5604_s21 + $0x48] sm:$0xff]  ;;  %v5100_v31 = vrot.slane %v6635_v6, 9 }
 0x201   : > { %5122 = vmatmul.msk.bf16.gmra.mxu3 %vm455_vm1, %v6614_v60 }
 0x203   : > { %v1883_v30 = vpop.f32.mrf.mxu1  ;;  %v2195_v13 = vpop.f32.mrf.mxu0 }
 0x204   : > { %v1909_v19 = vadd.f32 %v1883_v30, %v6575_v55  ;;  %v6763_v61 = vadd.f32 %v2195_v13, %v2089_v20  ;;  %v6773_v22 = vpop.f32.mrf.mxu3  ;;  %v2328_v55 = vrot.slane %v6638_v46, 5  ;;  %v398_v20 = vld [vmem:[%s5595_s17 + $0x7c] sm:$0xf]  ;;  %v2331_v30 = vrot.slane %v6651_v7, 5 }
 0x205   : > { %v2336_v13 = vrot.slane %v398_v20, 5 }
 0x206   : > { %v2001_v11 = vadd.f32 %v1975_v47, %v1909_v19  ;;  %5096 = vmatmul.msk.bf16.gmra.mxu1 %vm455_vm1, %v8323_v9  ;;  %5133 = vmatmul.msk.bf16.gmra.mxu0 %vm455_vm1, %v5450_v35  ;;  %v2330_v47 = vrot.slane %v2328_v55, 4  ;;  %v397_v35 = vld [vmem:[%s5595_s17 + $0x78] sm:$0xf]  ;;  %v2329_v46 = vsel %vm5846_vm7, %v5100_v31, %v2328_v55 }
 0x207   : > { %v5101_v6 = vrot.slane %v397_v35, 9  ;;  %v2338_v4 = vrot.slane %v2336_v13, 4  ;;  %v2343_v7 = vunpack.c.l.b16 %v2329_v46 }
 0x208   : > { %v6775_v56 = vadd.f32 %v2067_v15, %v2001_v11  ;;  %v6788_v15 = vpop.f32.mrf.mxu2  ;;  %v2332_v11 = vsel %vm5846_vm7, %v2330_v47, %v2331_v30 }
 0x209   : > { %v2344_v25 = vunpack.c.l.b16 %v2332_v11 }
 0x20b   : > { %v1885_v14 = vpop.f32.mrf.mxu1  ;;  %v2197_v18 = vpop.f32.mrf.mxu0  ;;  %v6801_v1 = vpack.c.b16 %v2344_v25, %v2343_v7 }
 0x20c   : > { %v1910_v19 = vadd.f32 %v1885_v14, %v6606_v62  ;;  %v6782_v60 = vadd.f32 %v2197_v18, %v2090_v49  ;;  %v2339_v62 = vrot.slane %v6786_v43, 5  ;;  %v6795_v49 = vpop.f32.mrf.mxu3  ;;  %v2337_v14 = vsel %vm5846_vm7, %v5101_v6, %v2336_v13 }
 0x20d   : > { %v2433_v31 = vunpack.c.l.b16 %v2337_v14  ;;  %5112 = vmatmul.msk.bf16.gmra.mxu2 %vm455_vm1, %v6801_v1  ;;  %v2125_v14 = vshll.u32 %v397_v35, 16 }
 0x20e   : > { %v2002_v44 = vadd.f32 %v1977_v48, %v1910_v19  ;;  %v2340_v55 = vsel %vm5846_vm7, %v2338_v4, %v2339_v62  ;;  %v8325_v4 = vld [vmem:[#allocation22_spill] sm:$0xff]  ;;  %v2122_v62 = vshrl.u32 %v397_v35, 16 }
 0x20f   : > { %v2434_v47 = vunpack.c.l.b16 %v2340_v55  ;;  %v2131_v55 = vshll.u32 %v398_v20, 16  ;;  %v2127_v35 = vrot.slane %v2125_v14, 5  ;;  %v5178_v14 = vld [vmem:[%s8179_s2 + $0x10] sm:$0x3] }
 0x210   : > { %v6799_v18 = vadd.f32 %v2069_v3, %v2002_v44  ;;  %v6814_v25 = vpop.f32.mrf.mxu2  ;;  %v5451_v3 = vld [vmem:[%s5604_s21 + $0x54] sm:$0xff] }
 0x211   : > { %v6807_v19 = vpack.c.b16 %v2434_v47, %v2433_v31  ;;  %v2135_v31 = vshrl.u32 %v398_v20, 16 }
 0x213   : > { %v1888_v48 = vpop.f32.mrf.mxu1  ;;  %v2200_v30 = vpop.f32.mrf.mxu0  ;;  %8324 = vst [vmem:[#allocation17_spill] sm:$0xff] %v6807_v19  ;;  %5123 = vmatmul.msk.bf16.gmra.mxu3 %vm455_vm1, %v6807_v19  ;;  %v2137_v20 = vrot.slane %v2135_v31, 4  ;;  %v2141_v19 = vshll.u32 %v6786_v43, 16  ;;  %v5452_v43 = vld [vmem:[%s5604_s21 + $0x60] sm:$0xff] }
 0x214   : > { %v1911_v46 = vadd.f32 %v1888_v48, %v6619_v5  ;;  %v6810_v13 = vadd.f32 %v2200_v30, %v2091_v26  ;;  %v6821_v11 = vpop.f32.mrf.mxu3  ;;  %v5154_v5 = vld [vmem:[%s8179_s2 + $0xe] sm:$0x3] }
 0x215   : > { %v2762_v26 = vsel %vm486_vm0, %v5154_v5, 0  ;;  %v2133_v5 = vrot.slane %v2131_v55, 5  ;;  %v8326_v55 = vld [vmem:[#allocation29_spill] sm:$0xff] }
 0x216   : > { %v2003_v44 = vadd.f32 %v6743_v58, %v1911_v46  ;;  %5097 = vmatmul.msk.bf16.gmra.mxu1 %vm455_vm1, %v8325_v4  ;;  %5134 = vmatmul.msk.bf16.gmra.mxu0 %vm455_vm1, %v5451_v3  ;;  %v2124_v3 = vrot.slane %v2122_v62, 4 }
 0x217   : > { %2771 = vmatpush.bf16.msrb.mxu2 %v2762_v26 }
 0x218   : > { %v6824_v6 = vadd.f32 %v6749_v37, %v2003_v44  ;;  %v5165_v37 = vld [vmem:[%s8180_s3 + $0xe] sm:$0x3]  ;;  %v6838_v46 = vpop.f32.mrf.mxu2 }
 0x219   : > { %v2852_v30 = vsel %vm486_vm0, %v5165_v37, 0  ;;  %v2138_v37 = vor.u32 %v2137_v20, %v2133_v5 }
 0x21a   : > { %2861 = vmatpush.bf16.msrb.mxu3 %v2852_v30  ;;  %v2143_v30 = vrot.slane %v2141_v19, 5 }
 0x21b   : > { %v1890_v7 = vpop.f32.mrf.mxu1  ;;  %v2202_v58 = vpop.f32.mrf.mxu0 }
 0x21c   : > { %v1912_v47 = vadd.f32 %v1890_v7, %v6645_v36  ;;  %v6832_v48 = vadd.f32 %v2202_v58, %v6758_v21  ;;  %v2458_v36 = vpop.f32.mrf.mxu3  ;;  %v2128_v58 = vor.u32 %v2127_v35, %v2124_v3 }
 0x21d   : > { %5155 = vmatmul.msk.bf16.vlgmr.msrb.gmra.mxu2 %vm455_vm1, %v5685_v38  ;;  %v2958_v38 = vsel %vm486_vm0, %v5178_v14, 0 }
 0x21e   : > { %v2004_v44 = vadd.f32 %v6754_v59, %v1912_v47  ;;  %v2129_v31 = vrot.slane %v2128_v58, 4  ;;  %v2139_v47 = vrot.slane %v2138_v37, 4  ;;  %2967 = vmatpush.bf16.msra.mxu0 %v2958_v38 }
 0x220   : > { %v2096_v21 = vadd.f32 %v6756_v34, %v2004_v44  ;;  %v2134_v20 = vsel %vm5640_vm4, %v2129_v31, %v2133_v5  ;;  %v8327_v5 = vld [vmem:[#allocation5_spill] sm:$0xff] }
 0x221   : > { %v2237_v37 = vunpack.c.l.b16 %v2134_v20 }
 0x223   : > { %v2205_v26 = vpop.f32.mrf.mxu0  ;;  %v2255_v7 = vpop.f32.mrf.mxu1  ;;  %5166 = vmatmul.msk.bf16.vlgmr.msrb.gmra.mxu3 %vm455_vm1, %v8317_v10 }
 0x224   : > { %v6846_v59 = vadd.f32 %v2205_v26, %v6775_v56  ;;  %v2305_v62 = vadd.f32 %v2255_v7, %v6657_v51  ;;  %v2371_v56 = vpop.f32.mrf.mxu2  ;;  %v5189_v51 = vld [vmem:[%s8180_s3 + $0x10] sm:$0x3]  ;;  %v2144_v26 = vsel %vm5640_vm4, %v2139_v47, %v2143_v30 }
 0x225   : > { %v3048_v10 = vsel %vm486_vm0, %v5189_v51, 0 }
 0x226   : > { %v2411_v34 = vadd.f32 %v6767_v33, %v2305_v62  ;;  %5098 = vmatmul.msk.bf16.gmra.mxu1 %vm455_vm1, %v8326_v55  ;;  %5135 = vmatmul.msk.bf16.gmra.mxu0 %vm455_vm1, %v5452_v43  ;;  %v2461_v33 = vpop.f32.mrf.mxu3 }
 0x227   : > { %3057 = vmatpush.bf16.msrb.mxu1 %v3048_v10 }
 0x228   : > { %v2501_v44 = vadd.f32 %v6773_v22, %v2411_v34  ;;  %v2238_v22 = vunpack.c.l.b16 %v2144_v26 }
 0x22a   : > { %v6875_v38 = vpack.c.b16 %v2238_v22, %v2237_v37 }
 0x22b   : > { %v2207_v3 = vpop.f32.mrf.mxu0  ;;  %v2257_v35 = vpop.f32.mrf.mxu1 }
 0x22c   : > { %v6870_v7 = vadd.f32 %v2207_v3, %v6799_v18  ;;  %v2306_v19 = vadd.f32 %v2257_v35, %v6672_v52  ;;  %v2373_v14 = vpop.f32.mrf.mxu2  ;;  %v8328_v35 = vld [vmem:[#allocation7_spill] sm:$0xff] }
 0x22d   : > { %5156 = vmatmul.msk.bf16.gmra.mxu2 %vm455_vm1, %v8327_v5 }
 0x22e   : > { %v2412_v58 = vadd.f32 %v6788_v15, %v2306_v19  ;;  %v2463_v34 = vpop.f32.mrf.mxu3 }
 0x230   : > { %v2502_v62 = vadd.f32 %v6795_v49, %v2412_v58  ;;  %v5453_v49 = vld [vmem:[%s5604_s21 + $0x6c] sm:$0xff] }
 0x233   : > { %v2210_v43 = vpop.f32.mrf.mxu0  ;;  %v2260_v51 = vpop.f32.mrf.mxu1  ;;  %5167 = vmatmul.msk.bf16.gmra.mxu3 %vm455_vm1, %v8319_v0 }
 0x234   : > { %v6880_v18 = vadd.f32 %v2210_v43, %v6824_v6  ;;  %v2307_v52 = vadd.f32 %v2260_v51, %v6681_v53  ;;  %v2376_v47 = vpop.f32.mrf.mxu2 }
 0x236   : > { %v2413_v15 = vadd.f32 %v6814_v25, %v2307_v52  ;;  %5099 = vmatmul.msk.bf16.gmra.mxu1 %vm455_vm1, %v6875_v38  ;;  %5136 = vmatmul.msk.bf16.gmra.mxu0 %vm455_vm1, %v5453_v49  ;;  %v2466_v3 = vpop.f32.mrf.mxu3 }
 0x238   : > { %v2503_v31 = vadd.f32 %v6821_v11, %v2413_v15  ;;  %v8330_v15 = vld [vmem:[#allocation9_spill] sm:$0xff] }
 0x23b   : > { %v2212_v30 = vpop.f32.mrf.mxu0  ;;  %v2262_v6 = vpop.f32.mrf.mxu1 }
 0x23c   : > { %v6891_v10 = vadd.f32 %v2212_v30, %v2096_v21  ;;  %v2308_v53 = vadd.f32 %v2262_v6, %v6692_v8  ;;  %v2378_v58 = vpop.f32.mrf.mxu2  ;;  %v8329_v8 = vld [vmem:[#allocation34_spill] sm:$0xff] }
 0x23d   : > { %5157 = vmatmul.msk.bf16.gmra.mxu2 %vm455_vm1, %v8328_v35 }
 0x23e   : > { %v2414_v0 = vadd.f32 %v6838_v46, %v2308_v53  ;;  %v5454_v46 = vld [vmem:[%s5595_s17 + $0x18] sm:$0xff] }
 0x240   : > { %v2504_v25 = vadd.f32 %v2458_v36, %v2414_v0  ;;  %v2468_v36 = vpop.f32.mrf.mxu3 }
 0x243   : > { %v2265_v20 = vpop.f32.mrf.mxu1  ;;  %v2543_v26 = vpop.f32.mrf.mxu0  ;;  %5168 = vmatmul.msk.bf16.gmra.mxu3 %vm455_vm1, %v8320_v27 }
 0x244   : > { %v2309_v19 = vadd.f32 %v2265_v20, %v6697_v24  ;;  %v6898_v11 = vadd.f32 %v2543_v26, %v2501_v44  ;;  %v2381_v51 = vpop.f32.mrf.mxu2 }
 0x246   : > { %v2415_v21 = vadd.f32 %v2371_v56, %v2309_v19  ;;  %5137 = vmatmul.msk.bf16.gmra.mxu0 %vm455_vm1, %v8329_v8  ;;  %5144 = vmatmul.msk.bf16.vlgmr.msra.gmra.mxu1 %vm455_vm1, %v5454_v46  ;;  %v5345_v56 = vld [vmem:[%s5604_s21 + $0x84] sm:$0xff] }
 0x248   : > { %v2505_v37 = vadd.f32 %v2461_v33, %v2415_v21  ;;  %v2471_v27 = vpop.f32.mrf.mxu3 }
 0x24b   : > { %v2267_v22 = vpop.f32.mrf.mxu1  ;;  %v2545_v5 = vpop.f32.mrf.mxu0 }
 0x24c   : > { %v2310_v24 = vadd.f32 %v2267_v22, %v6706_v2  ;;  %v6907_v44 = vadd.f32 %v2545_v5, %v2502_v62  ;;  %v5455_v62 = vld [vmem:[%s5595_s17 + $0x24] sm:$0xff] }
 0x24d   : > { %5158 = vmatmul.msk.bf16.gmra.mxu2 %vm455_vm1, %v8330_v15 }
 0x24e   : > { %v2416_v43 = vadd.f32 %v2373_v14, %v2310_v24 }
 0x250   : > { %v2506_v52 = vadd.f32 %v2463_v34, %v2416_v43  ;;  %v2383_v34 = vpop.f32.mrf.mxu2  ;;  %v2473_v53 = vpop.f32.mrf.mxu3 }
 0x253   : > { %v2270_v49 = vpop.f32.mrf.mxu1  ;;  %v2548_v30 = vpop.f32.mrf.mxu0  ;;  %5169 = vmatmul.msk.bf16.gmra.mxu3 %vm455_vm1, %v8321_v42  ;;  %v8331_v42 = vld [vmem:[#allocation11_spill] sm:$0xff] }
 0x254   : > { %v2311_v6 = vadd.f32 %v2270_v49, %v6711_v45  ;;  %v6913_v33 = vadd.f32 %v2548_v30, %v2503_v31 }
 0x256   : > { %v2417_v2 = vadd.f32 %v2376_v47, %v2311_v6  ;;  %5138 = vmatmul.msk.bf16.gmra.mxu0 %vm455_vm1, %v5345_v56  ;;  %5145 = vmatmul.msk.bf16.gmra.mxu1 %vm455_vm1, %v5455_v62 }
 0x258   : > { %v2507_v14 = vadd.f32 %v2466_v3, %v2417_v2  ;;  %v2386_v19 = vpop.f32.mrf.mxu2  ;;  %v2476_v46 = vpop.f32.mrf.mxu3 }
 0x25b   : > { %v2272_v0 = vpop.f32.mrf.mxu1  ;;  %v2550_v35 = vpop.f32.mrf.mxu0 }
 0x25c   : > { %v2312_v20 = vadd.f32 %v2272_v0, %v6720_v29  ;;  %v6921_v45 = vadd.f32 %v2550_v35, %v2504_v25  ;;  %v5456_v29 = vld [vmem:[%s5595_s17 + $0x30] sm:$0xff]  ;;  %v8332_v25 = vld [vmem:[#allocation20_spill] sm:$0xff] }
 0x25d   : > { %5159 = vmatmul.msk.bf16.gmra.mxu2 %vm455_vm1, %v8331_v42 }
 0x25e   : > { %v2418_v31 = vadd.f32 %v2378_v58, %v2312_v20 }
 0x260   : > { %v2508_v26 = vadd.f32 %v2468_v36, %v2418_v31  ;;  %v2478_v56 = vpop.f32.mrf.mxu3  ;;  %v8334_v31 = vld [vmem:[#allocation21_spill] sm:$0xff] }
 0x263   : > { %v2275_v47 = vpop.f32.mrf.mxu1  ;;  %v2553_v21 = vpop.f32.mrf.mxu0  ;;  %5170 = vmatmul.msk.bf16.gmra.mxu3 %vm455_vm1, %v8322_v23  ;;  %v8333_v23 = vld [vmem:[#allocation14_spill] sm:$0xff] }
 0x264   : > { %v2313_v8 = vadd.f32 %v2275_v47, %v6725_v50  ;;  %v6926_v3 = vadd.f32 %v2553_v21, %v2505_v37  ;;  %v2388_v37 = vpop.f32.mrf.mxu2 }
 0x266   : > { %v2419_v22 = vadd.f32 %v2381_v51, %v2313_v8  ;;  %5146 = vmatmul.msk.bf16.gmra.mxu1 %vm455_vm1, %v5456_v29  ;;  %5179 = vmatmul.msk.bf16.vlgmr.msra.gmra.mxu0 %vm455_vm1, %v8332_v25 }
 0x268   : > { %v2509_v58 = vadd.f32 %v2471_v27, %v2419_v22  ;;  %v2481_v62 = vpop.f32.mrf.mxu3 }
 0x26b   : > { %v2277_v36 = vpop.f32.mrf.mxu1  ;;  %v2555_v5 = vpop.f32.mrf.mxu0 }
 0x26c   : > { %v2314_v24 = vadd.f32 %v2277_v36, %v6734_v17  ;;  %v6935_v50 = vadd.f32 %v2555_v5, %v2506_v52  ;;  %v5457_v17 = vld [vmem:[%s5595_s17 + $0x3c] sm:$0xff]  ;;  %v2391_v52 = vpop.f32.mrf.mxu2 }
 0x26d   : > { %5160 = vmatmul.msk.bf16.gmra.mxu2 %vm455_vm1, %v8333_v23 }
 0x26e   : > { %v2420_v43 = vadd.f32 %v2383_v34, %v2314_v24 }
 0x270   : > { %v2510_v15 = vadd.f32 %v2473_v53, %v2420_v43  ;;  %v2483_v20 = vpop.f32.mrf.mxu3  ;;  %v5459_v43 = vld [vmem:[%s5595_s17 + $0x54] sm:$0xff] }
 0x273   : > { %v2280_v51 = vpop.f32.mrf.mxu1  ;;  %v2558_v49 = vpop.f32.mrf.mxu0  ;;  %5171 = vmatmul.msk.bf16.gmra.mxu3 %vm455_vm1, %v8323_v9 }
 0x274   : > { %v2315_v30 = vadd.f32 %v2280_v51, %v6739_v63  ;;  %v6940_v6 = vadd.f32 %v2558_v49, %v2507_v14  ;;  %v2393_v9 = vpop.f32.mrf.mxu2 }
 0x276   : > { %v2421_v27 = vadd.f32 %v2386_v19, %v2315_v30  ;;  %5147 = vmatmul.msk.bf16.gmra.mxu1 %vm455_vm1, %v5457_v17  ;;  %5180 = vmatmul.msk.bf16.gmra.mxu0 %vm455_vm1, %v8313_v57 }
 0x278   : > { %v2511_v2 = vadd.f32 %v2476_v46, %v2421_v27  ;;  %v2486_v25 = vpop.f32.mrf.mxu3 }
 0x27b   : > { %v2282_v34 = vpop.f32.mrf.mxu1  ;;  %v2560_v53 = vpop.f32.mrf.mxu0 }
 0x27c   : > { %v2316_v63 = vadd.f32 %v2282_v34, %v6752_v54  ;;  %v6949_v14 = vadd.f32 %v2560_v53, %v2508_v26  ;;  %v5458_v54 = vld [vmem:[%s5595_s17 + $0x48] sm:$0xff]  ;;  %v2396_v8 = vpop.f32.mrf.mxu2 }
 0x27d   : > { %5161 = vmatmul.msk.bf16.gmra.mxu2 %vm455_vm1, %v8334_v31 }
 0x27e   : > { %v2422_v0 = vadd.f32 %v2388_v37, %v2316_v63 }
 0x280   : > { %v2512_v35 = vadd.f32 %v2478_v56, %v2422_v0  ;;  %v2488_v56 = vpop.f32.mrf.mxu3 }
 0x283   : > { %v2285_v19 = vpop.f32.mrf.mxu1  ;;  %v2563_v42 = vpop.f32.mrf.mxu0  ;;  %5172 = vmatmul.msk.bf16.gmra.mxu3 %vm455_vm1, %v8325_v4 }
 0x284   : > { %v2317_v57 = vadd.f32 %v2285_v19, %v6763_v61  ;;  %v6954_v47 = vadd.f32 %v2563_v42, %v2509_v58  ;;  %v2398_v37 = vpop.f32.mrf.mxu2 }
 0x286   : > { %v2423_v21 = vadd.f32 %v2391_v52, %v2317_v57  ;;  %5148 = vmatmul.msk.bf16.gmra.mxu1 %vm455_vm1, %v5458_v54  ;;  %5181 = vmatmul.msk.bf16.gmra.mxu0 %vm455_vm1, %v8316_v41 }
 0x288   : > { %v2513_v26 = vadd.f32 %v2481_v62, %v2423_v21  ;;  %v2491_v27 = vpop.f32.mrf.mxu3  ;;  %v6994_v62 = vld [vmem:[%s5604_s21 + $0x88] sm:$0xf]  ;;  %v7015_v21 = vld [vmem:[%s5604_s21 + $0x8c] sm:$0x1] }
 0x289   : > { %v2715_v53 = vshll.u32 %v6994_v62, 16  ;;  %v2719_v63 = vshrl.u32 %v6994_v62, 16 }
 0x28b   : > { %v2287_v46 = vpop.f32.mrf.mxu1  ;;  %v2565_v22 = vpop.f32.mrf.mxu0  ;;  %v2717_v31 = vrot.slane %v2715_v53, 5  ;;  %v2721_v19 = vrot.slane %v2719_v63, 4 }
 0x28c   : > { %v2318_v29 = vadd.f32 %v2287_v46, %v6782_v60  ;;  %v6963_v61 = vadd.f32 %v2565_v22, %v2510_v15  ;;  %v2725_v22 = vshll.u32 %v7015_v21, 16 }
 0x28d   : > { %5162 = vmatmul.msk.bf16.gmra.mxu2 %vm455_vm1, %v8314_v16  ;;  %v2722_v46 = vor.u32 %v2721_v19, %v2717_v31 }
 0x28e   : > { %v2424_v58 = vadd.f32 %v2393_v9, %v2318_v29  ;;  %v7010_v9 = vld [vmem:[%s5595_s17 + $0x88] sm:$0xf] }
 0x28f   : > { %v2743_v29 = vshrl.u32 %v7010_v9, 16 }
 0x290   : > { %v6965_v36 = vadd.f32 %v2483_v20, %v2424_v58  ;;  %v7025_v58 = vld [vmem:[%s5595_s17 + $0x8c] sm:$0x1] }
 0x293   : > { %v2290_v4 = vpop.f32.mrf.mxu1  ;;  %v2568_v5 = vpop.f32.mrf.mxu0  ;;  %5173 = vmatmul.msk.bf16.gmra.mxu3 %vm455_vm1, %v8326_v55 }
 0x294   : > { %v2319_v41 = vadd.f32 %v2290_v4, %v6810_v13  ;;  %v6970_v24 = vadd.f32 %v2568_v5, %v2511_v2  ;;  %v2401_v55 = vpop.f32.mrf.mxu2 }
 0x296   : > { %v2425_v60 = vadd.f32 %v2396_v8, %v2319_v41  ;;  %5149 = vmatmul.msk.bf16.gmra.mxu1 %vm455_vm1, %v5459_v43  ;;  %5182 = vmatmul.msk.bf16.gmra.mxu0 %vm455_vm1, %v8318_v28 }
 0x298   : > { %v6978_v16 = vadd.f32 %v2486_v25, %v2425_v60  ;;  %v7022_v25 = vpop.f32.mrf.mxu3 }
 0x29b   : > { %v2292_v15 = vpop.f32.mrf.mxu1  ;;  %v2570_v13 = vpop.f32.mrf.mxu0 }
 0x29c   : > { %v2320_v23 = vadd.f32 %v2292_v15, %v6832_v48  ;;  %v6981_v51 = vadd.f32 %v2570_v13, %v2512_v35  ;;  %v6991_v48 = vld [vmem:[%s5604_s21 + $0x84] sm:$0xf]  ;;  %v7012_v57 = vpop.f32.mrf.mxu2  ;;  %v2727_v15 = vrot.slane %v2725_v22, 5  ;;  %v2745_v13 = vrot.slane %v2743_v29, 4  ;;  %v5461_v29 = vld [vmem:[%s5595_s17 + $0x6c] sm:$0xff] }
 0x29d   : > { %5163 = vmatmul.msk.bf16.gmra.mxu2 %vm455_vm1, %v6676_v40  ;;  %v2706_v34 = vshrl.u32 %v6991_v48, 16  ;;  %v2709_v40 = vshll.u32 %v6991_v48, 16  ;;  %v7007_v35 = vld [vmem:[%s5595_s17 + $0x84] sm:$0xf] }
 0x29e   : > { %v2426_v49 = vadd.f32 %v2398_v37, %v2320_v23  ;;  %v2730_v54 = vshrl.u32 %v7007_v35, 16 }
 0x29f   : > { %v2711_v20 = vrot.slane %v2709_v40, 5 }
 0x2a0   : > { %v6983_v30 = vadd.f32 %v2488_v56, %v2426_v49  ;;  %v2732_v4 = vrot.slane %v2730_v54, 4  ;;  %v2723_v56 = vrot.slane %v2722_v46, 4  ;;  %v2496_v46 = vpop.f32.mrf.mxu3 }
 0x2a3   : > { %v2295_v28 = vpop.f32.mrf.mxu1  ;;  %v2573_v17 = vpop.f32.mrf.mxu0  ;;  %5174 = vmatmul.msk.bf16.gmra.mxu3 %vm455_vm1, %v6875_v38  ;;  %v2708_v38 = vrot.slane %v2706_v34, 4 }
 0x2a4   : > { %v2321_v52 = vadd.f32 %v2295_v28, %v6846_v59  ;;  %v6988_v2 = vadd.f32 %v2573_v17, %v2513_v26  ;;  %v5460_v59 = vld [vmem:[%s5595_s17 + $0x60] sm:$0xff]  ;;  %v2733_v26 = vshll.u32 %v7007_v35, 16  ;;  %v2728_v17 = vsel %vm5640_vm4, %v2723_v56, %v2727_v15 }
 0x2a5   : > { %v2712_v8 = vor.u32 %v2711_v20, %v2708_v38  ;;  %v2756_v40 = vunpack.c.l.b16 %v2728_v17  ;;  %v2406_v20 = vpop.f32.mrf.mxu2 }
 0x2a6   : > { %v2427_v0 = vadd.f32 %v2401_v55, %v2321_v52  ;;  %5150 = vmatmul.msk.bf16.gmra.mxu1 %vm455_vm1, %v5460_v59  ;;  %5183 = vmatmul.msk.bf16.gmra.mxu0 %vm455_vm1, %v6194_v39  ;;  %v2739_v39 = vshll.u32 %v7010_v9, 16  ;;  %v2735_v5 = vrot.slane %v2733_v26, 5 }
 0x2a7   : > { %v2713_v43 = vrot.slane %v2712_v8, 4 }
 0x2a8   : > { %v2517_v42 = vadd.f32 %v2491_v27, %v2427_v0  ;;  %v2741_v41 = vrot.slane %v2739_v39, 5  ;;  %v2736_v55 = vor.u32 %v2735_v5, %v2732_v4  ;;  %v2749_v27 = vshll.u32 %v7025_v58, 16  ;;  %v8335_v4 = vld [vmem:[#allocation36_spill] sm:$0xff] }
 0x2a9   : > { %v2718_v28 = vsel %vm5640_vm4, %v2713_v43, %v2717_v31 }
 0x2aa   : > { %v2746_v52 = vor.u32 %v2745_v13, %v2741_v41  ;;  %v2755_v34 = vunpack.c.l.b16 %v2718_v28  ;;  %v2737_v53 = vrot.slane %v2736_v55, 4  ;;  %v5462_v13 = vld [vmem:[%s5595_s17 + $0x78] sm:$0xff]  ;;  %v8336_v55 = vld [vmem:[#allocation37_spill] sm:$0xff]  ;;  %v2936_v28 = vrot.slane %v6994_v62, 5 }
 0x2ab   : > { %v2297_v37 = vpop.f32.mrf.mxu1  ;;  %v2575_v60 = vpop.f32.mrf.mxu0 }
 0x2ac   : > { %v7028_v23 = vadd.f32 %v2297_v37, %v6870_v7  ;;  %v7031_v49 = vadd.f32 %v2575_v60, %v6965_v36  ;;  %v2747_v63 = vrot.slane %v2746_v52, 4  ;;  %v2751_v7 = vrot.slane %v2749_v27, 5  ;;  %v5201_v52 = vld [vmem:[%s8182_s5 + $0x2] sm:$0x3] }
 0x2ad   : > { %v2757_v0 = vpack.c.b16 %v2756_v40, %v2755_v34  ;;  %v2742_v36 = vsel %vm5640_vm4, %v2737_v53, %v2741_v41  ;;  %v2938_v17 = vrot.slane %v2936_v28, 4  ;;  %v3838_v34 = vsel %vm486_vm0, %v5201_v52, 0  ;;  %v5358_v53 = vld [vmem:[%s5595_s17 + $0x84] sm:$0xff]  ;;  %s7223_s17 = sshll.u32 %s5489_s24, 3 }
 0x2ae   : > { %v2752_v59 = vsel %vm5640_vm4, %v2747_v63, %v2751_v7  ;;  %v2845_v38 = vunpack.c.l.b16 %v2742_v36  ;;  %3847 = vmatpush.bf16.msra.mxu2 %v3838_v34  ;;  %v3594_v36 = vld [vmem:[%s8182_s5] sm:$0x3]  ;;  %s5200_s13 = sadd.s32 4294967295, %s7223_s17  ;;  %p316_p6 = scmp.lt.s32.totalorder %s7223_s17, 15 }
 0x2af   : > { %5164 = vmatmul.msk.bf16.gmra.mxu2 %vm455_vm1, %v2757_v0  ;;  %v2846_v31 = vunpack.c.l.b16 %v2752_v59 }
 0x2b0   : > { %s8386_s17 = smov (!%p316_p6, %s7223_s17), 15 }
 0x2b1   : > { %v2847_v8 = vpack.c.b16 %v2846_v31, %v2845_v38  ;;  %v3954_v38 = vsel %vm486_vm0, %v3594_v36, 0  ;;  %s4877_s15 = sshll.u32 %s8386_s17, 1 }
 0x2b2   : > { %3963 = vmatpush.bf16.msra.mxu3 %v3954_v38  ;;  %s320_s18 = sadd.s32 %s4878_s16, %s4877_s15 }
 0x2b3   : > { %v2300_v19 = vpop.f32.mrf.mxu1  ;;  %v2578_v54 = vpop.f32.mrf.mxu0  ;;  %5175 = vmatmul.msk.bf16.gmra.mxu3 %vm455_vm1, %v2847_v8  ;;  %s4879_s22 = sshll.u32 %s320_s18, 3 }
 0x2b4   : > { %v2323_v26 = vadd.f32 %v2300_v19, %v6880_v18  ;;  %v7045_v39 = vadd.f32 %v2578_v54, %v6978_v16  ;;  %s8085_s23 = scalar_lea.vmem %s8184_s7, %s4879_s22 }
 0x2b6   : > { %v2429_v22 = vadd.f32 %v2406_v20, %v2323_v26  ;;  %5151 = vmatmul.msk.bf16.gmra.mxu1 %vm455_vm1, %v5461_v29  ;;  %5184 = vmatmul.msk.bf16.gmra.mxu0 %vm455_vm1, %v8335_v4  ;;  %v8337_v20 = vld [vmem:[#allocation38_spill] sm:$0xff]  ;;  %v8338_v26 = vld [vmem:[#allocation39_spill] sm:$0xff] }
 0x2b8   : > { %v2519_v5 = vadd.f32 %v2496_v46, %v2429_v22 }
 0x2bb   : > { %v2302_v41 = vpop.f32.mrf.mxu1  ;;  %v2580_v37 = vpop.f32.mrf.mxu0 }
 0x2bc   : > { %v7053_v18 = vadd.f32 %v2302_v41, %v6891_v10  ;;  %v7056_v16 = vadd.f32 %v2580_v37, %v6983_v30  ;;  %v8340_v41 = vld [vmem:[#allocation41_spill] sm:$0xff] }
 0x2c3   : > { %v2583_v60 = vpop.f32.mrf.mxu0  ;;  %v2635_v43 = vpop.f32.mrf.mxu1 }
 0x2c4   : > { %v7058_v56 = vadd.f32 %v2583_v60, %v2517_v42  ;;  %v7061_v15 = vadd.f32 %v2635_v43, %v6898_v11  ;;  %v5176_v42 = vrot.slane %v6991_v48, 9  ;;  %v2939_v11 = vrot.slane %v7015_v21, 5  ;;  %v8341_v43 = vld [vmem:[#allocation42_spill] sm:$0xff] }
 0x2c6   : > { %5152 = vmatmul.msk.bf16.gmra.mxu1 %vm455_vm1, %v5462_v13  ;;  %5185 = vmatmul.msk.bf16.gmra.mxu0 %vm455_vm1, %v8336_v55  ;;  %v2937_v40 = vsel %vm5846_vm7, %v5176_v42, %v2936_v28  ;;  %v7134_v55 = vpop.f32.mrf.mxu2  ;;  %v8342_v28 = vld [vmem:[#allocation30_spill] sm:$0xff] }
 0x2c7   : > { %v2951_v62 = vunpack.c.l.b16 %v2937_v40  ;;  %v8343_v40 = vld [vmem:[#allocation32_spill] sm:$0xff] }
 0x2cb   : > { %v7067_v27 = vpop.f32.mrf.mxu0  ;;  %v2637_v10 = vpop.f32.mrf.mxu1 }
 0x2cc   : > { %v7070_v30 = vadd.f32 %v2637_v10, %v6907_v44  ;;  %v2940_v44 = vsel %vm5846_vm7, %v2938_v17, %v2939_v11 }
 0x2cd   : > { %v2952_v63 = vunpack.c.l.b16 %v2940_v44 }
 0x2ce   : > { %v2773_v17 = vpop.f32.mrf.mxu2 }
 0x2cf   : > { %v2953_v59 = vpack.c.b16 %v2952_v63, %v2951_v62 }
 0x2d3   : > { %v2588_v48 = vpop.f32.mrf.mxu0  ;;  %v2640_v7 = vpop.f32.mrf.mxu1 }
 0x2d4   : > { %v7084_v0 = vadd.f32 %v2588_v48, %v2519_v5  ;;  %v7087_v21 = vadd.f32 %v2640_v7, %v6913_v33 }
 0x2d6   : > { %5153 = vmatmul.msk.bf16.gmra.mxu1 %vm455_vm1, %v5358_v53  ;;  %5186 = vmatmul.msk.bf16.gmra.mxu0 %vm455_vm1, %v8337_v20 }
 0x2db   : > { %v2642_v31 = vpop.f32.mrf.mxu1  ;;  %v7146_v11 = vpop.f32.mrf.mxu0 }
 0x2dc   : > { %v7097_v19 = vadd.f32 %v2642_v31, %v6921_v45  ;;  %v8339_v45 = vld [vmem:[#allocation40_spill] sm:$0xff] }
 0x2e3   : > { %v2645_v54 = vpop.f32.mrf.mxu1  ;;  %v2969_v44 = vpop.f32.mrf.mxu0 }
 0x2e4   : > { %v7100_v33 = vadd.f32 %v2645_v54, %v6926_v3 }
 0x2e6   : > { %5187 = vmatmul.msk.bf16.gmra.mxu0 %vm455_vm1, %v6801_v1  ;;  %5190 = vmatmul.msk.bf16.vlgmr.msrb.gmra.mxu1 %vm455_vm1, %v8338_v26 }
 0x2eb   : > { %v2647_v8 = vpop.f32.mrf.mxu1  ;;  %v7160_v48 = vpop.f32.mrf.mxu0 }
 0x2ec   : > { %v7107_v46 = vadd.f32 %v2647_v8, %v6935_v50 }
 0x2f3   : > { %v2650_v22 = vpop.f32.mrf.mxu1  ;;  %v7177_v31 = vpop.f32.mrf.mxu0 }
 0x2f4   : > { %v7110_v29 = vadd.f32 %v2650_v22, %v6940_v6  ;;  %v8345_v22 = vld [vmem:[#allocation19_spill] sm:$0xff] }
 0x2f6   : > { %5188 = vmatmul.msk.bf16.gmra.mxu0 %vm455_vm1, %v2953_v59  ;;  %5191 = vmatmul.msk.bf16.gmra.mxu1 %vm455_vm1, %v8339_v45 }
 0x2fb   : > { %v2652_v3 = vpop.f32.mrf.mxu1  ;;  %v7208_v45 = vpop.f32.mrf.mxu0 }
 0x2fc   : > { %v7116_v4 = vadd.f32 %v2652_v3, %v6949_v14 }
 0x303   : > { %v2655_v1 = vpop.f32.mrf.mxu1 }
 0x304   : > { %v7119_v5 = vadd.f32 %v2655_v1, %v6954_v47  ;;  %v2823_v1 = vadd.f32 %v2773_v17, %v7061_v15  ;;  %v7241_v15 = vpop.f32.mrf.mxu0 }
 0x306   : > { %5192 = vmatmul.msk.bf16.gmra.mxu1 %vm455_vm1, %v8340_v41 }
 0x30b   : > { %v2657_v50 = vpop.f32.mrf.mxu1 }
 0x30c   : > { %v7124_v6 = vadd.f32 %v2657_v50, %v6963_v61  ;;  %v7141_v61 = vpop.f32.mrf.mxu3 }
 0x313   : > { %v2660_v37 = vpop.f32.mrf.mxu1 }
 0x314   : > { %v7127_v60 = vadd.f32 %v2660_v37, %v6970_v24  ;;  %v7243_v37 = vstv %s5200_s13 }
 0x315   : > { %vm3184_vm10 = vcmp.ge.s32.totalorder %v7243_v37, 0  ;;  %vm3194_vm11 = vcmp.lt.s32.totalorder %v7243_v37, 16 }
 0x316   : > { %5193 = vmatmul.msk.bf16.gmra.mxu1 %vm455_vm1, %v8341_v43  ;;  %vm7271_vm12 = vmand %vm3184_vm10, %vm3194_vm11 }
 0x317   : > { %vm7334_vm11 = vmand %vm3237_vm9, %vm3286_vm15 }
 0x31b   : > { %v2662_v14 = vpop.f32.mrf.mxu1 }
 0x31c   : > { %v7132_v13 = vadd.f32 %v2662_v14, %v6981_v51  ;;  %v2863_v51 = vpop.f32.mrf.mxu3  ;;  %v7250_v14 = vld [vmem:[%s8181_s4] ss:$0 sm:$0xff] }
 0x31d   : > { %v2913_v41 = vadd.f32 %v2863_v51, %v2823_v1  ;;  %v7287_v1 = vpop.f32.mrf.mxu0 }
 0x31f   : > { %v3019_v43 = vadd.f32 %v2969_v44, %v2913_v41  ;;  %v2947_v44 = vrot.slane %v7025_v58, 5 }
 0x323   : > { %v2665_v47 = vpop.f32.mrf.mxu1 }
 0x324   : > { %v7137_v10 = vadd.f32 %v2665_v47, %v6988_v2  ;;  %v2775_v2 = vpop.f32.mrf.mxu2  ;;  %v7156_v63 = vpop.f32.mrf.mxu3 }
 0x326   : > { %5194 = vmatmul.msk.bf16.gmra.mxu1 %vm455_vm1, %v8342_v28  ;;  %v2944_v28 = vrot.slane %v7010_v9, 5 }
 0x32b   : > { %v2667_v24 = vpop.f32.mrf.mxu1 }
 0x32c   : > { %v7144_v42 = vadd.f32 %v2667_v24, %v7031_v49  ;;  %v7158_v49 = vpop.f32.mrf.mxu2  ;;  %v7167_v59 = vpop.f32.mrf.mxu3  ;;  %v2824_v24 = vadd.f32 %v2775_v2, %v7070_v30  ;;  %v5177_v30 = vrot.slane %v7007_v35, 9  ;;  %v2946_v2 = vrot.slane %v2944_v28, 4 }
 0x32e   : > { %v2945_v58 = vsel %vm5846_vm7, %v5177_v30, %v2944_v28 }
 0x333   : > { %v2670_v52 = vpop.f32.mrf.mxu1 }
 0x334   : > { %v7149_v34 = vadd.f32 %v2670_v52, %v7045_v39  ;;  %v8344_v39 = vld [vmem:[#allocation33_spill] sm:$0xff]  ;;  %v7173_v20 = vpop.f32.mrf.mxu2 }
 0x336   : > { %5195 = vmatmul.msk.bf16.gmra.mxu1 %vm455_vm1, %v8343_v40  ;;  %v8346_v40 = vld [vmem:[#allocation17_spill] sm:$0xff] }
 0x33b   : > { %v2672_v53 = vpop.f32.mrf.mxu1 }
 0x33c   : > { %v7154_v62 = vadd.f32 %v2672_v53, %v7056_v16  ;;  %v5507_v16 = vmov 0   ;;  %v7202_v8 = vpop.f32.mrf.mxu2  ;;  %v2914_v53 = vadd.f32 %v7156_v63, %v2824_v24  ;;  %v2948_v63 = vsel %vm5846_vm7, %v2946_v2, %v2947_v44 }
 0x33d   : > { %3235 = vst.msk [vmem:[#allocation2] sm:$0xf] %vm3234_vm8, %v5507_v16 }
 0x33e   : > { %3236 = vst.msk [vmem:[#allocation2 + $0x4] sm:$0xf] %vm3234_vm8, %v5507_v16 }
 0x33f   : > { %3239 = vst.msk [vmem:[#allocation2 + $0xc] sm:$0xf] %vm3234_vm8, %v5507_v16 }
 0x340   : > { %3240 = vst.msk [vmem:[#allocation2 + $0x10] sm:$0xf] %vm3234_vm8, %v5507_v16 }
 0x341   : > { %3242 = vst.msk [vmem:[#allocation2 + $0x18] sm:$0xf] %vm3234_vm8, %v5507_v16 }
 0x342   : > { %3243 = vst.msk [vmem:[#allocation2 + $0x1c] sm:$0xf] %vm3234_vm8, %v5507_v16 }
 0x343   : > { %v2675_v7 = vpop.f32.mrf.mxu1  ;;  %3245 = vst.msk [vmem:[#allocation2 + $0x24] sm:$0xf] %vm3234_vm8, %v5507_v16 }
 0x344   : > { %v7163_v36 = vadd.f32 %v2675_v7, %v7058_v56  ;;  %v7187_v56 = vpop.f32.mrf.mxu3  ;;  %3246 = vst.msk [vmem:[#allocation2 + $0x28] sm:$0xf] %vm3234_vm8, %v5507_v16  ;;  %v7237_v50 = vpop.f32.mrf.mxu2  ;;  %v3492_v44 = vld [vmem:[#allocation2] sm:$0xf] }
 0x345   : > { %3248 = vst.msk [vmem:[#allocation2 + $0x30] sm:$0xf] %vm3234_vm8, %v5507_v16 }
 0x346   : > { %5196 = vmatmul.msk.bf16.gmra.mxu1 %vm455_vm1, %v8344_v39  ;;  %3249 = vst.msk [vmem:[#allocation2 + $0x34] sm:$0xf] %vm3234_vm8, %v5507_v16  ;;  %v3020_v39 = vadd.f32 %v7160_v48, %v2914_v53 }
 0x347   : > { %3251 = vst.msk [vmem:[#allocation2 + $0x3c] sm:$0xf] %vm3234_vm8, %v5507_v16 }
 0x348   : > { %3252 = vst.msk [vmem:[#allocation2 + $0x40] sm:$0xf] %vm3234_vm8, %v5507_v16 }
 0x349   : > { %3254 = vst.msk [vmem:[#allocation2 + $0x48] sm:$0xf] %vm3234_vm8, %v5507_v16 }
 0x34a   : > { %3255 = vst.msk [vmem:[#allocation2 + $0x4c] sm:$0xf] %vm3234_vm8, %v5507_v16 }
 0x34b   : > { %v7169_v38 = vpop.f32.mrf.mxu1  ;;  %3257 = vst.msk [vmem:[#allocation2 + $0x54] sm:$0xf] %vm3234_vm8, %v5507_v16 }
 0x34c   : > { %3258 = vst.msk [vmem:[#allocation2 + $0x58] sm:$0xf] %vm3234_vm8, %v5507_v16 }
 0x34d   : > { %3260 = vst.msk [vmem:[#allocation2 + $0x60] sm:$0xf] %vm3234_vm8, %v5507_v16 }
 0x34e   : > { %3261 = vst.msk [vmem:[#allocation2 + $0x64] sm:$0xf] %vm3234_vm8, %v5507_v16 }
 0x34f   : > { %3263 = vst.msk [vmem:[#allocation2 + $0x6c] sm:$0xf] %vm3234_vm8, %v5507_v16 }
 0x350   : > { %3264 = vst.msk [vmem:[#allocation2 + $0x70] sm:$0xf] %vm3234_vm8, %v5507_v16 }
 0x351   : > { %3238 = vst.msk [vmem:[#allocation2 + $0x8] sm:$0x1] %vm3237_vm9, %v5507_v16 }
 0x352   : > { %3241 = vst.msk [vmem:[#allocation2 + $0x14] sm:$0x1] %vm3237_vm9, %v5507_v16 }
 0x353   : > { %v2680_v54 = vpop.f32.mrf.mxu1  ;;  %3244 = vst.msk [vmem:[#allocation2 + $0x20] sm:$0x1] %vm3237_vm9, %v5507_v16 }
 0x354   : > { %v7196_v26 = vadd.f32 %v2680_v54, %v7084_v0  ;;  %v7218_v0 = vpop.f32.mrf.mxu3  ;;  %3247 = vst.msk [vmem:[#allocation2 + $0x2c] sm:$0x1] %vm3237_vm9, %v5507_v16  ;;  %v7283_v54 = vpop.f32.mrf.mxu2 }
 0x355   : > { %3250 = vst.msk [vmem:[#allocation2 + $0x38] sm:$0x1] %vm3237_vm9, %v5507_v16 }
 0x356   : > { %5197 = vmatmul.msk.bf16.gmra.mxu1 %vm455_vm1, %v8345_v22  ;;  %3253 = vst.msk [vmem:[#allocation2 + $0x44] sm:$0x1] %vm3237_vm9, %v5507_v16 }
 0x357   : > { %3256 = vst.msk [vmem:[#allocation2 + $0x50] sm:$0x1] %vm3237_vm9, %v5507_v16 }
 0x358   : > { %3259 = vst.msk [vmem:[#allocation2 + $0x5c] sm:$0x1] %vm3237_vm9, %v5507_v16 }
 0x359   : > { %3262 = vst.msk [vmem:[#allocation2 + $0x68] sm:$0x1] %vm3237_vm9, %v5507_v16 }
 0x35a   : > { %3265 = vst.msk [vmem:[#allocation2 + $0x74] sm:$0x1] %vm3237_vm9, %v5507_v16  ;;  %v2825_v16 = vadd.f32 %v7158_v49, %v7087_v21 }
 0x35b   : > { %v7220_v3 = vpop.f32.mrf.mxu1 }
 0x35c   : > { %v7262_v51 = vpop.f32.mrf.mxu3  ;;  %v2915_v21 = vadd.f32 %v7167_v59, %v2825_v16  ;;  %v2826_v16 = vadd.f32 %v7173_v20, %v7097_v19 }
 0x363   : > { %v3059_v47 = vpop.f32.mrf.mxu1 }
 0x364   : > { %v3109_v17 = vadd.f32 %v3059_v47, %v3019_v43  ;;  %v5280_v47 = vld [vmem:[%s8182_s5 + $0x8] sm:$0x3]  ;;  %v7300_v28 = vpop.f32.mrf.mxu3 }
 0x366   : > { %v3133_v52 = vadd.f32 %v7250_v14, %v3109_v17  ;;  %5198 = vmatmul.msk.bf16.gmra.mxu1 %vm455_vm1, %v8346_v40  ;;  %v3041_v17 = vunpack.c.l.b16 %v2945_v58  ;;  %v4298_v40 = vsel %vm486_vm0, %v5280_v47, 0 }
 0x367   : > { %4307 = vmatpush.bf16.msrb.mxu0 %v4298_v40 }
 0x368   : > { %v3153_v7 = vmax.f32 %v3133_v52, 0.0  ;;  %v3042_v52 = vunpack.c.l.b16 %v2948_v63 }
 0x36a   : > { %v3214_v22 = vsel %vm7271_vm12, %v3153_v7, 0.0  ;;  %v3175_v7 = vadd.s32 1, %v7243_v37  ;;  %v3043_v58 = vpack.c.b16 %v3042_v52, %v3041_v17  ;;  %v2916_v52 = vadd.f32 %v7187_v56, %v2826_v16 }
 0x36b   : > { %v3266_v41 = vpack.c.bf16 %v3214_v22, %v3214_v22  ;;  %v3061_v35 = vpop.f32.mrf.mxu1  ;;  %v3021_v22 = vadd.f32 %v7177_v31, %v2915_v21  ;;  %v7318_v31 = vpop.f32.mrf.mxu0 }
 0x36c   : > { %v3110_v43 = vadd.f32 %v3061_v35, %v3020_v39  ;;  %vm3185_vm3 = vcmp.ge.s32.totalorder %v3175_v7, 0  ;;  %vm3195_vm5 = vcmp.lt.s32.totalorder %v3175_v7, 16 }
 0x36d   : > { %v3290_v48 = vshrl.u32 %v3266_v41, 16  ;;  %v3293_v2 = vshll.u32 %v3266_v41, 16  ;;  %vm7327_vm10 = vmand %vm3185_vm3, %vm3195_vm5 }
 0x36e   : > { %v3134_v24 = vadd.f32 %v7250_v14, %v3110_v43  ;;  %v7316_v43 = vpop.f32.mrf.mxu2 }
 0x36f   : > { %v3292_v30 = vrot.slane %v3290_v48, 7 }
 0x370   : > { %v3154_v53 = vmax.f32 %v3134_v24, 0.0 }
 0x371   : > { %v3295_v39 = vor.u32 %v3293_v2, %v3292_v30  ;;  %v3498_v2 = vld [vmem:[#allocation2 + $0x8] sm:$0x1] }
 0x372   : > { %v3215_v35 = vsel %vm7271_vm12, %v3154_v53, 0.0  ;;  %v3296_v53 = vrot.slane %v3292_v30, 4 }
 0x373   : > { %v3493_v41 = vsel %vm7304_vm14, %v3295_v39, %v3492_v44  ;;  %v3267_v59 = vpack.c.bf16 %v3215_v35, %v3215_v35  ;;  %v3064_v63 = vpop.f32.mrf.mxu1  ;;  %v7338_v44 = vpop.f32.mrf.mxu3  ;;  %v3022_v35 = vadd.f32 %v7208_v45, %v2916_v52  ;;  %v3176_v52 = vadd.s32 2, %v7243_v37 }
 0x374   : > { %3494 = vst [vmem:[#allocation2] sm:$0xf] %v3493_v41  ;;  %v3111_v48 = vadd.f32 %v3064_v63, %v3021_v22  ;;  %v5290_v22 = vld [vmem:[%s8182_s5 + $0xa] sm:$0x3] }
 0x375   : > { %v3298_v9 = vshrl.u32 %v3267_v59, 16  ;;  %v3301_v19 = vshll.u32 %v3267_v59, 16  ;;  %vm3186_vm9 = vcmp.ge.s32.totalorder %v3176_v52, 0  ;;  %vm3196_vm12 = vcmp.lt.s32.totalorder %v3176_v52, 16 }
 0x376   : > { %v3135_v24 = vadd.f32 %v7250_v14, %v3111_v48  ;;  %5199 = vmatmul.msk.bf16.gmra.mxu1 %vm455_vm1, %v3043_v58  ;;  %v4382_v58 = vsel %vm486_vm0, %v5290_v22, 0  ;;  %v2827_v48 = vadd.f32 %v7202_v8, %v7100_v33  ;;  %vm7385_vm13 = vmand %vm3186_vm9, %vm3196_vm12 }
 0x377   : > { %v3300_v17 = vrot.slane %v3298_v9, 7  ;;  %4391 = vmatpush.bf16.msra.mxu1 %v4382_v58 }
 0x378   : > { %v3155_v21 = vmax.f32 %v3135_v24, 0.0 }
 0x379   : > { %v3303_v7 = vor.u32 %v3301_v19, %v3300_v17  ;;  %v3305_v39 = vrot.slane %v3300_v17, 4  ;;  %v2828_v17 = vadd.f32 %v7237_v50, %v7107_v46  ;;  %v2917_v50 = vadd.f32 %v7218_v0, %v2827_v48 }
 0x37a   : > { %v3216_v56 = vsel %vm7327_vm10, %v3155_v21, 0.0  ;;  %v7360_v21 = vpop.f32.mrf.mxu2 }
 0x37b   : > { %v3304_v41 = vsel %vm7321_vm6, %v3296_v53, %v3303_v7  ;;  %v3499_v59 = vsel %vm7334_vm11, %v3305_v39, %v3498_v2  ;;  %v3268_v30 = vpack.c.bf16 %v3216_v56, %v3216_v56  ;;  %v3066_v63 = vpop.f32.mrf.mxu1  ;;  %v3564_v16 = vld [vmem:[#allocation2] sm:$0xf]  ;;  %v5258_v2 = vld [vmem:[%s8182_s5 + $0x4] sm:$0x3]  ;;  %v7364_v39 = vpop.f32.mrf.mxu0 }
 0x37c   : > { %3495 = vst.msk [vmem:[#allocation2 + $0x4] sm:$0xf] %vm3234_vm8, %v3304_v41  ;;  %v3112_v45 = vadd.f32 %v3066_v63, %v3022_v35  ;;  %v3596_v9 = vshrl.u32 %v3564_v16, 16  ;;  %v3599_v24 = vshll.u32 %v3564_v16, 16  ;;  %v4120_v7 = vsel %vm486_vm0, %v5258_v2, 0 }
 0x37d   : > { %3500 = vst [vmem:[#allocation2 + $0x8] sm:$0x1] %v3499_v59  ;;  %v3307_v19 = vshrl.u32 %v3268_v30, 16  ;;  %v3310_v46 = vshll.u32 %v3268_v30, 16  ;;  %4129 = vmatpush.bf16.msrb.mxu2 %v4120_v7  ;;  %v3501_v35 = vld [vmem:[#allocation2 + $0xc] sm:$0xf]  ;;  %v2918_v59 = vadd.f32 %v7262_v51, %v2828_v17  ;;  %v3023_v63 = vadd.f32 %v7241_v15, %v2917_v50 }
 0x37e   : > { %v3136_v33 = vadd.f32 %v7250_v14, %v3112_v45  ;;  %v3598_v8 = vrot.slane %v3596_v9, 4  ;;  %v3601_v53 = vrot.slane %v3599_v24, 5  ;;  %v7371_v9 = vpop.f32.mrf.mxu3  ;;  %v5250_v2 = vrot.slane %v3564_v16, 9 }
 0x37f   : > { %v3309_v22 = vrot.slane %v3307_v19, 7  ;;  %v2829_v51 = vadd.f32 %v7283_v54, %v7110_v29 }
 0x380   : > { %v3156_v56 = vmax.f32 %v3136_v33, 0.0  ;;  %v3602_v41 = vor.u32 %v3601_v53, %v3598_v8 }
 0x381   : > { %v3312_v58 = vor.u32 %v3310_v46, %v3309_v22  ;;  %v5267_v46 = vld [vmem:[%s8182_s5 + $0x6] sm:$0x3]  ;;  %v3313_v52 = vrot.slane %v3309_v22, 4 }
 0x382   : > { %v3217_v45 = vsel %vm7327_vm10, %v3156_v56, 0.0  ;;  %v3603_v53 = vrot.slane %v3602_v41, 4  ;;  %v4198_v29 = vsel %vm486_vm0, %v5267_v46, 0 }
 0x383   : > { %v3502_v30 = vsel %vm7304_vm14, %v3312_v58, %v3501_v35  ;;  %v3269_v24 = vpack.c.bf16 %v3217_v45, %v3217_v45  ;;  %v3069_v19 = vpop.f32.mrf.mxu1  ;;  %v5359_v0 = vld [vmem:[#allocation2] sm:$0xff]  ;;  %4207 = vmatpush.bf16.msrb.mxu3 %v4198_v29 }
 0x384   : > { %v3565_v48 = vld [vmem:[#allocation2 + $0x4] sm:$0xf]  ;;  %3503 = vst [vmem:[#allocation2 + $0xc] sm:$0xf] %v3502_v30  ;;  %v3113_v15 = vadd.f32 %v3069_v19, %v3023_v63  ;;  %v3566_v17 = vld [vmem:[#allocation2 + $0x8] sm:$0x1]  ;;  %5242 = vmatmul.msk.bf16.vlgmr.msra.gmra.mxu3 %vm455_vm1, %v5359_v0  ;;  %v3024_v30 = vadd.f32 %v7287_v1, %v2918_v59  ;;  %v7392_v19 = vpop.f32.mrf.mxu2 }
 0x385   : > { %v3605_v20 = vshll.u32 %v3565_v48, 16  ;;  %v3609_v33 = vshrl.u32 %v3565_v48, 16  ;;  %v3315_v8 = vshrl.u32 %v3269_v24, 16  ;;  %v3615_v7 = vshll.u32 %v3566_v17, 16  ;;  %v3505_v0 = vld [vmem:[#allocation2 + $0x14] sm:$0x1] }
 0x386   : > { %v4015_v50 = vrot.slane %v3565_v48, 5  ;;  %v3137_v16 = vadd.f32 %v7250_v14, %v3113_v15  ;;  %v3318_v58 = vshll.u32 %v3269_v24, 16  ;;  %v7394_v24 = vpop.f32.mrf.mxu0 }
 0x387   : > { %v3607_v35 = vrot.slane %v3605_v20, 5  ;;  %v3611_v56 = vrot.slane %v3609_v33, 4  ;;  %v3317_v54 = vrot.slane %v3315_v8, 7  ;;  %v4018_v20 = vrot.slane %v3566_v17, 5 }
 0x388   : > { %v4016_v41 = vsel %vm5846_vm7, %v5250_v2, %v4015_v50  ;;  %v4017_v45 = vrot.slane %v4015_v50, 4  ;;  %v3157_v48 = vmax.f32 %v3137_v16, 0.0  ;;  %v3617_v29 = vrot.slane %v3615_v7, 5 }
 0x389   : > { %v3612_v15 = vor.u32 %v3611_v56, %v3607_v35  ;;  %v3320_v33 = vor.u32 %v3318_v58, %v3317_v54  ;;  %v3322_v8 = vrot.slane %v3317_v54, 4  ;;  %v3608_v46 = vsel %vm5640_vm4, %v3603_v53, %v3607_v35 }
 0x38a   : > { %v3218_v2 = vsel %vm7385_vm13, %v3157_v48, 0.0  ;;  %v4019_v1 = vsel %vm5846_vm7, %v4017_v45, %v4018_v20  ;;  %v3789_v7 = vunpack.c.l.b16 %v3608_v46  ;;  %v7409_v48 = vpop.f32.mrf.mxu3  ;;  %v2919_v46 = vadd.f32 %v7300_v28, %v2829_v51 }
 0x38b   : > { %v3613_v50 = vrot.slane %v3612_v15, 4  ;;  %v3321_v59 = vsel %vm7321_vm6, %v3313_v52, %v3320_v33  ;;  %v3506_v17 = vsel %vm7334_vm11, %v3322_v8, %v3505_v0  ;;  %v3270_v22 = vpack.c.bf16 %v3218_v2, %v3218_v2  ;;  %v3071_v16 = vpop.f32.mrf.mxu1  ;;  %v3567_v56 = vld [vmem:[#allocation2 + $0xc] sm:$0xf] }
 0x38c   : > { %v4072_v54 = vunpack.c.l.b16 %v4019_v1  ;;  %3504 = vst.msk [vmem:[#allocation2 + $0x10] sm:$0xf] %vm3234_vm8, %v3321_v59  ;;  %v3114_v53 = vadd.f32 %v3071_v16, %v3024_v30  ;;  %v3620_v58 = vshrl.u32 %v3567_v56, 16  ;;  %v3623_v20 = vshll.u32 %v3567_v56, 16 }
 0x38d   : > { %v3618_v35 = vsel %vm5640_vm4, %v3613_v50, %v3617_v29  ;;  %3507 = vst [vmem:[#allocation2 + $0x14] sm:$0x1] %v3506_v17  ;;  %v3324_v45 = vshrl.u32 %v3270_v22, 16  ;;  %v4071_v52 = vunpack.c.l.b16 %v4016_v41  ;;  %v3327_v0 = vshll.u32 %v3270_v22, 16  ;;  %v3508_v29 = vld [vmem:[#allocation2 + $0x18] sm:$0xf]  ;;  %v7420_v22 = vpop.f32.mrf.mxu2 }
 0x38e   : > { %v3790_v15 = vunpack.c.l.b16 %v3618_v35  ;;  %v3138_v33 = vadd.f32 %v7250_v14, %v3114_v53  ;;  %v3177_v8 = vadd.s32 3, %v7243_v37  ;;  %v3622_v2 = vrot.slane %v3620_v58, 4 }
 0x38f   : > { %v3326_v1 = vrot.slane %v3324_v45, 7  ;;  %v3625_v59 = vrot.slane %v3623_v20, 5  ;;  %v7413_v16 = vpack.c.b16 %v4072_v54, %v4071_v52  ;;  %v2830_v50 = vadd.f32 %v7316_v43, %v7116_v4  ;;  %v7424_v54 = vpop.f32.mrf.mxu0 }
 0x390   : > { %v3805_v30 = vpack.c.b16 %v3790_v15, %v3789_v7  ;;  %v3158_v17 = vmax.f32 %v3138_v33, 0.0  ;;  %v3025_v41 = vadd.f32 %v7318_v31, %v2919_v46  ;;  %vm3187_vm15 = vcmp.ge.s32.totalorder %v3177_v8, 0 }
 0x391   : > { %v3329_v35 = vor.u32 %v3327_v0, %v3326_v1  ;;  %vm3197_vm2 = vcmp.lt.s32.totalorder %v3177_v8, 16  ;;  %v5251_v58 = vrot.slane %v3567_v56, 9  ;;  %v3626_v45 = vor.u32 %v3625_v59, %v3622_v2 }
 0x392   : > { %5202 = vmatmul.msk.bf16.vlgmr.msra.gmra.mxu2 %vm455_vm1, %v3805_v30  ;;  %v3219_v53 = vsel %vm7385_vm13, %v3158_v17, 0.0  ;;  %v2920_v31 = vadd.f32 %v7338_v44, %v2830_v50  ;;  %v3330_v0 = vrot.slane %v3326_v1, 4  ;;  %v7433_v59 = vpop.f32.mrf.mxu3  ;;  %vm7437_vm3 = vmand %vm3187_vm15, %vm3197_vm2 }
 0x393   : > { %v3509_v28 = vsel %vm7304_vm14, %v3329_v35, %v3508_v29  ;;  %v3271_v4 = vpack.c.bf16 %v3219_v53, %v3219_v53  ;;  %v3074_v43 = vpop.f32.mrf.mxu1  ;;  %v5360_v51 = vld [vmem:[#allocation2 + $0xc] sm:$0xff]  ;;  %v3627_v35 = vrot.slane %v3626_v45, 4  ;;  %v3512_v53 = vld [vmem:[#allocation2 + $0x20] sm:$0x1] }
 0x394   : > { %v3568_v7 = vld [vmem:[#allocation2 + $0x10] sm:$0xf]  ;;  %3510 = vst [vmem:[#allocation2 + $0x18] sm:$0xf] %v3509_v28  ;;  %v3115_v15 = vadd.f32 %v3074_v43, %v3025_v41  ;;  %v3569_v20 = vld [vmem:[#allocation2 + $0x14] sm:$0x1]  ;;  %5243 = vmatmul.msk.bf16.gmra.mxu3 %vm455_vm1, %v5360_v51 }
 0x395   : > { %v4022_v63 = vrot.slane %v3568_v7, 5  ;;  %v3629_v52 = vshll.u32 %v3568_v7, 16  ;;  %v3332_v33 = vshrl.u32 %v3271_v4, 16  ;;  %v4025_v30 = vrot.slane %v3569_v20, 5 }
 0x396   : > { %v3633_v46 = vshrl.u32 %v3568_v7, 16  ;;  %v3139_v29 = vadd.f32 %v7250_v14, %v3115_v15  ;;  %v3335_v50 = vshll.u32 %v3271_v4, 16  ;;  %v3639_v7 = vshll.u32 %v3569_v20, 16 }
 0x397   : > { %v4023_v17 = vsel %vm5846_vm7, %v5251_v58, %v4022_v63  ;;  %v4024_v56 = vrot.slane %v4022_v63, 4  ;;  %v3631_v2 = vrot.slane %v3629_v52, 5  ;;  %v3334_v44 = vrot.slane %v3332_v33, 7 }
 0x398   : > { %v3635_v41 = vrot.slane %v3633_v46, 4  ;;  %v3159_v28 = vmax.f32 %v3139_v29, 0.0  ;;  %v4073_v51 = vunpack.c.l.b16 %v4023_v17  ;;  %v3026_v4 = vadd.f32 %v7364_v39, %v2920_v31  ;;  %v7456_v31 = vpop.f32.mrf.mxu2 }
 0x399   : > { %v4026_v43 = vsel %vm5846_vm7, %v4024_v56, %v4025_v30  ;;  %v3337_v58 = vor.u32 %v3335_v50, %v3334_v44  ;;  %v3339_v15 = vrot.slane %v3334_v44, 4  ;;  %v3632_v45 = vsel %vm5640_vm4, %v3627_v35, %v3631_v2  ;;  %v7459_v50 = vpop.f32.mrf.mxu0 }
 0x39a   : > { %v4074_v63 = vunpack.c.l.b16 %v4026_v43  ;;  %v3636_v52 = vor.u32 %v3635_v41, %v3631_v2  ;;  %v3220_v8 = vsel %vm7437_vm3, %v3159_v28, 0.0  ;;  %v2831_v39 = vadd.f32 %v7360_v21, %v7119_v5 }
 0x39b   : > { %v3338_v33 = vsel %vm7321_vm6, %v3330_v0, %v3337_v58  ;;  %v3513_v30 = vsel %vm7334_vm11, %v3339_v15, %v3512_v53  ;;  %v3272_v46 = vpack.c.bf16 %v3220_v8, %v3220_v8  ;;  %v3076_v20 = vpop.f32.mrf.mxu1  ;;  %v3570_v17 = vld [vmem:[#allocation2 + $0x18] sm:$0xf]  ;;  %v3641_v44 = vrot.slane %v3639_v7, 5 }
 0x39c   : > { %v7452_v29 = vpack.c.b16 %v4074_v63, %v4073_v51  ;;  %3511 = vst.msk [vmem:[#allocation2 + $0x1c] sm:$0xf] %vm3234_vm8, %v3338_v33  ;;  %v3116_v56 = vadd.f32 %v3076_v20, %v3026_v4  ;;  %v3637_v2 = vrot.slane %v3636_v52, 4  ;;  %v3178_v35 = vadd.s32 4, %v7243_v37  ;;  %v3515_v4 = vld [vmem:[#allocation2 + $0x24] sm:$0xf]  ;;  %v7470_v33 = vpop.f32.mrf.mxu3 }
 0x39d   : > { %3514 = vst [vmem:[#allocation2 + $0x20] sm:$0x1] %v3513_v30  ;;  %v3341_v0 = vshrl.u32 %v3272_v46, 16  ;;  %v3644_v41 = vshrl.u32 %v3570_v17, 16  ;;  %v3647_v53 = vshll.u32 %v3570_v17, 16  ;;  %v3344_v28 = vshll.u32 %v3272_v46, 16 }
 0x39e   : > { %5291 = vmatmul.msk.bf16.vlgmr.msra.gmra.mxu1 %vm455_vm1, %v7452_v29  ;;  %v3140_v5 = vadd.f32 %v7250_v14, %v3116_v56  ;;  %v3642_v21 = vsel %vm5640_vm4, %v3637_v2, %v3641_v44  ;;  %v3791_v43 = vunpack.c.l.b16 %v3632_v45  ;;  %v2921_v63 = vadd.f32 %v7371_v9, %v2831_v39 }
 0x39f   : > { %v3343_v51 = vrot.slane %v3341_v0, 7  ;;  %v3792_v7 = vunpack.c.l.b16 %v3642_v21  ;;  %v3646_v58 = vrot.slane %v3644_v41, 4  ;;  %v3649_v15 = vrot.slane %v3647_v53, 5 }
 0x3a0   : > { %v2832_v52 = vadd.f32 %v7392_v19, %v7124_v6  ;;  %v3160_v8 = vmax.f32 %v3140_v5, 0.0  ;;  %v3027_v20 = vadd.f32 %v7394_v24, %v2921_v63  ;;  %vm3188_vm5 = vcmp.ge.s32.totalorder %v3178_v35, 0 }
 0x3a1   : > { %v3346_v30 = vor.u32 %v3344_v28, %v3343_v51  ;;  %v3806_v46 = vpack.c.b16 %v3792_v7, %v3791_v43  ;;  %vm3198_vm10 = vcmp.lt.s32.totalorder %v3178_v35, 16  ;;  %v5252_v2 = vrot.slane %v3570_v17, 9  ;;  %v7481_v7 = vpop.f32.mrf.mxu2 }
 0x3a2   : > { %v3221_v45 = vsel %vm7437_vm3, %v3160_v8, 0.0  ;;  %v3650_v44 = vor.u32 %v3649_v15, %v3646_v58  ;;  %v2922_v24 = vadd.f32 %v7409_v48, %v2832_v52  ;;  %v3347_v28 = vrot.slane %v3343_v51, 4  ;;  %v7486_v15 = vpop.f32.mrf.mxu0  ;;  %vm7490_vm9 = vmand %vm3188_vm5, %vm3198_vm10 }
 0x3a3   : > { %v3516_v56 = vsel %vm7304_vm14, %v3346_v30, %v3515_v4  ;;  %v3273_v9 = vpack.c.bf16 %v3221_v45, %v3221_v45  ;;  %5203 = vmatmul.msk.bf16.gmra.mxu2 %vm455_vm1, %v3806_v46  ;;  %5281 = vmatmul.msk.bf16.vlgmr.msrb.gmra.mxu0 %vm455_vm1, %v3806_v46  ;;  %v3079_v6 = vpop.f32.mrf.mxu1  ;;  %v5361_v19 = vld [vmem:[#allocation2 + $0x18] sm:$0xff]  ;;  %v3519_v46 = vld [vmem:[#allocation2 + $0x2c] sm:$0x1] }
 0x3a4   : > { %v3571_v39 = vld [vmem:[#allocation2 + $0x1c] sm:$0xf]  ;;  %3517 = vst [vmem:[#allocation2 + $0x24] sm:$0xf] %v3516_v56  ;;  %v3117_v1 = vadd.f32 %v3079_v6, %v3027_v20  ;;  %v3572_v0 = vld [vmem:[#allocation2 + $0x20] sm:$0x1]  ;;  %5244 = vmatmul.msk.bf16.gmra.mxu3 %vm455_vm1, %v5361_v19 }
 0x3a5   : > { %v4029_v41 = vrot.slane %v3571_v39, 5  ;;  %v3653_v53 = vshll.u32 %v3571_v39, 16  ;;  %v3349_v5 = vshrl.u32 %v3273_v9, 16  ;;  %v4032_v21 = vrot.slane %v3572_v0, 5 }
 0x3a6   : > { %v3657_v43 = vshrl.u32 %v3571_v39, 16  ;;  %v3141_v63 = vadd.f32 %v7250_v14, %v3117_v1  ;;  %v3352_v4 = vshll.u32 %v3273_v9, 16  ;;  %v3651_v8 = vrot.slane %v3650_v44, 4 }
 0x3a7   : > { %v4030_v17 = vsel %vm5846_vm7, %v5252_v2, %v4029_v41  ;;  %v4031_v58 = vrot.slane %v4029_v41, 4  ;;  %v3655_v48 = vrot.slane %v3653_v53, 5  ;;  %v3351_v52 = vrot.slane %v3349_v5, 7  ;;  %v7501_v41 = vpop.f32.mrf.mxu3 }
 0x3a8   : > { %v3659_v30 = vrot.slane %v3657_v43, 4  ;;  %v3161_v20 = vmax.f32 %v3141_v63, 0.0  ;;  %v4075_v56 = vunpack.c.l.b16 %v4030_v17  ;;  %v3663_v6 = vshll.u32 %v3572_v0, 16 }
 0x3a9   : > { %v4033_v45 = vsel %vm5846_vm7, %v4031_v58, %v4032_v21  ;;  %v3354_v19 = vor.u32 %v3352_v4, %v3351_v52  ;;  %v3356_v39 = vrot.slane %v3351_v52, 4  ;;  %v3028_v9 = vadd.f32 %v7424_v54, %v2922_v24 }
 0x3aa   : > { %v4076_v2 = vunpack.c.l.b16 %v4033_v45  ;;  %v3660_v1 = vor.u32 %v3659_v30, %v3655_v48  ;;  %v3222_v35 = vsel %vm7490_vm9, %v3161_v20, 0.0  ;;  %v3656_v44 = vsel %vm5640_vm4, %v3651_v8, %v3655_v48 }
 0x3ab   : > { %v3355_v53 = vsel %vm7321_vm6, %v3347_v28, %v3354_v19  ;;  %v3520_v0 = vsel %vm7334_vm11, %v3356_v39, %v3519_v46  ;;  %v3274_v5 = vpack.c.bf16 %v3222_v35, %v3222_v35  ;;  %v3081_v21 = vpop.f32.mrf.mxu1  ;;  %v3573_v63 = vld [vmem:[#allocation2 + $0x24] sm:$0xf]  ;;  %v2833_v54 = vadd.f32 %v7420_v22, %v7127_v60  ;;  %v7523_v39 = vpop.f32.mrf.mxu2 }
 0x3ac   : > { %v7507_v43 = vpack.c.b16 %v4076_v2, %v4075_v56  ;;  %3518 = vst.msk [vmem:[#allocation2 + $0x28] sm:$0xf] %vm3234_vm8, %v3355_v53  ;;  %v3118_v24 = vadd.f32 %v3081_v21, %v3028_v9  ;;  %v3661_v17 = vrot.slane %v3660_v1, 4  ;;  %v3665_v58 = vrot.slane %v3663_v6, 5  ;;  %v3522_v2 = vld [vmem:[#allocation2 + $0x30] sm:$0xf]  ;;  %v7525_v9 = vpop.f32.mrf.mxu0 }
 0x3ad   : > { %3521 = vst [vmem:[#allocation2 + $0x2c] sm:$0x1] %v3520_v0  ;;  %v3358_v48 = vshrl.u32 %v3274_v5, 16  ;;  %v3179_v28 = vadd.s32 5, %v7243_v37  ;;  %v3668_v52 = vshrl.u32 %v3573_v63, 16  ;;  %v3671_v4 = vshll.u32 %v3573_v63, 16 }
 0x3ae   : > { %5292 = vmatmul.msk.bf16.gmra.mxu1 %vm455_vm1, %v7507_v43  ;;  %v3361_v8 = vshll.u32 %v3274_v5, 16  ;;  %v3142_v30 = vadd.f32 %v7250_v14, %v3118_v24  ;;  %v3666_v60 = vsel %vm5640_vm4, %v3661_v17, %v3665_v58  ;;  %v3793_v22 = vunpack.c.l.b16 %v3656_v44 }
 0x3af   : > { %v7518_v46 = vrot.slane %v3358_v48, 7  ;;  %v3794_v20 = vunpack.c.l.b16 %v3666_v60  ;;  %v3670_v45 = vrot.slane %v3668_v52, 4  ;;  %v3673_v56 = vrot.slane %v3671_v4, 5  ;;  %v7542_v52 = vpop.f32.mrf.mxu3 }
 0x3b0   : > { %v2923_v6 = vadd.f32 %v7433_v59, %v2833_v54  ;;  %v2834_v19 = vadd.f32 %v7456_v31, %v7132_v13  ;;  %v3162_v1 = vmax.f32 %v3142_v30, 0.0  ;;  %vm3189_vm12 = vcmp.ge.s32.totalorder %v3179_v28, 0 }
 0x3b1   : > { %v3363_v35 = vor.u32 %v3361_v8, %v7518_v46  ;;  %v7528_v53 = vpack.c.b16 %v3794_v20, %v3793_v22  ;;  %vm3199_vm13 = vcmp.lt.s32.totalorder %v3179_v28, 16  ;;  %v3674_v54 = vor.u32 %v3673_v56, %v3670_v45 }
 0x3b2   : > { %v3029_v44 = vadd.f32 %v7459_v50, %v2923_v6  ;;  %v3223_v0 = vsel %vm7490_vm9, %v3162_v1, 0.0  ;;  %v5253_v50 = vrot.slane %v3573_v63, 9  ;;  %v2924_v51 = vadd.f32 %v7470_v33, %v2834_v19  ;;  %vm7552_vm15 = vmand %vm3189_vm12, %vm3199_vm13 }
 0x3b3   : > { %v3523_v13 = vsel %vm7304_vm14, %v3363_v35, %v3522_v2  ;;  %v3275_v59 = vpack.c.bf16 %v3223_v0, %v3223_v0  ;;  %5204 = vmatmul.msk.bf16.gmra.mxu2 %vm455_vm1, %v7528_v53  ;;  %5282 = vmatmul.msk.bf16.gmra.mxu0 %vm455_vm1, %v7528_v53  ;;  %v3084_v31 = vpop.f32.mrf.mxu1  ;;  %v7539_v5 = vld [vmem:[#allocation2 + $0x24] sm:$0xff]  ;;  %v3364_v4 = vrot.slane %v7518_v46, 4  ;;  %v3675_v46 = vrot.slane %v3674_v54, 4  ;;  %v3526_v2 = vld [vmem:[#allocation2 + $0x38] sm:$0x1] }
 0x3b4   : > { %v3574_v21 = vld [vmem:[#allocation2 + $0x28] sm:$0xf]  ;;  %3524 = vst [vmem:[#allocation2 + $0x30] sm:$0xf] %v3523_v13  ;;  %v3119_v24 = vadd.f32 %v3084_v31, %v3029_v44  ;;  %v3575_v17 = vld [vmem:[#allocation2 + $0x2c] sm:$0x1]  ;;  %5245 = vmatmul.msk.bf16.gmra.mxu3 %vm455_vm1, %v7539_v5  ;;  %v2428_v28 = vadd.f32 %v7012_v57, %v7028_v23 }
 0x3b5   : > { %v4036_v58 = vrot.slane %v3574_v21, 5  ;;  %v3677_v48 = vshll.u32 %v3574_v21, 16  ;;  %v3366_v8 = vshrl.u32 %v3275_v59, 16  ;;  %v4039_v30 = vrot.slane %v3575_v17, 5 }
 0x3b6   : > { %v3681_v60 = vshrl.u32 %v3574_v21, 16  ;;  %v3143_v63 = vadd.f32 %v7250_v14, %v3119_v24  ;;  %v3369_v56 = vshll.u32 %v3275_v59, 16  ;;  %v3687_v0 = vshll.u32 %v3575_v17, 16  ;;  %v7560_v59 = vpop.f32.mrf.mxu2 }
 0x3b7   : > { %v4037_v33 = vsel %vm5846_vm7, %v5253_v50, %v4036_v58  ;;  %v4038_v22 = vrot.slane %v4036_v58, 4  ;;  %v3679_v20 = vrot.slane %v3677_v48, 5  ;;  %v3368_v45 = vrot.slane %v3366_v8, 7  ;;  %v7567_v48 = vpop.f32.mrf.mxu0 }
 0x3b8   : > { %v3683_v19 = vrot.slane %v3681_v60, 4  ;;  %v3163_v1 = vmax.f32 %v3143_v63, 0.0  ;;  %v4077_v44 = vunpack.c.l.b16 %v4037_v33  ;;  %v3030_v24 = vadd.f32 %v7486_v15, %v2924_v51 }
 0x3b9   : > { %v4040_v35 = vsel %vm5846_vm7, %v4038_v22, %v4039_v30  ;;  %v3371_v13 = vor.u32 %v3369_v56, %v3368_v45  ;;  %v3373_v31 = vrot.slane %v3368_v45, 4  ;;  %v3680_v58 = vsel %vm5640_vm4, %v3675_v46, %v3679_v20 }
 0x3ba   : > { %v4078_v21 = vunpack.c.l.b16 %v4040_v35  ;;  %v3684_v50 = vor.u32 %v3683_v19, %v3679_v20  ;;  %v3224_v54 = vsel %vm7552_vm15, %v3163_v1, 0.0  ;;  %v2835_v15 = vadd.f32 %v7481_v7, %v7137_v10  ;;  %v7584_v19 = vpop.f32.mrf.mxu3 }
 0x3bb   : > { %v3372_v17 = vsel %vm7321_vm6, %v3364_v4, %v3371_v13  ;;  %v3527_v8 = vsel %vm7334_vm11, %v3373_v31, %v3526_v2  ;;  %v3276_v30 = vpack.c.bf16 %v3224_v54, %v3224_v54  ;;  %v3086_v57 = vpop.f32.mrf.mxu1  ;;  %v3576_v60 = vld [vmem:[#allocation2 + $0x30] sm:$0xf]  ;;  %v3689_v33 = vrot.slane %v3687_v0, 5  ;;  %v3529_v31 = vld [vmem:[#allocation2 + $0x3c] sm:$0xf] }
 0x3bc   : > { %v7573_v23 = vpack.c.b16 %v4078_v21, %v4077_v44  ;;  %3525 = vst.msk [vmem:[#allocation2 + $0x34] sm:$0xf] %vm3234_vm8, %v3372_v17  ;;  %v3120_v51 = vadd.f32 %v3086_v57, %v3030_v24  ;;  %v3685_v63 = vrot.slane %v3684_v50, 4  ;;  %v3180_v4 = vadd.s32 6, %v7243_v37 }
 0x3bd   : > { %3528 = vst [vmem:[#allocation2 + $0x38] sm:$0x1] %v3527_v8  ;;  %v3375_v22 = vshrl.u32 %v3276_v30, 16  ;;  %v3692_v20 = vshrl.u32 %v3576_v60, 16  ;;  %v3695_v45 = vshll.u32 %v3576_v60, 16  ;;  %v3378_v56 = vshll.u32 %v3276_v30, 16 }
 0x3be   : > { %5293 = vmatmul.msk.bf16.gmra.mxu1 %vm455_vm1, %v7573_v23  ;;  %v3144_v46 = vadd.f32 %v7250_v14, %v3120_v51  ;;  %v3690_v10 = vsel %vm5640_vm4, %v3685_v63, %v3689_v33  ;;  %v3795_v7 = vunpack.c.l.b16 %v3680_v58  ;;  %v2925_v0 = vadd.f32 %v7501_v41, %v2835_v15  ;;  %v7606_v30 = vpop.f32.mrf.mxu2 }
 0x3bf   : > { %v3377_v2 = vrot.slane %v3375_v22, 7  ;;  %v3796_v1 = vunpack.c.l.b16 %v3690_v10  ;;  %v3694_v35 = vrot.slane %v3692_v20, 4  ;;  %v3697_v44 = vrot.slane %v3695_v45, 5  ;;  %v7608_v33 = vpop.f32.mrf.mxu0 }
 0x3c0   : > { %v2836_v13 = vadd.f32 %v7523_v39, %v7144_v42  ;;  %v3164_v21 = vmax.f32 %v3144_v46, 0.0  ;;  %v7590_v50 = vadd.f32 %v7022_v25, %v2428_v28  ;;  %v3031_v58 = vadd.f32 %v7525_v9, %v2925_v0  ;;  %v3533_v0 = vld [vmem:[#allocation2 + $0x44] sm:$0x1] }
 0x3c1   : > { %v3380_v24 = vor.u32 %v3378_v56, %v3377_v2  ;;  %v7592_v54 = vpack.c.b16 %v3796_v1, %v3795_v7  ;;  %vm3190_vm2 = vcmp.ge.s32.totalorder %v3180_v4, 0  ;;  %vm3200_vm3 = vcmp.lt.s32.totalorder %v3180_v4, 16 }
 0x3c2   : > { %v3225_v17 = vsel %vm7552_vm15, %v3164_v21, 0.0  ;;  %v5254_v9 = vrot.slane %v3576_v60, 9  ;;  %v3698_v28 = vor.u32 %v3697_v44, %v3694_v35  ;;  %v2926_v6 = vadd.f32 %v7542_v52, %v2836_v13  ;;  %vm7617_vm5 = vmand %vm3190_vm2, %vm3200_vm3 }
 0x3c3   : > { %v3530_v41 = vsel %vm7304_vm14, %v3380_v24, %v3529_v31  ;;  %v3277_v8 = vpack.c.bf16 %v3225_v17, %v3225_v17  ;;  %5205 = vmatmul.msk.bf16.gmra.mxu2 %vm455_vm1, %v7592_v54  ;;  %5283 = vmatmul.msk.bf16.gmra.mxu0 %vm455_vm1, %v7592_v54  ;;  %v3089_v25 = vpop.f32.mrf.mxu1  ;;  %v7603_v42 = vld [vmem:[#allocation2 + $0x30] sm:$0xff]  ;;  %v3381_v22 = vrot.slane %v3377_v2, 4  ;;  %v2430_v4 = vadd.f32 %v7134_v55, %v7053_v18 }
 0x3c4   : > { %v3577_v39 = vld [vmem:[#allocation2 + $0x34] sm:$0xf]  ;;  %3531 = vst [vmem:[#allocation2 + $0x3c] sm:$0xf] %v3530_v41  ;;  %v3121_v57 = vadd.f32 %v3089_v25, %v3031_v58  ;;  %v3578_v15 = vld [vmem:[#allocation2 + $0x38] sm:$0x1]  ;;  %5246 = vmatmul.msk.bf16.gmra.mxu3 %vm455_vm1, %v7603_v42  ;;  %v2900_v58 = vpop.f32.mrf.mxu3  ;;  %v2837_v18 = vadd.f32 %v7560_v59, %v7149_v34 }
 0x3c5   : > { %v4043_v51 = vrot.slane %v3577_v39, 5  ;;  %v3701_v63 = vshll.u32 %v3577_v39, 16  ;;  %v3383_v20 = vshrl.u32 %v3277_v8, 16  ;;  %v4046_v45 = vrot.slane %v3578_v15, 5 }
 0x3c6   : > { %v3705_v56 = vshrl.u32 %v3577_v39, 16  ;;  %v3145_v60 = vadd.f32 %v7250_v14, %v3121_v57  ;;  %v3386_v1 = vshll.u32 %v3277_v8, 16  ;;  %v3699_v2 = vrot.slane %v3698_v28, 4 }
 0x3c7   : > { %v4044_v52 = vsel %vm5846_vm7, %v5254_v9, %v4043_v51  ;;  %v4045_v46 = vrot.slane %v4043_v51, 4  ;;  %v3703_v10 = vrot.slane %v3701_v63, 5  ;;  %v3385_v7 = vrot.slane %v3383_v20, 7 }
 0x3c8   : > { %v3707_v44 = vrot.slane %v3705_v56, 4  ;;  %v3165_v13 = vmax.f32 %v3145_v60, 0.0  ;;  %v4079_v21 = vunpack.c.l.b16 %v4044_v52  ;;  %v3711_v24 = vshll.u32 %v3578_v15, 16 }
 0x3c9   : > { %v4047_v31 = vsel %vm5846_vm7, %v4045_v46, %v4046_v45  ;;  %v3388_v17 = vor.u32 %v3386_v1, %v3385_v7  ;;  %v3390_v41 = vrot.slane %v3385_v7, 4  ;;  %v3032_v39 = vadd.f32 %v7567_v48, %v2926_v6  ;;  %v7642_v46 = vpop.f32.mrf.mxu2  ;;  %v3006_v1 = vpop.f32.mrf.mxu0 }
 0x3ca   : > { %v4080_v25 = vunpack.c.l.b16 %v4047_v31  ;;  %v3708_v8 = vor.u32 %v3707_v44, %v3703_v10  ;;  %v3226_v9 = vsel %vm7617_vm5, %v3165_v13, 0.0  ;;  %v3704_v28 = vsel %vm5640_vm4, %v3699_v2, %v3703_v10 }
 0x3cb   : > { %v3389_v57 = vsel %vm7321_vm6, %v3381_v22, %v3388_v17  ;;  %v3534_v15 = vsel %vm7334_vm11, %v3390_v41, %v3533_v0  ;;  %v3278_v51 = vpack.c.bf16 %v3226_v9, %v3226_v9  ;;  %v3091_v63 = vpop.f32.mrf.mxu1  ;;  %v3579_v45 = vld [vmem:[#allocation2 + $0x3c] sm:$0xf]  ;;  %v3713_v6 = vrot.slane %v3711_v24, 5  ;;  %v3536_v24 = vld [vmem:[#allocation2 + $0x48] sm:$0xf] }
 0x3cc   : > { %v7634_v20 = vpack.c.b16 %v4080_v25, %v4079_v21  ;;  %3532 = vst.msk [vmem:[#allocation2 + $0x40] sm:$0xf] %vm3234_vm8, %v3389_v57  ;;  %v3122_v55 = vadd.f32 %v3091_v63, %v3032_v39  ;;  %v3709_v48 = vrot.slane %v3708_v8, 4  ;;  %v3181_v22 = vadd.s32 7, %v7243_v37 }
 0x3cd   : > { %3535 = vst [vmem:[#allocation2 + $0x44] sm:$0x1] %v3534_v15  ;;  %v3392_v56 = vshrl.u32 %v3278_v51, 16  ;;  %v3716_v60 = vshrl.u32 %v3579_v45, 16  ;;  %v3719_v52 = vshll.u32 %v3579_v45, 16  ;;  %v3395_v10 = vshll.u32 %v3278_v51, 16 }
 0x3ce   : > { %5294 = vmatmul.msk.bf16.gmra.mxu1 %vm455_vm1, %v7634_v20  ;;  %v3146_v7 = vadd.f32 %v7250_v14, %v3122_v55  ;;  %v3714_v34 = vsel %vm5640_vm4, %v3709_v48, %v3713_v6  ;;  %v3797_v59 = vunpack.c.l.b16 %v3704_v28  ;;  %v2927_v31 = vadd.f32 %v7584_v19, %v2837_v18  ;;  %v7679_v6 = vld [vmem:[%s8181_s4] ss:$0 sm:$0xff] }
 0x3cf   : > { %v7647_v2 = vrot.slane %v3392_v56, 7  ;;  %v3798_v44 = vunpack.c.l.b16 %v3714_v34  ;;  %v3718_v0 = vrot.slane %v3716_v60, 4  ;;  %v3721_v13 = vrot.slane %v3719_v52, 5 }
 0x3d0   : > { %v2838_v21 = vadd.f32 %v7606_v30, %v7154_v62  ;;  %v3166_v17 = vmax.f32 %v3146_v7, 0.0  ;;  %v7653_v41 = vadd.f32 %v7141_v61, %v2430_v4  ;;  %v2610_v14 = vadd.f32 %v7067_v27, %v7590_v50  ;;  %v7663_v62 = vpop.f32.mrf.mxu3 }
 0x3d1   : > { %v3397_v25 = vor.u32 %v3395_v10, %v7647_v2  ;;  %v7658_v8 = vpack.c.b16 %v3798_v44, %v3797_v59  ;;  %v3033_v39 = vadd.f32 %v7608_v33, %v2927_v31  ;;  %vm3191_vm10 = vcmp.ge.s32.totalorder %v3181_v22, 0  ;;  %v3540_v44 = vld [vmem:[#allocation2 + $0x50] sm:$0x1] }
 0x3d2   : > { %v3227_v19 = vsel %vm7617_vm5, %v3166_v17, 0.0  ;;  %vm3201_vm9 = vcmp.lt.s32.totalorder %v3181_v22, 16  ;;  %v5255_v35 = vrot.slane %v3579_v45, 9  ;;  %v3722_v4 = vor.u32 %v3721_v13, %v3718_v0 }
 0x3d3   : > { %v3537_v61 = vsel %vm7304_vm14, %v3397_v25, %v3536_v24  ;;  %v3279_v30 = vpack.c.bf16 %v3227_v19, %v3227_v19  ;;  %5206 = vmatmul.msk.bf16.gmra.mxu2 %vm455_vm1, %v7658_v8  ;;  %5284 = vmatmul.msk.bf16.gmra.mxu0 %vm455_vm1, %v7658_v8  ;;  %v3094_v27 = vpop.f32.mrf.mxu1  ;;  %v7671_v50 = vld [vmem:[#allocation2 + $0x3c] sm:$0xff]  ;;  %v2928_v9 = vadd.f32 %v2900_v58, %v2838_v21  ;;  %v3398_v63 = vrot.slane %v7647_v2, 4  ;;  %vm7686_vm12 = vmand %vm3191_vm10, %vm3201_vm9  ;;  %v2815_v2 = vpop.f32.mrf.mxu2 }
 0x3d4   : > { %v3580_v33 = vld [vmem:[#allocation2 + $0x40] sm:$0xf]  ;;  %3538 = vst [vmem:[#allocation2 + $0x48] sm:$0xf] %v3537_v61  ;;  %v3123_v28 = vadd.f32 %v3094_v27, %v3033_v39  ;;  %v3581_v57 = vld [vmem:[#allocation2 + $0x44] sm:$0x1]  ;;  %5247 = vmatmul.msk.bf16.gmra.mxu3 %vm455_vm1, %v7671_v50  ;;  %v3009_v24 = vpop.f32.mrf.mxu0  ;;  %v2839_v22 = vadd.f32 %v7642_v46, %v7163_v36  ;;  %v2702_v36 = vadd.f32 %v7169_v38, %v2610_v14 }
 0x3d5   : > { %v4050_v15 = vrot.slane %v3580_v33, 5  ;;  %v3725_v51 = vshll.u32 %v3580_v33, 16  ;;  %v3400_v18 = vshrl.u32 %v3279_v30, 16  ;;  %v4053_v55 = vrot.slane %v3581_v57, 5 }
 0x3d6   : > { %v3729_v48 = vshrl.u32 %v3580_v33, 16  ;;  %v3147_v58 = vadd.f32 %v7679_v6, %v3123_v28  ;;  %v3403_v10 = vshll.u32 %v3279_v30, 16  ;;  %v3723_v34 = vrot.slane %v3722_v4, 4 }
 0x3d7   : > { %v4051_v45 = vsel %vm5846_vm7, %v5255_v35, %v4050_v15  ;;  %v4052_v56 = vrot.slane %v4050_v15, 4  ;;  %v3727_v60 = vrot.slane %v3725_v51, 5  ;;  %v3402_v52 = vrot.slane %v3400_v18, 7 }
 0x3d8   : > { %v3731_v59 = vrot.slane %v3729_v48, 4  ;;  %v3167_v0 = vmax.f32 %v3147_v58, 0.0  ;;  %v4081_v31 = vunpack.c.l.b16 %v4051_v45  ;;  %v3735_v21 = vshll.u32 %v3581_v57, 16  ;;  %v2905_v51 = vpop.f32.mrf.mxu3 }
 0x3d9   : > { %v4054_v13 = vsel %vm5846_vm7, %v4052_v56, %v4053_v55  ;;  %v3405_v17 = vor.u32 %v3403_v10, %v3402_v52  ;;  %v3407_v25 = vrot.slane %v3402_v52, 4  ;;  %v3034_v61 = vadd.f32 %v3006_v1, %v2928_v9 }
 0x3da   : > { %v4082_v39 = vunpack.c.l.b16 %v4054_v13  ;;  %v3732_v19 = vor.u32 %v3731_v59, %v3727_v60  ;;  %v3228_v30 = vsel %vm7686_vm12, %v3167_v0, 0.0  ;;  %v3728_v27 = vsel %vm5640_vm4, %v3723_v34, %v3727_v60 }
 0x3db   : > { %v3406_v33 = vsel %vm7321_vm6, %v3398_v63, %v3405_v17  ;;  %v3541_v35 = vsel %vm7334_vm11, %v3407_v25, %v3540_v44  ;;  %v3280_v4 = vpack.c.bf16 %v3228_v30, %v3228_v30  ;;  %v3096_v28 = vpop.f32.mrf.mxu1  ;;  %v3582_v15 = vld [vmem:[#allocation2 + $0x48] sm:$0xf]  ;;  %v3737_v9 = vrot.slane %v3735_v21, 5  ;;  %v3543_v44 = vld [vmem:[#allocation2 + $0x54] sm:$0xf]  ;;  %v2818_v17 = vpop.f32.mrf.mxu2 }
 0x3dc   : > { %v7702_v57 = vpack.c.b16 %v4082_v39, %v4081_v31  ;;  %3539 = vst.msk [vmem:[#allocation2 + $0x4c] sm:$0xf] %vm3234_vm8, %v3406_v33  ;;  %v3124_v46 = vadd.f32 %v3096_v28, %v3034_v61  ;;  %v3733_v1 = vrot.slane %v3732_v19, 4  ;;  %v3182_v63 = vadd.s32 8, %v7243_v37  ;;  %v3011_v19 = vpop.f32.mrf.mxu0 }
 0x3dd   : > { %3542 = vst [vmem:[#allocation2 + $0x50] sm:$0x1] %v3541_v35  ;;  %v3409_v18 = vshrl.u32 %v3280_v4, 16  ;;  %v3740_v55 = vshrl.u32 %v3582_v15, 16  ;;  %v3743_v48 = vshll.u32 %v3582_v15, 16  ;;  %v3412_v58 = vshll.u32 %v3280_v4, 16 }
 0x3de   : > { %5295 = vmatmul.msk.bf16.gmra.mxu1 %vm455_vm1, %v7702_v57  ;;  %v3148_v45 = vadd.f32 %v7679_v6, %v3124_v46  ;;  %v3738_v38 = vsel %vm5640_vm4, %v3733_v1, %v3737_v9  ;;  %v3799_v14 = vunpack.c.l.b16 %v3728_v27  ;;  %v2929_v34 = vadd.f32 %v7663_v62, %v2839_v22 }
 0x3df   : > { %v3411_v56 = vrot.slane %v3409_v18, 7  ;;  %v3800_v60 = vunpack.c.l.b16 %v3738_v38  ;;  %v3742_v52 = vrot.slane %v3740_v55, 4  ;;  %v3745_v10 = vrot.slane %v3743_v48, 5 }
 0x3e0   : > { %v2840_v59 = vadd.f32 %v2815_v2, %v2702_v36  ;;  %v3168_v0 = vmax.f32 %v3148_v45, 0.0  ;;  %v2612_v13 = vadd.f32 %v7146_v11, %v7653_v41  ;;  %v3035_v25 = vadd.f32 %v3009_v24, %v2929_v34 }
 0x3e1   : > { %v3414_v31 = vor.u32 %v3412_v58, %v3411_v56  ;;  %v7715_v21 = vpack.c.b16 %v3800_v60, %v3799_v14  ;;  %vm3192_vm13 = vcmp.ge.s32.totalorder %v3182_v63, 0  ;;  %vm3202_vm15 = vcmp.lt.s32.totalorder %v3182_v63, 16  ;;  %v3547_v14 = vld [vmem:[#allocation2 + $0x5c] sm:$0x1] }
 0x3e2   : > { %v3229_v39 = vsel %vm7686_vm12, %v3168_v0, 0.0  ;;  %v5256_v22 = vrot.slane %v3582_v15, 9  ;;  %v3746_v7 = vor.u32 %v3745_v10, %v3742_v52  ;;  %v2930_v61 = vadd.f32 %v2905_v51, %v2840_v59  ;;  %v2908_v51 = vpop.f32.mrf.mxu3  ;;  %vm7734_vm2 = vmand %vm3192_vm13, %vm3202_vm15 }
 0x3e3   : > { %v3544_v62 = vsel %vm7304_vm14, %v3414_v31, %v3543_v44  ;;  %v3281_v2 = vpack.c.bf16 %v3229_v39, %v3229_v39  ;;  %5207 = vmatmul.msk.bf16.gmra.mxu2 %vm455_vm1, %v7715_v21  ;;  %5285 = vmatmul.msk.bf16.gmra.mxu0 %vm455_vm1, %v7715_v21  ;;  %v3099_v11 = vpop.f32.mrf.mxu1  ;;  %v7725_v41 = vld [vmem:[#allocation2 + $0x48] sm:$0xff]  ;;  %v3415_v4 = vrot.slane %v3411_v56, 4  ;;  %v2841_v31 = vadd.f32 %v2818_v17, %v7196_v26 }
 0x3e4   : > { %v3583_v24 = vld [vmem:[#allocation2 + $0x4c] sm:$0xf]  ;;  %3545 = vst [vmem:[#allocation2 + $0x54] sm:$0xf] %v3544_v62  ;;  %v3125_v30 = vadd.f32 %v3099_v11, %v3035_v25  ;;  %v3584_v27 = vld [vmem:[#allocation2 + $0x50] sm:$0x1]  ;;  %5248 = vmatmul.msk.bf16.gmra.mxu3 %vm455_vm1, %v7725_v41  ;;  %v3036_v63 = vadd.f32 %v3011_v19, %v2930_v61  ;;  %v2704_v26 = vadd.f32 %v7220_v3, %v2612_v13 }
 0x3e5   : > { %v4057_v33 = vrot.slane %v3583_v24, 5  ;;  %v3749_v35 = vshll.u32 %v3583_v24, 16  ;;  %v3417_v28 = vshrl.u32 %v3281_v2, 16  ;;  %v4060_v36 = vrot.slane %v3584_v27, 5 }
 0x3e6   : > { %v3753_v46 = vshrl.u32 %v3583_v24, 16  ;;  %v3149_v1 = vadd.f32 %v7679_v6, %v3125_v30  ;;  %v3420_v48 = vshll.u32 %v3281_v2, 16  ;;  %v3747_v45 = vrot.slane %v3746_v7, 4  ;;  %v2820_v30 = vpop.f32.mrf.mxu2 }
 0x3e7   : > { %v4058_v9 = vsel %vm5846_vm7, %v5256_v22, %v4057_v33  ;;  %v4059_v15 = vrot.slane %v4057_v33, 4  ;;  %v3751_v18 = vrot.slane %v3749_v35, 5  ;;  %v3419_v55 = vrot.slane %v3417_v28, 7 }
 0x3e8   : > { %v3755_v38 = vrot.slane %v3753_v46, 4  ;;  %v3169_v56 = vmax.f32 %v3149_v1, 0.0  ;;  %v4083_v52 = vunpack.c.l.b16 %v4058_v9  ;;  %v3759_v10 = vshll.u32 %v3584_v27, 16  ;;  %v3014_v27 = vpop.f32.mrf.mxu0 }
 0x3e9   : > { %v4061_v60 = vsel %vm5846_vm7, %v4059_v15, %v4060_v36  ;;  %v3422_v34 = vor.u32 %v3420_v48, %v3419_v55  ;;  %v3424_v59 = vrot.slane %v3419_v55, 4  ;;  %v3752_v39 = vsel %vm5640_vm4, %v3747_v45, %v3751_v18  ;;  %v3550_v45 = vld [vmem:[#allocation2 + $0x60] sm:$0xf] }
 0x3ea   : > { %v4084_v44 = vunpack.c.l.b16 %v4061_v60  ;;  %v3756_v0 = vor.u32 %v3755_v38, %v3751_v18  ;;  %v3230_v25 = vsel %vm7734_vm2, %v3169_v56, 0.0  ;;  %v3761_v61 = vrot.slane %v3759_v10, 5 }
 0x3eb   : > { %v3423_v62 = vsel %vm7321_vm6, %v3415_v4, %v3422_v34  ;;  %v3548_v2 = vsel %vm7334_vm11, %v3424_v59, %v3547_v14  ;;  %v3282_v11 = vpack.c.bf16 %v3230_v25, %v3230_v25  ;;  %v3101_v24 = vpop.f32.mrf.mxu1  ;;  %v3585_v7 = vld [vmem:[#allocation2 + $0x54] sm:$0xf]  ;;  %v3183_v35 = vadd.s32 9, %v7243_v37  ;;  %v2910_v14 = vpop.f32.mrf.mxu3 }
 0x3ec   : > { %v7749_v22 = vpack.c.b16 %v4084_v44, %v4083_v52  ;;  %3546 = vst.msk [vmem:[#allocation2 + $0x58] sm:$0xf] %vm3234_vm8, %v3423_v62  ;;  %v3126_v17 = vadd.f32 %v3101_v24, %v3036_v63  ;;  %v3757_v19 = vrot.slane %v3756_v0, 4  ;;  %v3764_v4 = vshrl.u32 %v3585_v7, 16 }
 0x3ed   : > { %3549 = vst [vmem:[#allocation2 + $0x5c] sm:$0x1] %v3548_v2  ;;  %v3426_v33 = vshrl.u32 %v3282_v11, 16  ;;  %v3767_v28 = vshll.u32 %v3585_v7, 16  ;;  %v3429_v36 = vshll.u32 %v3282_v11, 16  ;;  %v3801_v13 = vunpack.c.l.b16 %v3752_v39 }
 0x3ee   : > { %5296 = vmatmul.msk.bf16.gmra.mxu1 %vm455_vm1, %v7749_v22  ;;  %v3150_v46 = vadd.f32 %v7679_v6, %v3126_v17  ;;  %v3762_v3 = vsel %vm5640_vm4, %v3757_v19, %v3761_v61  ;;  %v3766_v15 = vrot.slane %v3764_v4, 4  ;;  %v2931_v55 = vadd.f32 %v2908_v51, %v2841_v31  ;;  %v5299_v19 = vld [vmem:[%s8182_s5 + $0xc] sm:$0x3] }
 0x3ef   : > { %v7759_v1 = vrot.slane %v3426_v33, 7  ;;  %v3802_v9 = vunpack.c.l.b16 %v3762_v3  ;;  %v3769_v18 = vrot.slane %v3767_v28, 5  ;;  %v2842_v48 = vadd.f32 %v2820_v30, %v2704_v26 }
 0x3f0   : > { %v3170_v38 = vmax.f32 %v3150_v46, 0.0  ;;  %v3037_v52 = vadd.f32 %v3014_v27, %v2931_v55  ;;  %vm3193_vm3 = vcmp.ge.s32.totalorder %v3183_v35, 0  ;;  %vm3203_vm5 = vcmp.lt.s32.totalorder %v3183_v35, 16  ;;  %v3016_v33 = vpop.f32.mrf.mxu0 }
 0x3f1   : > { %v3431_v37 = vor.u32 %v3429_v36, %v7759_v1  ;;  %v7762_v56 = vpack.c.b16 %v3802_v9, %v3801_v13  ;;  %v3770_v60 = vor.u32 %v3769_v18, %v3766_v15  ;;  %v3432_v34 = vrot.slane %v7759_v1, 4  ;;  %vm7785_vm10 = vmand %vm3193_vm3, %vm3203_vm5  ;;  %v5312_v13 = vld [vmem:[%s8182_s5 + $0xe] sm:$0x3]  ;;  %v3554_v1 = vld [vmem:[#allocation2 + $0x68] sm:$0x1] }
 0x3f2   : > { %v3231_v10 = vsel %vm7734_vm2, %v3170_v38, 0.0  ;;  %v5257_v58 = vrot.slane %v3585_v7, 9  ;;  %v2932_v63 = vadd.f32 %v2910_v14, %v2842_v48  ;;  %v4460_v55 = vsel %vm486_vm0, %v5299_v19, 0  ;;  %v5464_v36 = vld [vmem:[#allocation2 + $0xc] sm:$0xff] }
 0x3f3   : > { %v3551_v51 = vsel %vm7304_vm14, %v3431_v37, %v3550_v45  ;;  %v3283_v59 = vpack.c.bf16 %v3231_v10, %v3231_v10  ;;  %5208 = vmatmul.msk.bf16.gmra.mxu2 %vm455_vm1, %v7762_v56  ;;  %5286 = vmatmul.msk.bf16.gmra.mxu0 %vm455_vm1, %v7762_v56  ;;  %v3104_v44 = vpop.f32.mrf.mxu1  ;;  %v7773_v0 = vld [vmem:[#allocation2 + $0x54] sm:$0xff]  ;;  %v3771_v26 = vrot.slane %v3770_v60, 4  ;;  %v5322_v10 = vld [vmem:[%s8182_s5 + $0x10] sm:$0x3] }
 0x3f4   : > { %v3586_v31 = vld [vmem:[#allocation2 + $0x58] sm:$0xf]  ;;  %3552 = vst [vmem:[#allocation2 + $0x60] sm:$0xf] %v3551_v51  ;;  %v3127_v25 = vadd.f32 %v3104_v44, %v3037_v52  ;;  %v3587_v39 = vld [vmem:[#allocation2 + $0x5c] sm:$0x1]  ;;  %5249 = vmatmul.msk.bf16.gmra.mxu3 %vm455_vm1, %v7773_v0  ;;  %4469 = vmatpush.bf16.msra.mxu2 %v4460_v55  ;;  %v3038_v14 = vadd.f32 %v3016_v33, %v2932_v63 }
 0x3f5   : > { %v4064_v62 = vrot.slane %v3586_v31, 5  ;;  %v3773_v2 = vshll.u32 %v3586_v31, 16  ;;  %v3434_v11 = vshrl.u32 %v3283_v59, 16  ;;  %v4067_v24 = vrot.slane %v3587_v39, 5 }
 0x3f6   : > { %v3777_v17 = vshrl.u32 %v3586_v31, 16  ;;  %v3151_v61 = vadd.f32 %v7679_v6, %v3127_v25  ;;  %v3437_v28 = vshll.u32 %v3283_v59, 16  ;;  %v3783_v18 = vshll.u32 %v3587_v39, 16 }
 0x3f7   : > { %v4065_v7 = vsel %vm5846_vm7, %v5257_v58, %v4064_v62  ;;  %v4066_v30 = vrot.slane %v4064_v62, 4  ;;  %v3775_v27 = vrot.slane %v3773_v2, 5  ;;  %v3436_v4 = vrot.slane %v3434_v11, 7 }
 0x3f8   : > { %v4085_v46 = vunpack.c.l.b16 %v4065_v7  ;;  %v3779_v3 = vrot.slane %v3777_v17, 4  ;;  %v3171_v9 = vmax.f32 %v3151_v61, 0.0  ;;  %v4560_v52 = vsel %vm486_vm0, %v5312_v13, 0 }
 0x3f9   : > { %v4068_v15 = vsel %vm5846_vm7, %v4066_v30, %v4067_v24  ;;  %v3439_v48 = vor.u32 %v3437_v28, %v3436_v4  ;;  %v3441_v35 = vrot.slane %v3436_v4, 4  ;;  %v3776_v60 = vsel %vm5640_vm4, %v3771_v26, %v3775_v27  ;;  %4569 = vmatpush.bf16.msra.mxu3 %v4560_v52 }
 0x3fa   : > { %v4086_v45 = vunpack.c.l.b16 %v4068_v15  ;;  %v3780_v38 = vor.u32 %v3779_v3, %v3775_v27  ;;  %v3232_v37 = vsel %vm7785_vm10, %v3171_v9, 0.0  ;;  %v3785_v62 = vrot.slane %v3783_v18, 5  ;;  %v3557_v27 = vld [vmem:[#allocation2 + $0x6c] sm:$0xf] }
 0x3fb   : > { %v3440_v51 = vsel %vm7321_vm6, %v3432_v34, %v3439_v48  ;;  %v3555_v59 = vsel %vm7334_vm11, %v3441_v35, %v3554_v1  ;;  %v3284_v44 = vpack.c.bf16 %v3232_v37, %v3232_v37  ;;  %v3106_v31 = vpop.f32.mrf.mxu1  ;;  %v3588_v63 = vld [vmem:[#allocation2 + $0x60] sm:$0xf]  ;;  %v4644_v24 = vsel %vm486_vm0, %v5322_v10, 0 }
 0x3fc   : > { %v7807_v58 = vpack.c.b16 %v4086_v45, %v4085_v46  ;;  %3553 = vst.msk [vmem:[#allocation2 + $0x64] sm:$0xf] %vm3234_vm8, %v3440_v51  ;;  %v3128_v25 = vadd.f32 %v3106_v31, %v3038_v14  ;;  %v3781_v39 = vrot.slane %v3780_v38, 4  ;;  %v4266_v2 = vshrl.u32 %v3588_v63, 16  ;;  %4653 = vmatpush.bf16.msra.mxu0 %v4644_v24  ;;  %v3561_v31 = vld [vmem:[#allocation2 + $0x74] sm:$0x1] }
 0x3fd   : > { %3556 = vst [vmem:[#allocation2 + $0x68] sm:$0x1] %v3555_v59  ;;  %v3443_v11 = vshrl.u32 %v3284_v44, 16  ;;  %v4269_v34 = vshll.u32 %v3588_v63, 16  ;;  %v3446_v61 = vshll.u32 %v3284_v44, 16  ;;  %v3803_v7 = vunpack.c.l.b16 %v3776_v60 }
 0x3fe   : > { %5297 = vmatmul.msk.bf16.gmra.mxu1 %vm455_vm1, %v7807_v58  ;;  %v3152_v26 = vadd.f32 %v7679_v6, %v3128_v25  ;;  %v3786_v17 = vsel %vm5640_vm4, %v3781_v39, %v3785_v62  ;;  %v4268_v4 = vrot.slane %v4266_v2, 4  ;;  %v5289_v15 = vrot.slane %v3588_v63, 9 }
 0x3ff   : > { %v3445_v19 = vrot.slane %v3443_v11, 7  ;;  %v3804_v30 = vunpack.c.l.b16 %v3786_v17  ;;  %v4271_v28 = vrot.slane %v4269_v34, 5 }
 0x400   : > { %v3172_v33 = vmax.f32 %v3152_v26, 0.0 }
 0x401   : > { %v3448_v46 = vor.u32 %v3446_v61, %v3445_v19  ;;  %v7816_v3 = vpack.c.b16 %v3804_v30, %v3803_v7  ;;  %v4272_v48 = vor.u32 %v4271_v28, %v4268_v4  ;;  %v3449_v44 = vrot.slane %v3445_v19, 4 }
 0x402   : > { %v3233_v13 = vsel %vm7785_vm10, %v3172_v33, 0.0 }
 0x403   : > { %v3558_v6 = vsel %vm7304_vm14, %v3448_v46, %v3557_v27  ;;  %v3285_v1 = vpack.c.bf16 %v3233_v13, %v3233_v13  ;;  %5209 = vmatmul.msk.bf16.gmra.mxu2 %vm455_vm1, %v7816_v3  ;;  %5287 = vmatmul.msk.bf16.gmra.mxu0 %vm455_vm1, %v7816_v3  ;;  %v3589_v9 = vld [vmem:[#allocation2 + $0x64] sm:$0xf]  ;;  %v4273_v62 = vrot.slane %v4272_v48, 4 }
 0x404   : > { %3559 = vst [vmem:[#allocation2 + $0x6c] sm:$0xf] %v3558_v6  ;;  %v3590_v18 = vld [vmem:[#allocation2 + $0x68] sm:$0x1]  ;;  %v4368_v55 = vrot.slane %v3589_v9, 5  ;;  %v4275_v35 = vshll.u32 %v3589_v9, 16  ;;  %5272 = vmatmul.msk.bf16.vlgmr.msrb.gmra.mxu3 %vm455_vm1, %v5464_v36 }
 0x405   : > { %v3451_v45 = vshrl.u32 %v3285_v1, 16  ;;  %v4371_v49 = vrot.slane %v3590_v18, 5  ;;  %v4279_v38 = vshrl.u32 %v3589_v9, 16  ;;  %v4285_v52 = vshll.u32 %v3590_v18, 16  ;;  %v7862_v36 = vld [vmem:[#allocation2 + $0x18] sm:$0xff] }
 0x406   : > { %v4369_v14 = vsel %vm5846_vm7, %v5289_v15, %v4368_v55  ;;  %v4370_v37 = vrot.slane %v4368_v55, 4  ;;  %v4277_v60 = vrot.slane %v4275_v35, 5  ;;  %v3454_v51 = vshll.u32 %v3285_v1, 16 }
 0x407   : > { %v3453_v10 = vrot.slane %v3451_v45, 7  ;;  %v4281_v59 = vrot.slane %v4279_v38, 4  ;;  %v3965_v63 = vpop.f32.mrf.mxu3  ;;  %v4375_v39 = vunpack.c.l.b16 %v4369_v14  ;;  %v4287_v17 = vrot.slane %v4285_v52, 5 }
 0x408   : > { %v4372_v25 = vsel %vm5846_vm7, %v4370_v37, %v4371_v49  ;;  %v4278_v26 = vsel %vm5640_vm4, %v4273_v62, %v4277_v60 }
 0x409   : > { %v3456_v2 = vor.u32 %v3454_v51, %v3453_v10  ;;  %v3458_v11 = vrot.slane %v3453_v10, 4  ;;  %v4376_v34 = vunpack.c.l.b16 %v4372_v25  ;;  %v4282_v24 = vor.u32 %v4281_v59, %v4277_v60 }
 0x40a   : > { %v4291_v40 = vunpack.c.l.b16 %v4278_v26 }
 0x40b   : > { %v3457_v61 = vsel %vm7321_vm6, %v3449_v44, %v3456_v2  ;;  %v3562_v19 = vsel %vm7334_vm11, %v3458_v11, %v3561_v31  ;;  %v7837_v7 = vpack.c.b16 %v4376_v34, %v4375_v39  ;;  %v4283_v30 = vrot.slane %v4282_v24, 4  ;;  %v7839_v27 = vld [vmem:[#allocation2 + $0x6c] sm:$0xf] }
 0x40c   : > { %3560 = vst.msk [vmem:[#allocation2 + $0x70] sm:$0xf] %vm3234_vm8, %v3457_v61  ;;  %v4528_v33 = vshrl.u32 %v7839_v27, 16  ;;  %v4531_v4 = vshll.u32 %v7839_v27, 16 }
 0x40d   : > { %3563 = vst [vmem:[#allocation2 + $0x74] sm:$0x1] %v3562_v19  ;;  %v4288_v47 = vsel %vm5640_vm4, %v4283_v30, %v4287_v17 }
 0x40e   : > { %5298 = vmatmul.msk.bf16.gmra.mxu1 %vm455_vm1, %v7837_v7  ;;  %v4292_v28 = vunpack.c.l.b16 %v4288_v47  ;;  %v4530_v46 = vrot.slane %v4528_v33, 4  ;;  %v4533_v13 = vrot.slane %v4531_v4, 5 }
 0x40f   : > { %v3967_v6 = vpop.f32.mrf.mxu3 }
 0x410   : > { %v7848_v1 = vpack.c.b16 %v4292_v28, %v4291_v40  ;;  %v4534_v9 = vor.u32 %v4533_v13, %v4530_v46 }
 0x413   : > { %5259 = vmatmul.msk.bf16.vlgmr.msrb.gmra.mxu2 %vm455_vm1, %v7413_v16  ;;  %5288 = vmatmul.msk.bf16.gmra.mxu0 %vm455_vm1, %v7848_v1  ;;  %v7854_v15 = vld [vmem:[#allocation2 + $0x70] sm:$0xf]  ;;  %v4535_v16 = vrot.slane %v4534_v9, 4 }
 0x414   : > { %v7856_v55 = vld [vmem:[#allocation2 + $0x74] sm:$0x1]  ;;  %v4537_v48 = vshll.u32 %v7854_v15, 16  ;;  %v4541_v35 = vshrl.u32 %v7854_v15, 16  ;;  %5273 = vmatmul.msk.bf16.gmra.mxu3 %vm455_vm1, %v7862_v36 }
 0x415   : > { %v3849_v18 = vpop.f32.mrf.mxu2  ;;  %v4547_v14 = vshll.u32 %v7856_v55, 16 }
 0x416   : > { %v7860_v45 = vadd.f32 %v3965_v63, %v3849_v18  ;;  %v4539_v49 = vrot.slane %v4537_v48, 5  ;;  %v4543_v38 = vrot.slane %v4541_v35, 4 }
 0x417   : > { %v3970_v37 = vpop.f32.mrf.mxu3  ;;  %v4549_v51 = vrot.slane %v4547_v14, 5 }
 0x418   : > { %v4540_v60 = vsel %vm5640_vm4, %v4535_v16, %v4539_v49  ;;  %v4544_v52 = vor.u32 %v4543_v38, %v4539_v49 }
 0x419   : > { %v7873_v63 = vunpack.c.l.b16 %v4540_v60 }
 0x41a   : > { %v4545_v10 = vrot.slane %v4544_v52, 4 }
 0x41c   : > { %v4550_v44 = vsel %vm5640_vm4, %v4545_v10, %v4549_v51 }
 0x41d   : > { %v3851_v59 = vpop.f32.mrf.mxu2  ;;  %v7875_v25 = vunpack.c.l.b16 %v4550_v44 }
 0x41e   : > { %v7871_v31 = vadd.f32 %v3967_v6, %v3851_v59 }
 0x41f   : > { %v4555_v39 = vpack.c.b16 %v7875_v25, %v7873_v63  ;;  %v3972_v62 = vpop.f32.mrf.mxu3  ;;  %v5368_v63 = vld [vmem:[#allocation2 + $0x6c] sm:$0xff] }
 0x420   : > { %v7907_v47 = vpop.f32.mrf.mxu0 }
 0x423   : > { %5260 = vmatmul.msk.bf16.gmra.mxu2 %vm455_vm1, %v7452_v29  ;;  %5323 = vmatmul.msk.bf16.vlgmr.msra.gmra.mxu0 %vm455_vm1, %v7507_v43 }
 0x424   : > { %5274 = vmatmul.msk.bf16.gmra.mxu3 %vm455_vm1, %v7539_v5 }
 0x426   : > { %v3854_v32 = vpop.f32.mrf.mxu2 }
 0x427   : > { %v7885_v2 = vadd.f32 %v3970_v37, %v3854_v32  ;;  %v3975_v11 = vpop.f32.mrf.mxu3 }
 0x428   : > { %v7917_v13 = vpop.f32.mrf.mxu0 }
 0x42e   : > { %v3856_v34 = vpop.f32.mrf.mxu2 }
 0x42f   : > { %v7887_v24 = vadd.f32 %v3972_v62, %v3856_v34  ;;  %v3977_v26 = vpop.f32.mrf.mxu3  ;;  %v4630_v34 = vrot.slane %v7854_v15, 5  ;;  %v5321_v15 = vrot.slane %v7839_v27, 9 }
 0x430   : > { %v7923_v16 = vpop.f32.mrf.mxu0 }
 0x433   : > { %5261 = vmatmul.msk.bf16.gmra.mxu2 %vm455_vm1, %v7507_v43  ;;  %5324 = vmatmul.msk.bf16.gmra.mxu0 %vm455_vm1, %v7573_v23 }
 0x434   : > { %5275 = vmatmul.msk.bf16.gmra.mxu3 %vm455_vm1, %v7603_v42 }
 0x436   : > { %v3859_v29 = vpop.f32.mrf.mxu2 }
 0x437   : > { %v7895_v17 = vadd.f32 %v3975_v11, %v3859_v29  ;;  %v3980_v5 = vpop.f32.mrf.mxu3  ;;  %v4632_v29 = vrot.slane %v4630_v34, 4 }
 0x438   : > { %v7933_v14 = vpop.f32.mrf.mxu0 }
 0x43e   : > { %v3861_v61 = vpop.f32.mrf.mxu2 }
 0x43f   : > { %v7897_v19 = vadd.f32 %v3977_v26, %v3861_v61  ;;  %v3982_v30 = vpop.f32.mrf.mxu3 }
 0x440   : > { %v7943_v10 = vpop.f32.mrf.mxu0 }
 0x443   : > { %5262 = vmatmul.msk.bf16.gmra.mxu2 %vm455_vm1, %v7573_v23  ;;  %5325 = vmatmul.msk.bf16.gmra.mxu0 %vm455_vm1, %v7634_v20 }
 0x444   : > { %5276 = vmatmul.msk.bf16.gmra.mxu3 %vm455_vm1, %v7671_v50 }
 0x446   : > { %v3864_v43 = vpop.f32.mrf.mxu2 }
 0x447   : > { %v7905_v33 = vadd.f32 %v3980_v5, %v3864_v43  ;;  %v3985_v4 = vpop.f32.mrf.mxu3 }
 0x448   : > { %v7949_v32 = vpop.f32.mrf.mxu0 }
 0x44e   : > { %v3866_v40 = vpop.f32.mrf.mxu2 }
 0x44f   : > { %v7909_v28 = vadd.f32 %v3982_v30, %v3866_v40  ;;  %v3987_v46 = vpop.f32.mrf.mxu3  ;;  %v4633_v30 = vrot.slane %v7856_v55, 5 }
 0x450   : > { %v7963_v43 = vpop.f32.mrf.mxu0 }
 0x453   : > { %5263 = vmatmul.msk.bf16.gmra.mxu2 %vm455_vm1, %v7634_v20  ;;  %5326 = vmatmul.msk.bf16.gmra.mxu0 %vm455_vm1, %v7702_v57 }
 0x454   : > { %5277 = vmatmul.msk.bf16.gmra.mxu3 %vm455_vm1, %v7725_v41 }
 0x456   : > { %v3869_v23 = vpop.f32.mrf.mxu2 }
 0x457   : > { %v7919_v6 = vadd.f32 %v3985_v4, %v3869_v23  ;;  %v3990_v9 = vpop.f32.mrf.mxu3 }
 0x45e   : > { %v3871_v18 = vpop.f32.mrf.mxu2 }
 0x45f   : > { %v7921_v48 = vadd.f32 %v3987_v46, %v3871_v18  ;;  %v3992_v35 = vpop.f32.mrf.mxu3  ;;  %v7972_v18 = vpop.f32.mrf.mxu0 }
 0x463   : > { %5264 = vmatmul.msk.bf16.gmra.mxu2 %vm455_vm1, %v7702_v57  ;;  %5327 = vmatmul.msk.bf16.gmra.mxu0 %vm455_vm1, %v7749_v22  ;;  %v7941_v57 = vld [vmem:[#allocation2 + $0x60] sm:$0xff] }
 0x464   : > { %5278 = vmatmul.msk.bf16.gmra.mxu3 %vm455_vm1, %v7773_v0 }
 0x466   : > { %v3874_v20 = vpop.f32.mrf.mxu2 }
 0x467   : > { %v7931_v49 = vadd.f32 %v3990_v9, %v3874_v20  ;;  %v3995_v38 = vpop.f32.mrf.mxu3 }
 0x46e   : > { %v3876_v37 = vpop.f32.mrf.mxu2 }
 0x46f   : > { %v7935_v60 = vadd.f32 %v3992_v35, %v3876_v37  ;;  %v3997_v52 = vpop.f32.mrf.mxu3 }
 0x473   : > { %5265 = vmatmul.msk.bf16.gmra.mxu2 %vm455_vm1, %v7749_v22  ;;  %5328 = vmatmul.msk.bf16.gmra.mxu0 %vm455_vm1, %v7807_v58 }
 0x474   : > { %5279 = vmatmul.msk.bf16.gmra.mxu3 %vm455_vm1, %v7941_v57 }
 0x476   : > { %v3879_v51 = vpop.f32.mrf.mxu2 }
 0x477   : > { %v7947_v59 = vadd.f32 %v3995_v38, %v3879_v51  ;;  %v4000_v44 = vpop.f32.mrf.mxu3  ;;  %v5466_v51 = vld [vmem:[#allocation2 + $0x24] sm:$0xff] }
 0x47e   : > { %v3881_v62 = vpop.f32.mrf.mxu2 }
 0x47f   : > { %v7951_v11 = vadd.f32 %v3997_v52, %v3881_v62  ;;  %v4002_v22 = vpop.f32.mrf.mxu3  ;;  %v7991_v62 = vpop.f32.mrf.mxu0 }
 0x483   : > { %5266 = vmatmul.msk.bf16.gmra.mxu2 %vm455_vm1, %v7807_v58  ;;  %5329 = vmatmul.msk.bf16.gmra.mxu0 %vm455_vm1, %v7837_v7  ;;  %v4634_v58 = vsel %vm5846_vm7, %v4632_v29, %v4633_v30  ;;  %v4631_v7 = vsel %vm5846_vm7, %v5321_v15, %v4630_v34 }
 0x484   : > { %5313 = vmatmul.msk.bf16.vlgmr.msra.gmra.mxu3 %vm455_vm1, %v7528_v53  ;;  %v4638_v4 = vunpack.c.l.b16 %v4634_v58  ;;  %v4637_v46 = vunpack.c.l.b16 %v4631_v7 }
 0x486   : > { %v3884_v26 = vpop.f32.mrf.mxu2  ;;  %v4639_v9 = vpack.c.b16 %v4638_v4, %v4637_v46 }
 0x487   : > { %v7960_v5 = vadd.f32 %v4000_v44, %v3884_v26  ;;  %v4209_v61 = vpop.f32.mrf.mxu3 }
 0x48e   : > { %v3886_v40 = vpop.f32.mrf.mxu2 }
 0x48f   : > { %v7970_v53 = vadd.f32 %v4002_v22, %v3886_v40  ;;  %v4211_v23 = vpop.f32.mrf.mxu3 }
 0x493   : > { %5304 = vmatmul.msk.bf16.vlgmr.msra.gmra.mxu2 %vm455_vm1, %v7862_v36  ;;  %5330 = vmatmul.msk.bf16.gmra.mxu0 %vm455_vm1, %v4639_v9 }
 0x494   : > { %5314 = vmatmul.msk.bf16.gmra.mxu3 %vm455_vm1, %v7592_v54 }
 0x496   : > { %v4131_v27 = vpop.f32.mrf.mxu2 }
 0x497   : > { %v4171_v12 = vadd.f32 %v4131_v27, %v7860_v45  ;;  %v4214_v55 = vpop.f32.mrf.mxu3 }
 0x499   : > { %v7980_v35 = vadd.f32 %v4209_v61, %v4171_v12 }
 0x49e   : > { %v4133_v20 = vpop.f32.mrf.mxu2 }
 0x49f   : > { %v4172_v38 = vadd.f32 %v4133_v20, %v7871_v31  ;;  %v4216_v37 = vpop.f32.mrf.mxu3 }
 0x4a1   : > { %v7983_v52 = vadd.f32 %v4211_v23, %v4172_v38 }
 0x4a3   : > { %5305 = vmatmul.msk.bf16.gmra.mxu2 %vm455_vm1, %v5466_v51 }
 0x4a4   : > { %5315 = vmatmul.msk.bf16.gmra.mxu3 %vm455_vm1, %v7658_v8  ;;  %v8000_v8 = vpop.f32.mrf.mxu0 }
 0x4a6   : > { %v4136_v36 = vpop.f32.mrf.mxu2 }
 0x4a7   : > { %v4173_v54 = vadd.f32 %v4136_v36, %v7885_v2  ;;  %v4219_v44 = vpop.f32.mrf.mxu3 }
 0x4a9   : > { %v7989_v45 = vadd.f32 %v4214_v55, %v4173_v54 }
 0x4ac   : > { %v8006_v58 = vpop.f32.mrf.mxu0 }
 0x4ae   : > { %v4138_v22 = vpop.f32.mrf.mxu2 }
 0x4af   : > { %v4174_v31 = vadd.f32 %v4138_v22, %v7887_v24  ;;  %v4221_v34 = vpop.f32.mrf.mxu3 }
 0x4b1   : > { %v7994_v26 = vadd.f32 %v4216_v37, %v4174_v31 }
 0x4b3   : > { %5306 = vmatmul.msk.bf16.gmra.mxu2 %vm455_vm1, %v7603_v42 }
 0x4b4   : > { %5316 = vmatmul.msk.bf16.gmra.mxu3 %vm455_vm1, %v7715_v21  ;;  %v8017_v46 = vpop.f32.mrf.mxu0 }
 0x4b6   : > { %v4141_v2 = vpop.f32.mrf.mxu2 }
 0x4b7   : > { %v4175_v29 = vadd.f32 %v4141_v2, %v7895_v17  ;;  %v4224_v61 = vpop.f32.mrf.mxu3 }
 0x4b9   : > { %v8003_v30 = vadd.f32 %v4219_v44, %v4175_v29 }
 0x4be   : > { %v4143_v15 = vpop.f32.mrf.mxu2 }
 0x4bf   : > { %v4176_v24 = vadd.f32 %v4143_v15, %v7897_v19  ;;  %v4226_v7 = vpop.f32.mrf.mxu3 }
 0x4c1   : > { %v8008_v4 = vadd.f32 %v4221_v34, %v4176_v24 }
 0x4c3   : > { %5307 = vmatmul.msk.bf16.gmra.mxu2 %vm455_vm1, %v7671_v50  ;;  %v8024_v50 = vpop.f32.mrf.mxu0 }
 0x4c4   : > { %5317 = vmatmul.msk.bf16.gmra.mxu3 %vm455_vm1, %v7762_v56 }
 0x4c6   : > { %v4146_v42 = vpop.f32.mrf.mxu2 }
 0x4c7   : > { %v4177_v21 = vadd.f32 %v4146_v42, %v7905_v33  ;;  %v4229_v17 = vpop.f32.mrf.mxu3 }
 0x4c9   : > { %v8015_v40 = vadd.f32 %v4224_v61, %v4177_v21 }
 0x4cb   : > { %v8031_v20 = vpop.f32.mrf.mxu0 }
 0x4ce   : > { %v4148_v19 = vpop.f32.mrf.mxu2 }
 0x4cf   : > { %v4178_v23 = vadd.f32 %v4148_v19, %v7909_v28  ;;  %v4231_v9 = vpop.f32.mrf.mxu3 }
 0x4d1   : > { %v8020_v27 = vadd.f32 %v4226_v7, %v4178_v23 }
 0x4d3   : > { %5308 = vmatmul.msk.bf16.gmra.mxu2 %vm455_vm1, %v7725_v41 }
 0x4d4   : > { %5318 = vmatmul.msk.bf16.gmra.mxu3 %vm455_vm1, %v7816_v3 }
 0x4d6   : > { %v4151_v56 = vpop.f32.mrf.mxu2 }
 0x4d7   : > { %v4179_v33 = vadd.f32 %v4151_v56, %v7919_v6  ;;  %v4234_v12 = vpop.f32.mrf.mxu3  ;;  %v8041_v6 = vpop.f32.mrf.mxu0 }
 0x4d9   : > { %v8029_v55 = vadd.f32 %v4229_v17, %v4179_v33  ;;  %v4349_v33 = vadd.f32 %v7907_v47, %v7980_v35 }
 0x4de   : > { %v4153_v28 = vpop.f32.mrf.mxu2 }
 0x4df   : > { %v4180_v38 = vadd.f32 %v4153_v28, %v7921_v48  ;;  %v4236_v37 = vpop.f32.mrf.mxu3  ;;  %v8048_v34 = vpop.f32.mrf.mxu0 }
 0x4e1   : > { %v8034_v51 = vadd.f32 %v4231_v9, %v4180_v38 }
 0x4e3   : > { %5309 = vmatmul.msk.bf16.gmra.mxu2 %vm455_vm1, %v7773_v0  ;;  %v4393_v0 = vpop.f32.mrf.mxu1 }
 0x4e4   : > { %5319 = vmatmul.msk.bf16.gmra.mxu3 %vm455_vm1, %v7848_v1 }
 0x4e6   : > { %v4156_v41 = vpop.f32.mrf.mxu2 }
 0x4e7   : > { %v4181_v3 = vadd.f32 %v4156_v41, %v7931_v49  ;;  %v4239_v36 = vpop.f32.mrf.mxu3  ;;  %v4655_v29 = vpop.f32.mrf.mxu0 }
 0x4e9   : > { %v8043_v54 = vadd.f32 %v4234_v12, %v4181_v3  ;;  %v4350_v3 = vadd.f32 %v7917_v13, %v7983_v52  ;;  %v4351_v52 = vadd.f32 %v7923_v16, %v7989_v45 }
 0x4eb   : > { %v4395_v24 = vpop.f32.mrf.mxu1 }
 0x4ee   : > { %v4158_v44 = vpop.f32.mrf.mxu2 }
 0x4ef   : > { %v4182_v48 = vadd.f32 %v4158_v44, %v7935_v60  ;;  %v4241_v22 = vpop.f32.mrf.mxu3  ;;  %v4657_v25 = vpop.f32.mrf.mxu0  ;;  %v4434_v44 = vadd.f32 %v4395_v24, %v4350_v3 }
 0x4f1   : > { %v8046_v31 = vadd.f32 %v4236_v37, %v4182_v48 }
 0x4f3   : > { %5310 = vmatmul.msk.bf16.gmra.mxu2 %vm455_vm1, %v7941_v57  ;;  %v4398_v17 = vpop.f32.mrf.mxu1 }
 0x4f4   : > { %5320 = vmatmul.msk.bf16.gmra.mxu3 %vm455_vm1, %v4555_v39 }
 0x4f6   : > { %v4161_v1 = vpop.f32.mrf.mxu2 }
 0x4f7   : > { %v4183_v49 = vadd.f32 %v4161_v1, %v7947_v59  ;;  %v4244_v2 = vpop.f32.mrf.mxu3  ;;  %v4660_v23 = vpop.f32.mrf.mxu0 }
 0x4f9   : > { %v8057_v60 = vadd.f32 %v4239_v36, %v4183_v49 }
 0x4fb   : > { %v4400_v12 = vpop.f32.mrf.mxu1 }
 0x4fe   : > { %v4163_v61 = vpop.f32.mrf.mxu2 }
 0x4ff   : > { %v4184_v15 = vadd.f32 %v4163_v61, %v7951_v11  ;;  %v4246_v7 = vpop.f32.mrf.mxu3  ;;  %v4662_v36 = vpop.f32.mrf.mxu0 }
 0x501   : > { %v8060_v57 = vadd.f32 %v4241_v22, %v4184_v15  ;;  %v4435_v15 = vadd.f32 %v4398_v17, %v4351_v52 }
 0x503   : > { %5311 = vmatmul.msk.bf16.gmra.mxu2 %vm455_vm1, %v5368_v63  ;;  %v4403_v48 = vpop.f32.mrf.mxu1 }
 0x506   : > { %v4166_v39 = vpop.f32.mrf.mxu2 }
 0x507   : > { %v4185_v59 = vadd.f32 %v4166_v39, %v7960_v5  ;;  %v4571_v42 = vpop.f32.mrf.mxu3  ;;  %v4433_v5 = vadd.f32 %v4393_v0, %v4349_v33 }
 0x509   : > { %v8064_v21 = vadd.f32 %v4244_v2, %v4185_v59 }
 0x50b   : > { %v4405_v39 = vpop.f32.mrf.mxu1 }
 0x50e   : > { %v4168_v19 = vpop.f32.mrf.mxu2 }
 0x50f   : > { %v4186_v11 = vadd.f32 %v4168_v19, %v7970_v53  ;;  %v4573_v9 = vpop.f32.mrf.mxu3  ;;  %v8077_v53 = vld [vmem:[%s8183_s6] ss:$0 sm:$0xff]  ;;  %v4352_v19 = vadd.f32 %v7933_v14, %v7994_v26 }
 0x511   : > { %v8068_v56 = vadd.f32 %v4246_v7, %v4186_v11  ;;  %v4436_v45 = vadd.f32 %v4400_v12, %v4352_v19 }
 0x516   : > { %v4471_v28 = vpop.f32.mrf.mxu2 }
 0x517   : > { %v4511_v38 = vadd.f32 %v4471_v28, %v4433_v5  ;;  %v4576_v37 = vpop.f32.mrf.mxu3 }
 0x519   : > { %v4611_v41 = vadd.f32 %v4571_v42, %v4511_v38  ;;  %v4353_v38 = vadd.f32 %v7943_v10, %v8003_v30 }
 0x51b   : > { %v4695_v47 = vadd.f32 %v4655_v29, %v4611_v41  ;;  %v4665_v29 = vpop.f32.mrf.mxu0  ;;  %v4437_v26 = vadd.f32 %v4403_v48, %v4353_v38 }
 0x51d   : > { %v4715_v35 = vadd.f32 %v8077_v53, %v4695_v47 }
 0x51e   : > { %v4473_v22 = vpop.f32.mrf.mxu2 }
 0x51f   : > { %v4731_v0 = vmax.f32 %v4715_v35, 0.0  ;;  %v4512_v1 = vadd.f32 %v4473_v22, %v4434_v44  ;;  %v4578_v49 = vpop.f32.mrf.mxu3  ;;  %v4354_v22 = vadd.f32 %v7949_v32, %v8008_v4 }
 0x521   : > { %4747 = vst.msk [vmem:[%s8085_s23] sm:$0xff] %vm455_vm1, %v4731_v0  ;;  %v4612_v13 = vadd.f32 %v4573_v9, %v4512_v1  ;;  %v4438_v30 = vadd.f32 %v4405_v39, %v4354_v22 }
 0x523   : > { %v4696_v2 = vadd.f32 %v4657_v25, %v4612_v13  ;;  %v4667_v25 = vpop.f32.mrf.mxu0 }
 0x525   : > { %v4716_v61 = vadd.f32 %v8077_v53, %v4696_v2  ;;  %v4355_v2 = vadd.f32 %v7963_v43, %v8015_v40 }
 0x526   : > { %v4476_v24 = vpop.f32.mrf.mxu2 }
 0x527   : > { %v4732_v7 = vmax.f32 %v4716_v61, 0.0  ;;  %v4513_v63 = vadd.f32 %v4476_v24, %v4435_v15  ;;  %v4581_v59 = vpop.f32.mrf.mxu3 }
 0x529   : > { %4748 = vst.msk [vmem:[%s8085_s23 + $0x8] sm:$0xff] %vm455_vm1, %v4732_v7  ;;  %v4613_v42 = vadd.f32 %v4576_v37, %v4513_v63  ;;  %v4408_v37 = vpop.f32.mrf.mxu1 }
 0x52a   : > { %v4439_v4 = vadd.f32 %v4408_v37, %v4355_v2 }
 0x52b   : > { %v4697_v11 = vadd.f32 %v4660_v23, %v4613_v42  ;;  %v4670_v47 = vpop.f32.mrf.mxu0 }
 0x52d   : > { %v4717_v16 = vadd.f32 %v8077_v53, %v4697_v11 }
 0x52e   : > { %v4478_v9 = vpop.f32.mrf.mxu2 }
 0x52f   : > { %v4733_v17 = vmax.f32 %v4717_v16, 0.0  ;;  %v4514_v33 = vadd.f32 %v4478_v9, %v4436_v45  ;;  %v4583_v5 = vpop.f32.mrf.mxu3 }
 0x531   : > { %4749 = vst.msk [vmem:[%s8085_s23 + $0x10] sm:$0xff] %vm455_vm1, %v4733_v17  ;;  %v4614_v28 = vadd.f32 %v4578_v49, %v4514_v33  ;;  %v4410_v1 = vpop.f32.mrf.mxu1  ;;  %v4357_v33 = vadd.f32 %v7991_v62, %v8029_v55 }
 0x533   : > { %v4698_v41 = vadd.f32 %v4662_v36, %v4614_v28  ;;  %v4672_v61 = vpop.f32.mrf.mxu0 }
 0x535   : > { %v4718_v14 = vadd.f32 %v8077_v53, %v4698_v41 }
 0x536   : > { %v4481_v23 = vpop.f32.mrf.mxu2 }
 0x537   : > { %v4734_v12 = vmax.f32 %v4718_v14, 0.0  ;;  %v4515_v3 = vadd.f32 %v4481_v23, %v4437_v26  ;;  %v4586_v35 = vpop.f32.mrf.mxu3  ;;  %v4358_v23 = vadd.f32 %v8000_v8, %v8034_v51 }
 0x539   : > { %4750 = vst.msk [vmem:[%s8085_s23 + $0x18] sm:$0xff] %vm455_vm1, %v4734_v12  ;;  %v4615_v44 = vadd.f32 %v4581_v59, %v4515_v3  ;;  %v4356_v59 = vadd.f32 %v7972_v18, %v8020_v27 }
 0x53b   : > { %v4699_v0 = vadd.f32 %v4665_v29, %v4615_v44  ;;  %v4413_v29 = vpop.f32.mrf.mxu1  ;;  %v4675_v11 = vpop.f32.mrf.mxu0  ;;  %v4440_v40 = vadd.f32 %v4410_v1, %v4356_v59 }
 0x53c   : > { %v4441_v27 = vadd.f32 %v4413_v29, %v4357_v33 }
 0x53d   : > { %v4719_v10 = vadd.f32 %v8077_v53, %v4699_v0 }
 0x53e   : > { %v4483_v36 = vpop.f32.mrf.mxu2 }
 0x53f   : > { %v4735_v48 = vmax.f32 %v4719_v10, 0.0  ;;  %v4516_v49 = vadd.f32 %v4483_v36, %v4438_v30  ;;  %v4588_v13 = vpop.f32.mrf.mxu3  ;;  %v4359_v10 = vadd.f32 %v8006_v58, %v8043_v54 }
 0x541   : > { %4751 = vst.msk [vmem:[%s8085_s23 + $0x20] sm:$0xff] %vm455_vm1, %v4735_v48  ;;  %v4616_v52 = vadd.f32 %v4583_v5, %v4516_v49 }
 0x543   : > { %v4700_v15 = vadd.f32 %v4667_v25, %v4616_v52  ;;  %v4415_v9 = vpop.f32.mrf.mxu1  ;;  %v4677_v38 = vpop.f32.mrf.mxu0 }
 0x544   : > { %v4442_v55 = vadd.f32 %v4415_v9, %v4358_v23 }
 0x545   : > { %v4720_v32 = vadd.f32 %v8077_v53, %v4700_v15 }
 0x546   : > { %v4486_v24 = vpop.f32.mrf.mxu2 }
 0x547   : > { %v4736_v7 = vmax.f32 %v4720_v32, 0.0  ;;  %v4517_v63 = vadd.f32 %v4486_v24, %v4439_v4  ;;  %v4591_v42 = vpop.f32.mrf.mxu3 }
 0x549   : > { %4752 = vst.msk [vmem:[%s8085_s23 + $0x28] sm:$0xff] %vm455_vm1, %v4736_v7  ;;  %v4617_v39 = vadd.f32 %v4586_v35, %v4517_v63 }
 0x54b   : > { %v4701_v19 = vadd.f32 %v4670_v47, %v4617_v39  ;;  %v4418_v12 = vpop.f32.mrf.mxu1  ;;  %v4680_v0 = vpop.f32.mrf.mxu0  ;;  %v4361_v39 = vadd.f32 %v8024_v50, %v8057_v60 }
 0x54c   : > { %v4443_v51 = vadd.f32 %v4418_v12, %v4359_v10 }
 0x54d   : > { %v4721_v43 = vadd.f32 %v8077_v53, %v4701_v19 }
 0x54e   : > { %v4488_v16 = vpop.f32.mrf.mxu2 }
 0x54f   : > { %v4737_v45 = vmax.f32 %v4721_v43, 0.0  ;;  %v4518_v25 = vadd.f32 %v4488_v16, %v4440_v40  ;;  %v4593_v28 = vpop.f32.mrf.mxu3 }
 0x551   : > { %4753 = vst.msk [vmem:[%s8085_s23 + $0x30] sm:$0xff] %vm455_vm1, %v4737_v45  ;;  %v4618_v17 = vadd.f32 %v4588_v13, %v4518_v25  ;;  %v4362_v25 = vadd.f32 %v8031_v20, %v8060_v57 }
 0x553   : > { %v4702_v5 = vadd.f32 %v4672_v61, %v4618_v17  ;;  %v4420_v36 = vpop.f32.mrf.mxu1  ;;  %v4360_v61 = vadd.f32 %v8017_v46, %v8046_v31  ;;  %v4682_v15 = vpop.f32.mrf.mxu0 }
 0x555   : > { %v4722_v18 = vadd.f32 %v8077_v53, %v4702_v5  ;;  %v4444_v54 = vadd.f32 %v4420_v36, %v4360_v61 }
 0x556   : > { %v4491_v37 = vpop.f32.mrf.mxu2 }
 0x557   : > { %v4738_v41 = vmax.f32 %v4722_v18, 0.0  ;;  %v4519_v14 = vadd.f32 %v4491_v37, %v4441_v27  ;;  %v4596_v47 = vpop.f32.mrf.mxu3 }
 0x559   : > { %4754 = vst.msk [vmem:[%s8085_s23 + $0x38] sm:$0xff] %vm455_vm1, %v4738_v41  ;;  %v4619_v26 = vadd.f32 %v4591_v42, %v4519_v14 }
 0x55b   : > { %v4703_v3 = vadd.f32 %v4675_v11, %v4619_v26  ;;  %v4423_v4 = vpop.f32.mrf.mxu1  ;;  %v4685_v19 = vpop.f32.mrf.mxu0 }
 0x55c   : > { %v4445_v31 = vadd.f32 %v4423_v4, %v4361_v39 }
 0x55d   : > { %v4723_v62 = vadd.f32 %v8077_v53, %v4703_v3 }
 0x55e   : > { %v4493_v35 = vpop.f32.mrf.mxu2 }
 0x55f   : > { %v4739_v44 = vmax.f32 %v4723_v62, 0.0  ;;  %v4520_v22 = vadd.f32 %v4493_v35, %v4442_v55  ;;  %v4598_v52 = vpop.f32.mrf.mxu3  ;;  %v4364_v55 = vadd.f32 %v8048_v34, %v8068_v56 }
 0x561   : > { %4755 = vst.msk [vmem:[%s8085_s23 + $0x40] sm:$0xff] %vm455_vm1, %v4739_v44  ;;  %v4620_v1 = vadd.f32 %v4593_v28, %v4520_v22 }
 0x563   : > { %v4704_v30 = vadd.f32 %v4677_v38, %v4620_v1  ;;  %v4425_v16 = vpop.f32.mrf.mxu1  ;;  %v4687_v33 = vpop.f32.mrf.mxu0  ;;  %v4363_v38 = vadd.f32 %v8041_v6, %v8064_v21 }
 0x564   : > { %v4446_v60 = vadd.f32 %v4425_v16, %v4362_v25 }
 0x565   : > { %v4724_v8 = vadd.f32 %v8077_v53, %v4704_v30 }
 0x566   : > { %v4496_v48 = vpop.f32.mrf.mxu2 }
 0x567   : > { %v4740_v49 = vmax.f32 %v4724_v8, 0.0  ;;  %v4521_v13 = vadd.f32 %v4496_v48, %v4443_v51  ;;  %v4601_v59 = vpop.f32.mrf.mxu3 }
 0x569   : > { %4756 = vst.msk [vmem:[%s8085_s23 + $0x48] sm:$0xff] %vm455_vm1, %v4740_v49  ;;  %v4621_v2 = vadd.f32 %v4596_v47, %v4521_v13 }
 0x56b   : > { %v4705_v32 = vadd.f32 %v4680_v0, %v4621_v2  ;;  %v4428_v37 = vpop.f32.mrf.mxu1  ;;  %v4690_v3 = vpop.f32.mrf.mxu0 }
 0x56c   : > { %v4447_v57 = vadd.f32 %v4428_v37, %v4363_v38 }
 0x56d   : > { %v4725_v58 = vadd.f32 %v8077_v53, %v4705_v32 }
 0x56e   : > { %v4498_v29 = vpop.f32.mrf.mxu2 }
 0x56f   : > { %v4741_v24 = vmax.f32 %v4725_v58, 0.0  ;;  %v4522_v7 = vadd.f32 %v4498_v29, %v4444_v54  ;;  %v4603_v17 = vpop.f32.mrf.mxu3 }
 0x571   : > { %4757 = vst.msk [vmem:[%s8085_s23 + $0x50] sm:$0xff] %vm455_vm1, %v4741_v24  ;;  %v4622_v63 = vadd.f32 %v4598_v52, %v4522_v7 }
 0x573   : > { %v4706_v42 = vadd.f32 %v4682_v15, %v4622_v63  ;;  %v4430_v6 = vpop.f32.mrf.mxu1  ;;  %v4692_v30 = vpop.f32.mrf.mxu0 }
 0x574   : > { %v4448_v35 = vadd.f32 %v4430_v6, %v4364_v55 }
 0x575   : > { %v4726_v46 = vadd.f32 %v8077_v53, %v4706_v42 }
 0x576   : > { %v4501_v11 = vpop.f32.mrf.mxu2 }
 0x577   : > { %v4742_v43 = vmax.f32 %v4726_v46, 0.0  ;;  %v4523_v40 = vadd.f32 %v4501_v11, %v4445_v31  ;;  %v4606_v14 = vpop.f32.mrf.mxu3 }
 0x579   : > { %4758 = vst.msk [vmem:[%s8085_s23 + $0x58] sm:$0xff] %vm455_vm1, %v4742_v43  ;;  %v4623_v45 = vadd.f32 %v4601_v59, %v4523_v40 }
 0x57b   : > { %v4707_v9 = vadd.f32 %v4685_v19, %v4623_v45 }
 0x57d   : > { %v4727_v50 = vadd.f32 %v8077_v53, %v4707_v9 }
 0x57e   : > { %v4503_v5 = vpop.f32.mrf.mxu2 }
 0x57f   : > { %v4743_v28 = vmax.f32 %v4727_v50, 0.0  ;;  %v4524_v18 = vadd.f32 %v4503_v5, %v4446_v60  ;;  %v4608_v1 = vpop.f32.mrf.mxu3 }
 0x581   : > { %4759 = vst.msk [vmem:[%s8085_s23 + $0x60] sm:$0xff] %vm455_vm1, %v4743_v28  ;;  %v4624_v27 = vadd.f32 %v4603_v17, %v4524_v18 }
 0x583   : > { %v4708_v41 = vadd.f32 %v4687_v33, %v4624_v27 }
 0x585   : > { %v4728_v20 = vadd.f32 %v8077_v53, %v4708_v41 }
 0x586   : > { %v4506_v26 = vpop.f32.mrf.mxu2 }
 0x587   : > { %v4744_v23 = vmax.f32 %v4728_v20, 0.0  ;;  %v4525_v12 = vadd.f32 %v4506_v26, %v4447_v57 }
 0x589   : > { %4760 = vst.msk [vmem:[%s8085_s23 + $0x68] sm:$0xff] %vm455_vm1, %v4744_v23  ;;  %v4625_v62 = vadd.f32 %v4606_v14, %v4525_v12 }
 0x58b   : > { %v4709_v47 = vadd.f32 %v4690_v3, %v4625_v62 }
 0x58d   : > { %v4729_v21 = vadd.f32 %v8077_v53, %v4709_v47 }
 0x58e   : > { %v4508_v44 = vpop.f32.mrf.mxu2 }
 0x58f   : > { %v4745_v22 = vmax.f32 %v4729_v21, 0.0  ;;  %v4526_v0 = vadd.f32 %v4508_v44, %v4448_v35 }
 0x591   : > { %4761 = vst.msk [vmem:[%s8085_s23 + $0x70] sm:$0xff] %vm455_vm1, %v4745_v22  ;;  %v4626_v10 = vadd.f32 %v4608_v1, %v4526_v0 }
 0x593   : > { %v4710_v36 = vadd.f32 %v4692_v30, %v4626_v10 }
 0x595   : > { %v4730_v8 = vadd.f32 %v8077_v53, %v4710_v36 }
 0x597   : > { %v4746_v51 = vmax.f32 %v4730_v8, 0.0 }
 0x599   : > { %4762 = vst.msk [vmem:[%s8085_s23 + $0x78] sm:$0xff] %vm455_vm1, %v4746_v51 }
 0x59a PF: > { %s17_s28 = sadd.s32 1, %s5505_s28   ;;  %s8373_s24 = smov %s5497_s26 }
 0x59b   : > { %p14_p7 = scmp.ge.s32.totalorder %s17_s28, 6   ;;  %s8374_s25 = smov %s5501_s27 }
 0x59c   : > { %s8375_s26 = smov %s8378_s29  ;;  %s8376_s27 = smov %s8382_s30 }
 0x59d   :  { %16 = sbr.rel (!%p14_p7) target bundleno = 3 (0x3), region = 107 }

</bundles_post_ra>
